<compile_context>
chip_gen: v7x
topology: tpu7x:2x2x1
jax: 0.10.0
libtpu: 0.0.40
codegen_flags: <defaults>
</compile_context>

<pallas_src>
import functools

import jax
import jax.numpy as jnp
from jax import lax
from jax.experimental import pallas as pl
from jax.experimental.pallas import tpu as pltpu


def _fill_im2col(col_ref, x_cm, mask_ref, H, W):
    """Stage the 27-tap im2col matrix of x_cm into col_ref.

    x_cm    : (C, M) f32 value, flat spatial (w fastest) on the lane axis.
    mask_ref: (27, M) f32 ref of 0/1 halo-validity masks (tap-major, same order
              as the loop below and the flattened weight layout).
    col_ref : (27*C, M) f32 VMEM scratch; row t*C + c = channel c shifted by tap t.
    """
    C, M = x_cm.shape
    # Doubled copy: a circular shift becomes a static, unambiguous lane slice:
    #   xx[:, s : s + M][:, m] == x[:, (m + off) % M]   with  s = off % M.
    xx = jnp.concatenate([x_cm, x_cm], axis=1)                # (C, 2*M)
    t = 0
    for dd in (-1, 0, 1):
        for dh in (-1, 0, 1):
            for dw in (-1, 0, 1):
                off = (dd * H + dh) * W + dw                  # flat-index offset of tap
                start = off % M
                shifted = xx[:, start:start + M]              # (C, M)
                col_ref[t * C:(t + 1) * C, :] = shifted * mask_ref[t:t + 1, :]
                t += 1


def _instnorm_lrelu(acc, gamma, beta):
    """InstanceNorm3d (biased var, eps=1e-5, affine) + LeakyReLU(0.01), all f32.

    acc: (C, M) f32; gamma/beta: (C, 1) f32.  One-pass sum / sum-of-squares stats.
    """
    inv_m = 1.0 / acc.shape[1]
    mean = jnp.sum(acc, axis=1, keepdims=True) * inv_m
    ex2 = jnp.sum(acc * acc, axis=1, keepdims=True) * inv_m
    var = jnp.maximum(ex2 - mean * mean, 0.0)
    inv_std = lax.rsqrt(var + 1e-5)
    y = (acc - mean) * (inv_std * gamma) + beta
    return jnp.where(y >= 0, y, 0.01 * y)


def _double_conv_kernel(x_ref, mask_ref,
                        w1_ref, b1_ref, g1_ref, be1_ref,
                        w2_ref, b2_ref, g2_ref, be2_ref,
                        o_ref, col1_ref, col2_ref, *, H, W):
    # ---- stage 1: conv1 + IN1 + LeakyReLU ------------------------------------
    _fill_im2col(col1_ref, x_ref[0], mask_ref, H, W)          # (27*Cin, M)
    acc1 = jnp.dot(w1_ref[...],                               # bf16 weights
                   col1_ref[...].astype(jnp.bfloat16),        # bf16 im2col
                   preferred_element_type=jnp.float32)        # (Cout, M) f32
    acc1 = acc1 + b1_ref[...]
    y1 = _instnorm_lrelu(acc1, g1_ref[...], be1_ref[...])     # (Cout, M) f32

    # ---- stage 2: conv2 + IN2 + LeakyReLU (y1 never leaves VMEM) -------------
    _fill_im2col(col2_ref, y1, mask_ref, H, W)                # (27*Cout, M)
    acc2 = jnp.dot(w2_ref[...],
                   col2_ref[...].astype(jnp.bfloat16),
                   preferred_element_type=jnp.float32)
    acc2 = acc2 + b2_ref[...]
    y2 = _instnorm_lrelu(acc2, g2_ref[...], be2_ref[...])

    o_ref[0] = y2.astype(o_ref.dtype)                         # lane-dense full store


def _tap_masks(D, H, W):
    """(27, D*H*W) f32 0/1 masks: validity of each 3x3x3 tap under padding=1."""
    d = jnp.arange(D)[:, None, None]
    h = jnp.arange(H)[None, :, None]
    w = jnp.arange(W)[None, None, :]
    masks = []
    for dd in (-1, 0, 1):
        for dh in (-1, 0, 1):
            for dw in (-1, 0, 1):
                ok = ((d + dd >= 0) & (d + dd < D) &
                      (h + dh >= 0) & (h + dh < H) &
                      (w + dw >= 0) & (w + dw < W))
                masks.append(ok.reshape(-1))
    return jnp.stack(masks, axis=0).astype(jnp.float32)


def _taps_matrix(w):
    """(Cout, Cin, 3, 3, 3) torch conv weight -> (Cout, 27*Cin) bf16, tap-major K.

    K index = tap*Cin + cin with tap = (kd*3 + kh)*3 + kw, matching _fill_im2col
    (kd,kh,kw) == (dd,dh,dw) + 1.
    """
    cout, cin = w.shape[0], w.shape[1]
    return jnp.transpose(w, (0, 2, 3, 4, 1)).reshape(cout, 27 * cin).astype(
        jnp.bfloat16)


def _pad_axis_to(a, axis, size):
    pad = size - a.shape[axis]
    if pad == 0:
        return a
    widths = [(0, 0)] * a.ndim
    widths[axis] = (0, pad)
    return jnp.pad(a, widths)


@jax.jit
def double_conv(x_ncdhw, params):
    """DoubleConv forward. Input/output: NCDHW (PyTorch convention)."""
    N, Cin, D, H, W = x_ncdhw.shape
    Cout = params["w1"].shape[0]
    M = D * H * W
    rnd8 = lambda c: -(-c // 8) * 8
    Cin_p, Cout_p = rnd8(Cin), rnd8(Cout)

    # Channels-first -> flat lane-dense (C, M); zero-pad channels to a multiple of
    # 8 so every im2col scratch write is an aligned 8-sublane store.  Padded
    # channels carry zero data / zero weights / zero affine params => results are
    # unchanged (padded IN channels stay exactly 0, no NaNs).
    x_flat = _pad_axis_to(x_ncdhw.reshape(N, Cin, M).astype(jnp.float32), 1, Cin_p)
    mask = _tap_masks(D, H, W)                                           # (27, M)
    w1 = _taps_matrix(_pad_axis_to(_pad_axis_to(params["w1"], 1, Cin_p), 0, Cout_p))
    w2 = _taps_matrix(_pad_axis_to(_pad_axis_to(params["w2"], 1, Cout_p), 0, Cout_p))
    colv = lambda v: _pad_axis_to(v.astype(jnp.float32), 0, Cout_p).reshape(Cout_p, 1)
    b1, g1, be1 = colv(params["b1"]), colv(params["g1"]), colv(params["be1"])
    b2, g2, be2 = colv(params["b2"]), colv(params["g2"]), colv(params["be2"])

    rep = lambda n: (0, 0)   # grid-invariant operands stay resident in VMEM

    out_flat = pl.pallas_call(
        functools.partial(_double_conv_kernel, H=H, W=W),
        out_shape=jax.ShapeDtypeStruct((N, Cout_p, M), x_ncdhw.dtype),
        grid_spec=pltpu.PrefetchScalarGridSpec(
            num_scalar_prefetch=0,
            grid=(N,),
            in_specs=[
                pl.BlockSpec((1, Cin_p, M), lambda n: (n, 0, 0)),
                pl.BlockSpec((27, M), rep),
                pl.BlockSpec((Cout_p, 27 * Cin_p), rep),
                pl.BlockSpec((Cout_p, 1), rep),
                pl.BlockSpec((Cout_p, 1), rep),
                pl.BlockSpec((Cout_p, 1), rep),
                pl.BlockSpec((Cout_p, 27 * Cout_p), rep),
                pl.BlockSpec((Cout_p, 1), rep),
                pl.BlockSpec((Cout_p, 1), rep),
                pl.BlockSpec((Cout_p, 1), rep),
            ],
            out_specs=pl.BlockSpec((1, Cout_p, M), lambda n: (n, 0, 0)),
            scratch_shapes=[
                pltpu.VMEM((27 * Cin_p, M), jnp.float32),    # im2col, stage 1
                pltpu.VMEM((27 * Cout_p, M), jnp.float32),   # im2col, stage 2
            ],
        ),
        compiler_params=pltpu.CompilerParams(
            dimension_semantics=("parallel",),
            vmem_limit_bytes=32 * 1024 * 1024,
        ),
    )(x_flat, mask, w1, b1, g1, be1, w2, b2, g2, be2)

    return out_flat[:, :Cout, :].reshape(N, Cout, D, H, W)


def _ref_forward(x, params, matmul_dtype=jnp.float32):
    """Pure-JAX reference mirroring the PyTorch module.  matmul_dtype=bfloat16
    reproduces the kernel's bf16-operand / f32-accumulate matmul numerics."""
    def stage(x, w, b, g, be):
        y = lax.conv_general_dilated(
            x.astype(matmul_dtype), w.astype(matmul_dtype),
            window_strides=(1, 1, 1),
            padding=((1, 1), (1, 1), (1, 1)),
            dimension_numbers=("NCDHW", "OIDHW", "NCDHW"),
            preferred_element_type=jnp.float32)
        y = y + b[None, :, None, None, None]
        mean = jnp.mean(y, axis=(2, 3, 4), keepdims=True)
        var = jnp.mean(jnp.square(y - mean), axis=(2, 3, 4), keepdims=True)
        y = (y - mean) * lax.rsqrt(var + 1e-5)
        y = y * g[None, :, None, None, None] + be[None, :, None, None, None]
        return jnp.where(y >= 0, y, 0.01 * y)

    y = stage(x, params["w1"], params["b1"], params["g1"], params["be1"])
    y = stage(y, params["w2"], params["b2"], params["g2"], params["be2"])
    return y


if __name__ == "__main__":
    N, Cin, Cout = 2, 4, 8
    D = H = W = 8

    key = jax.random.PRNGKey(0)
    ks = jax.random.split(key, 9)
    params = {
        "w1": 0.1 * jax.random.normal(ks[0], (Cout, Cin, 3, 3, 3), jnp.float32),
        "b1": 0.1 * jax.random.normal(ks[1], (Cout,), jnp.float32),
        "g1": 1.0 + 0.1 * jax.random.normal(ks[2], (Cout,), jnp.float32),
        "be1": 0.1 * jax.random.normal(ks[3], (Cout,), jnp.float32),
        "w2": 0.1 * jax.random.normal(ks[4], (Cout, Cout, 3, 3, 3), jnp.float32),
        "b2": 0.1 * jax.random.normal(ks[5], (Cout,), jnp.float32),
        "g2": 1.0 + 0.1 * jax.random.normal(ks[6], (Cout,), jnp.float32),
        "be2": 0.1 * jax.random.normal(ks[7], (Cout,), jnp.float32),
    }
    x = jax.random.normal(ks[8], (N, Cin, D, H, W), jnp.float32)

    out = jax.block_until_ready(double_conv(x, params))
    assert out.shape == (N, Cout, D, H, W), out.shape
    assert bool(jnp.all(jnp.isfinite(out)))

    # Check vs a reference mirroring the kernel's bf16-operand matmuls.
    ref_bf = jax.block_until_ready(_ref_forward(x, params, jnp.bfloat16))
    err_bf = float(jnp.max(jnp.abs(out - ref_bf)))
    assert err_bf < 2e-2, err_bf

    # Loose check vs the full-f32 PyTorch-equivalent reference.
    ref_f32 = jax.block_until_ready(_ref_forward(x, params, jnp.float32))
    err_f32 = float(jnp.max(jnp.abs(out - ref_f32)))
    assert err_f32 < 1.5e-1, err_f32

    print("KERNEL_OK")
</pallas_src>

<mosaic_0001>
module attributes {stable_mosaic.version = 11 : i64} {
  func.func @_double_conv_kernel(%arg0: i32, %arg1: memref<1x8x512xf32, #tpu.memory_space<vmem>>, %arg2: memref<27x512xf32, #tpu.memory_space<vmem>>, %arg3: memref<8x216xbf16, #tpu.memory_space<vmem>>, %arg4: memref<8x1xf32, #tpu.memory_space<vmem>>, %arg5: memref<8x1xf32, #tpu.memory_space<vmem>>, %arg6: memref<8x1xf32, #tpu.memory_space<vmem>>, %arg7: memref<8x216xbf16, #tpu.memory_space<vmem>>, %arg8: memref<8x1xf32, #tpu.memory_space<vmem>>, %arg9: memref<8x1xf32, #tpu.memory_space<vmem>>, %arg10: memref<8x1xf32, #tpu.memory_space<vmem>>, %arg11: memref<1x8x512xf32, #tpu.memory_space<vmem>>, %arg12: memref<216x512xf32, #tpu.memory_space<vmem>>, %arg13: memref<216x512xf32, #tpu.memory_space<vmem>>) attributes {dimension_semantics = [#tpu.dimension_semantics<parallel>], iteration_bounds = array<i64: 2>, scalar_prefetch = 0 : i64, scratch_operands = 2 : i64, tpu.core_type = #tpu.core_type<tc>, window_params = [{transform_indices = @transform_0, window_bounds = array<i64: 1, 8, 512>}, {pipeline_mode = #tpu.pipeline_mode<synchronous>, transform_indices = @transform_1, window_bounds = array<i64: 27, 512>}, {pipeline_mode = #tpu.pipeline_mode<synchronous>, transform_indices = @transform_2, window_bounds = array<i64: 8, 216>}, {pipeline_mode = #tpu.pipeline_mode<synchronous>, transform_indices = @transform_3, window_bounds = array<i64: 8, 1>}, {pipeline_mode = #tpu.pipeline_mode<synchronous>, transform_indices = @transform_4, window_bounds = array<i64: 8, 1>}, {pipeline_mode = #tpu.pipeline_mode<synchronous>, transform_indices = @transform_5, window_bounds = array<i64: 8, 1>}, {pipeline_mode = #tpu.pipeline_mode<synchronous>, transform_indices = @transform_6, window_bounds = array<i64: 8, 216>}, {pipeline_mode = #tpu.pipeline_mode<synchronous>, transform_indices = @transform_7, window_bounds = array<i64: 8, 1>}, {pipeline_mode = #tpu.pipeline_mode<synchronous>, transform_indices = @transform_8, window_bounds = array<i64: 8, 1>}, {pipeline_mode = #tpu.pipeline_mode<synchronous>, transform_indices = @transform_9, window_bounds = array<i64: 8, 1>}, {transform_indices = @transform_10, window_bounds = array<i64: 1, 8, 512>}]} {
    %c0 = arith.constant 0 : index
    %c0_0 = arith.constant 0 : index
    %c0_1 = arith.constant 0 : index
    %0 = vector.load %arg1[%c0, %c0_0, %c0_1] : memref<1x8x512xf32, #tpu.memory_space<vmem>>, vector<1x8x512xf32>
    %1 = vector.shape_cast %0 : vector<1x8x512xf32> to vector<8x512xf32>
    %2 = tpu.concatenate %1, %1 in 1 : vector<8x512xf32>, vector<8x512xf32> -> vector<8x1024xf32>
    %3 = vector.extract_strided_slice %2 {offsets = [0, 439], sizes = [8, 512], strides = [1, 1]} : vector<8x1024xf32> to vector<8x512xf32>
    %c0_2 = arith.constant 0 : index
    %c0_3 = arith.constant 0 : index
    %4 = vector.load %arg2[%c0_2, %c0_3] : memref<27x512xf32, #tpu.memory_space<vmem>>, vector<1x512xf32>
    %5 = vector.broadcast %4 : vector<1x512xf32> to vector<8x512xf32>
    %6 = arith.mulf %3, %5 : vector<8x512xf32>
    %c0_4 = arith.constant 0 : index
    %c0_5 = arith.constant 0 : index
    %7 = vector.load %arg12[%c0_4, %c0_5] : memref<216x512xf32, #tpu.memory_space<vmem>>, vector<8x512xf32>
    tpu.vector_store %arg12[%c0_4, %c0_5], %6 {strides = array<i32>} : memref<216x512xf32, #tpu.memory_space<vmem>>, vector<8x512xf32>,
    %8 = vector.extract_strided_slice %2 {offsets = [0, 440], sizes = [8, 512], strides = [1, 1]} : vector<8x1024xf32> to vector<8x512xf32>
    %c1 = arith.constant 1 : index
    %c0_6 = arith.constant 0 : index
    %9 = vector.load %arg2[%c1, %c0_6] : memref<27x512xf32, #tpu.memory_space<vmem>>, vector<1x512xf32>
    %10 = vector.broadcast %9 : vector<1x512xf32> to vector<8x512xf32>
    %11 = arith.mulf %8, %10 : vector<8x512xf32>
    %c8 = arith.constant 8 : index
    %c0_7 = arith.constant 0 : index
    %12 = vector.load %arg12[%c8, %c0_7] : memref<216x512xf32, #tpu.memory_space<vmem>>, vector<8x512xf32>
    tpu.vector_store %arg12[%c8, %c0_7], %11 {strides = array<i32>} : memref<216x512xf32, #tpu.memory_space<vmem>>, vector<8x512xf32>,
    %13 = vector.extract_strided_slice %2 {offsets = [0, 441], sizes = [8, 512], strides = [1, 1]} : vector<8x1024xf32> to vector<8x512xf32>
    %c2 = arith.constant 2 : index
    %c0_8 = arith.constant 0 : index
    %14 = vector.load %arg2[%c2, %c0_8] : memref<27x512xf32, #tpu.memory_space<vmem>>, vector<1x512xf32>
    %15 = vector.broadcast %14 : vector<1x512xf32> to vector<8x512xf32>
    %16 = arith.mulf %13, %15 : vector<8x512xf32>
    %c16 = arith.constant 16 : index
    %c0_9 = arith.constant 0 : index
    %17 = vector.load %arg12[%c16, %c0_9] : memref<216x512xf32, #tpu.memory_space<vmem>>, vector<8x512xf32>
    tpu.vector_store %arg12[%c16, %c0_9], %16 {strides = array<i32>} : memref<216x512xf32, #tpu.memory_space<vmem>>, vector<8x512xf32>,
    %18 = vector.extract_strided_slice %2 {offsets = [0, 447], sizes = [8, 512], strides = [1, 1]} : vector<8x1024xf32> to vector<8x512xf32>
    %c3 = arith.constant 3 : index
    %c0_10 = arith.constant 0 : index
    %19 = vector.load %arg2[%c3, %c0_10] : memref<27x512xf32, #tpu.memory_space<vmem>>, vector<1x512xf32>
    %20 = vector.broadcast %19 : vector<1x512xf32> to vector<8x512xf32>
    %21 = arith.mulf %18, %20 : vector<8x512xf32>
    %c24 = arith.constant 24 : index
    %c0_11 = arith.constant 0 : index
    %22 = vector.load %arg12[%c24, %c0_11] : memref<216x512xf32, #tpu.memory_space<vmem>>, vector<8x512xf32>
    tpu.vector_store %arg12[%c24, %c0_11], %21 {strides = array<i32>} : memref<216x512xf32, #tpu.memory_space<vmem>>, vector<8x512xf32>,
    %23 = vector.extract_strided_slice %2 {offsets = [0, 448], sizes = [8, 512], strides = [1, 1]} : vector<8x1024xf32> to vector<8x512xf32>
    %c4 = arith.constant 4 : index
    %c0_12 = arith.constant 0 : index
    %24 = vector.load %arg2[%c4, %c0_12] : memref<27x512xf32, #tpu.memory_space<vmem>>, vector<1x512xf32>
    %25 = vector.broadcast %24 : vector<1x512xf32> to vector<8x512xf32>
    %26 = arith.mulf %23, %25 : vector<8x512xf32>
    %c32 = arith.constant 32 : index
    %c0_13 = arith.constant 0 : index
    %27 = vector.load %arg12[%c32, %c0_13] : memref<216x512xf32, #tpu.memory_space<vmem>>, vector<8x512xf32>
    tpu.vector_store %arg12[%c32, %c0_13], %26 {strides = array<i32>} : memref<216x512xf32, #tpu.memory_space<vmem>>, vector<8x512xf32>,
    %28 = vector.extract_strided_slice %2 {offsets = [0, 449], sizes = [8, 512], strides = [1, 1]} : vector<8x1024xf32> to vector<8x512xf32>
    %c5 = arith.constant 5 : index
    %c0_14 = arith.constant 0 : index
    %29 = vector.load %arg2[%c5, %c0_14] : memref<27x512xf32, #tpu.memory_space<vmem>>, vector<1x512xf32>
    %30 = vector.broadcast %29 : vector<1x512xf32> to vector<8x512xf32>
    %31 = arith.mulf %28, %30 : vector<8x512xf32>
    %c40 = arith.constant 40 : index
    %c0_15 = arith.constant 0 : index
    %32 = vector.load %arg12[%c40, %c0_15] : memref<216x512xf32, #tpu.memory_space<vmem>>, vector<8x512xf32>
    tpu.vector_store %arg12[%c40, %c0_15], %31 {strides = array<i32>} : memref<216x512xf32, #tpu.memory_space<vmem>>, vector<8x512xf32>,
    %33 = vector.extract_strided_slice %2 {offsets = [0, 455], sizes = [8, 512], strides = [1, 1]} : vector<8x1024xf32> to vector<8x512xf32>
    %c6 = arith.constant 6 : index
    %c0_16 = arith.constant 0 : index
    %34 = vector.load %arg2[%c6, %c0_16] : memref<27x512xf32, #tpu.memory_space<vmem>>, vector<1x512xf32>
    %35 = vector.broadcast %34 : vector<1x512xf32> to vector<8x512xf32>
    %36 = arith.mulf %33, %35 : vector<8x512xf32>
    %c48 = arith.constant 48 : index
    %c0_17 = arith.constant 0 : index
    %37 = vector.load %arg12[%c48, %c0_17] : memref<216x512xf32, #tpu.memory_space<vmem>>, vector<8x512xf32>
    tpu.vector_store %arg12[%c48, %c0_17], %36 {strides = array<i32>} : memref<216x512xf32, #tpu.memory_space<vmem>>, vector<8x512xf32>,
    %38 = vector.extract_strided_slice %2 {offsets = [0, 456], sizes = [8, 512], strides = [1, 1]} : vector<8x1024xf32> to vector<8x512xf32>
    %c7 = arith.constant 7 : index
    %c0_18 = arith.constant 0 : index
    %39 = vector.load %arg2[%c7, %c0_18] : memref<27x512xf32, #tpu.memory_space<vmem>>, vector<1x512xf32>
    %40 = vector.broadcast %39 : vector<1x512xf32> to vector<8x512xf32>
    %41 = arith.mulf %38, %40 : vector<8x512xf32>
    %c56 = arith.constant 56 : index
    %c0_19 = arith.constant 0 : index
    %42 = vector.load %arg12[%c56, %c0_19] : memref<216x512xf32, #tpu.memory_space<vmem>>, vector<8x512xf32>
    tpu.vector_store %arg12[%c56, %c0_19], %41 {strides = array<i32>} : memref<216x512xf32, #tpu.memory_space<vmem>>, vector<8x512xf32>,
    %43 = vector.extract_strided_slice %2 {offsets = [0, 457], sizes = [8, 512], strides = [1, 1]} : vector<8x1024xf32> to vector<8x512xf32>
    %c8_20 = arith.constant 8 : index
    %c0_21 = arith.constant 0 : index
    %44 = vector.load %arg2[%c8_20, %c0_21] : memref<27x512xf32, #tpu.memory_space<vmem>>, vector<1x512xf32>
    %45 = vector.broadcast %44 : vector<1x512xf32> to vector<8x512xf32>
    %46 = arith.mulf %43, %45 : vector<8x512xf32>
    %c64 = arith.constant 64 : index
    %c0_22 = arith.constant 0 : index
    %47 = vector.load %arg12[%c64, %c0_22] : memref<216x512xf32, #tpu.memory_space<vmem>>, vector<8x512xf32>
    tpu.vector_store %arg12[%c64, %c0_22], %46 {strides = array<i32>} : memref<216x512xf32, #tpu.memory_space<vmem>>, vector<8x512xf32>,
    %48 = vector.extract_strided_slice %2 {offsets = [0, 503], sizes = [8, 512], strides = [1, 1]} : vector<8x1024xf32> to vector<8x512xf32>
    %c9 = arith.constant 9 : index
    %c0_23 = arith.constant 0 : index
    %49 = vector.load %arg2[%c9, %c0_23] : memref<27x512xf32, #tpu.memory_space<vmem>>, vector<1x512xf32>
    %50 = vector.broadcast %49 : vector<1x512xf32> to vector<8x512xf32>
    %51 = arith.mulf %48, %50 : vector<8x512xf32>
    %c72 = arith.constant 72 : index
    %c0_24 = arith.constant 0 : index
    %52 = vector.load %arg12[%c72, %c0_24] : memref<216x512xf32, #tpu.memory_space<vmem>>, vector<8x512xf32>
    tpu.vector_store %arg12[%c72, %c0_24], %51 {strides = array<i32>} : memref<216x512xf32, #tpu.memory_space<vmem>>, vector<8x512xf32>,
    %53 = vector.extract_strided_slice %2 {offsets = [0, 504], sizes = [8, 512], strides = [1, 1]} : vector<8x1024xf32> to vector<8x512xf32>
    %c10 = arith.constant 10 : index
    %c0_25 = arith.constant 0 : index
    %54 = vector.load %arg2[%c10, %c0_25] : memref<27x512xf32, #tpu.memory_space<vmem>>, vector<1x512xf32>
    %55 = vector.broadcast %54 : vector<1x512xf32> to vector<8x512xf32>
    %56 = arith.mulf %53, %55 : vector<8x512xf32>
    %c80 = arith.constant 80 : index
    %c0_26 = arith.constant 0 : index
    %57 = vector.load %arg12[%c80, %c0_26] : memref<216x512xf32, #tpu.memory_space<vmem>>, vector<8x512xf32>
    tpu.vector_store %arg12[%c80, %c0_26], %56 {strides = array<i32>} : memref<216x512xf32, #tpu.memory_space<vmem>>, vector<8x512xf32>,
    %58 = vector.extract_strided_slice %2 {offsets = [0, 505], sizes = [8, 512], strides = [1, 1]} : vector<8x1024xf32> to vector<8x512xf32>
    %c11 = arith.constant 11 : index
    %c0_27 = arith.constant 0 : index
    %59 = vector.load %arg2[%c11, %c0_27] : memref<27x512xf32, #tpu.memory_space<vmem>>, vector<1x512xf32>
    %60 = vector.broadcast %59 : vector<1x512xf32> to vector<8x512xf32>
    %61 = arith.mulf %58, %60 : vector<8x512xf32>
    %c88 = arith.constant 88 : index
    %c0_28 = arith.constant 0 : index
    %62 = vector.load %arg12[%c88, %c0_28] : memref<216x512xf32, #tpu.memory_space<vmem>>, vector<8x512xf32>
    tpu.vector_store %arg12[%c88, %c0_28], %61 {strides = array<i32>} : memref<216x512xf32, #tpu.memory_space<vmem>>, vector<8x512xf32>,
    %63 = vector.extract_strided_slice %2 {offsets = [0, 511], sizes = [8, 512], strides = [1, 1]} : vector<8x1024xf32> to vector<8x512xf32>
    %c12 = arith.constant 12 : index
    %c0_29 = arith.constant 0 : index
    %64 = vector.load %arg2[%c12, %c0_29] : memref<27x512xf32, #tpu.memory_space<vmem>>, vector<1x512xf32>
    %65 = vector.broadcast %64 : vector<1x512xf32> to vector<8x512xf32>
    %66 = arith.mulf %63, %65 : vector<8x512xf32>
    %c96 = arith.constant 96 : index
    %c0_30 = arith.constant 0 : index
    %67 = vector.load %arg12[%c96, %c0_30] : memref<216x512xf32, #tpu.memory_space<vmem>>, vector<8x512xf32>
    tpu.vector_store %arg12[%c96, %c0_30], %66 {strides = array<i32>} : memref<216x512xf32, #tpu.memory_space<vmem>>, vector<8x512xf32>,
    %68 = vector.extract_strided_slice %2 {offsets = [0, 0], sizes = [8, 512], strides = [1, 1]} : vector<8x1024xf32> to vector<8x512xf32>
    %c13 = arith.constant 13 : index
    %c0_31 = arith.constant 0 : index
    %69 = vector.load %arg2[%c13, %c0_31] : memref<27x512xf32, #tpu.memory_space<vmem>>, vector<1x512xf32>
    %70 = vector.broadcast %69 : vector<1x512xf32> to vector<8x512xf32>
    %71 = arith.mulf %68, %70 : vector<8x512xf32>
    %c104 = arith.constant 104 : index
    %c0_32 = arith.constant 0 : index
    %72 = vector.load %arg12[%c104, %c0_32] : memref<216x512xf32, #tpu.memory_space<vmem>>, vector<8x512xf32>
    tpu.vector_store %arg12[%c104, %c0_32], %71 {strides = array<i32>} : memref<216x512xf32, #tpu.memory_space<vmem>>, vector<8x512xf32>,
    %73 = vector.extract_strided_slice %2 {offsets = [0, 1], sizes = [8, 512], strides = [1, 1]} : vector<8x1024xf32> to vector<8x512xf32>
    %c14 = arith.constant 14 : index
    %c0_33 = arith.constant 0 : index
    %74 = vector.load %arg2[%c14, %c0_33] : memref<27x512xf32, #tpu.memory_space<vmem>>, vector<1x512xf32>
    %75 = vector.broadcast %74 : vector<1x512xf32> to vector<8x512xf32>
    %76 = arith.mulf %73, %75 : vector<8x512xf32>
    %c112 = arith.constant 112 : index
    %c0_34 = arith.constant 0 : index
    %77 = vector.load %arg12[%c112, %c0_34] : memref<216x512xf32, #tpu.memory_space<vmem>>, vector<8x512xf32>
    tpu.vector_store %arg12[%c112, %c0_34], %76 {strides = array<i32>} : memref<216x512xf32, #tpu.memory_space<vmem>>, vector<8x512xf32>,
    %78 = vector.extract_strided_slice %2 {offsets = [0, 7], sizes = [8, 512], strides = [1, 1]} : vector<8x1024xf32> to vector<8x512xf32>
    %c15 = arith.constant 15 : index
    %c0_35 = arith.constant 0 : index
    %79 = vector.load %arg2[%c15, %c0_35] : memref<27x512xf32, #tpu.memory_space<vmem>>, vector<1x512xf32>
    %80 = vector.broadcast %79 : vector<1x512xf32> to vector<8x512xf32>
    %81 = arith.mulf %78, %80 : vector<8x512xf32>
    %c120 = arith.constant 120 : index
    %c0_36 = arith.constant 0 : index
    %82 = vector.load %arg12[%c120, %c0_36] : memref<216x512xf32, #tpu.memory_space<vmem>>, vector<8x512xf32>
    tpu.vector_store %arg12[%c120, %c0_36], %81 {strides = array<i32>} : memref<216x512xf32, #tpu.memory_space<vmem>>, vector<8x512xf32>,
    %83 = vector.extract_strided_slice %2 {offsets = [0, 8], sizes = [8, 512], strides = [1, 1]} : vector<8x1024xf32> to vector<8x512xf32>
    %c16_37 = arith.constant 16 : index
    %c0_38 = arith.constant 0 : index
    %84 = vector.load %arg2[%c16_37, %c0_38] : memref<27x512xf32, #tpu.memory_space<vmem>>, vector<1x512xf32>
    %85 = vector.broadcast %84 : vector<1x512xf32> to vector<8x512xf32>
    %86 = arith.mulf %83, %85 : vector<8x512xf32>
    %c128 = arith.constant 128 : index
    %c0_39 = arith.constant 0 : index
    %87 = vector.load %arg12[%c128, %c0_39] : memref<216x512xf32, #tpu.memory_space<vmem>>, vector<8x512xf32>
    tpu.vector_store %arg12[%c128, %c0_39], %86 {strides = array<i32>} : memref<216x512xf32, #tpu.memory_space<vmem>>, vector<8x512xf32>,
    %88 = vector.extract_strided_slice %2 {offsets = [0, 9], sizes = [8, 512], strides = [1, 1]} : vector<8x1024xf32> to vector<8x512xf32>
    %c17 = arith.constant 17 : index
    %c0_40 = arith.constant 0 : index
    %89 = vector.load %arg2[%c17, %c0_40] : memref<27x512xf32, #tpu.memory_space<vmem>>, vector<1x512xf32>
    %90 = vector.broadcast %89 : vector<1x512xf32> to vector<8x512xf32>
    %91 = arith.mulf %88, %90 : vector<8x512xf32>
    %c136 = arith.constant 136 : index
    %c0_41 = arith.constant 0 : index
    %92 = vector.load %arg12[%c136, %c0_41] : memref<216x512xf32, #tpu.memory_space<vmem>>, vector<8x512xf32>
    tpu.vector_store %arg12[%c136, %c0_41], %91 {strides = array<i32>} : memref<216x512xf32, #tpu.memory_space<vmem>>, vector<8x512xf32>,
    %93 = vector.extract_strided_slice %2 {offsets = [0, 55], sizes = [8, 512], strides = [1, 1]} : vector<8x1024xf32> to vector<8x512xf32>
    %c18 = arith.constant 18 : index
    %c0_42 = arith.constant 0 : index
    %94 = vector.load %arg2[%c18, %c0_42] : memref<27x512xf32, #tpu.memory_space<vmem>>, vector<1x512xf32>
    %95 = vector.broadcast %94 : vector<1x512xf32> to vector<8x512xf32>
    %96 = arith.mulf %93, %95 : vector<8x512xf32>
    %c144 = arith.constant 144 : index
    %c0_43 = arith.constant 0 : index
    %97 = vector.load %arg12[%c144, %c0_43] : memref<216x512xf32, #tpu.memory_space<vmem>>, vector<8x512xf32>
    tpu.vector_store %arg12[%c144, %c0_43], %96 {strides = array<i32>} : memref<216x512xf32, #tpu.memory_space<vmem>>, vector<8x512xf32>,
    %98 = vector.extract_strided_slice %2 {offsets = [0, 56], sizes = [8, 512], strides = [1, 1]} : vector<8x1024xf32> to vector<8x512xf32>
    %c19 = arith.constant 19 : index
    %c0_44 = arith.constant 0 : index
    %99 = vector.load %arg2[%c19, %c0_44] : memref<27x512xf32, #tpu.memory_space<vmem>>, vector<1x512xf32>
    %100 = vector.broadcast %99 : vector<1x512xf32> to vector<8x512xf32>
    %101 = arith.mulf %98, %100 : vector<8x512xf32>
    %c152 = arith.constant 152 : index
    %c0_45 = arith.constant 0 : index
    %102 = vector.load %arg12[%c152, %c0_45] : memref<216x512xf32, #tpu.memory_space<vmem>>, vector<8x512xf32>
    tpu.vector_store %arg12[%c152, %c0_45], %101 {strides = array<i32>} : memref<216x512xf32, #tpu.memory_space<vmem>>, vector<8x512xf32>,
    %103 = vector.extract_strided_slice %2 {offsets = [0, 57], sizes = [8, 512], strides = [1, 1]} : vector<8x1024xf32> to vector<8x512xf32>
    %c20 = arith.constant 20 : index
    %c0_46 = arith.constant 0 : index
    %104 = vector.load %arg2[%c20, %c0_46] : memref<27x512xf32, #tpu.memory_space<vmem>>, vector<1x512xf32>
    %105 = vector.broadcast %104 : vector<1x512xf32> to vector<8x512xf32>
    %106 = arith.mulf %103, %105 : vector<8x512xf32>
    %c160 = arith.constant 160 : index
    %c0_47 = arith.constant 0 : index
    %107 = vector.load %arg12[%c160, %c0_47] : memref<216x512xf32, #tpu.memory_space<vmem>>, vector<8x512xf32>
    tpu.vector_store %arg12[%c160, %c0_47], %106 {strides = array<i32>} : memref<216x512xf32, #tpu.memory_space<vmem>>, vector<8x512xf32>,
    %108 = vector.extract_strided_slice %2 {offsets = [0, 63], sizes = [8, 512], strides = [1, 1]} : vector<8x1024xf32> to vector<8x512xf32>
    %c21 = arith.constant 21 : index
    %c0_48 = arith.constant 0 : index
    %109 = vector.load %arg2[%c21, %c0_48] : memref<27x512xf32, #tpu.memory_space<vmem>>, vector<1x512xf32>
    %110 = vector.broadcast %109 : vector<1x512xf32> to vector<8x512xf32>
    %111 = arith.mulf %108, %110 : vector<8x512xf32>
    %c168 = arith.constant 168 : index
    %c0_49 = arith.constant 0 : index
    %112 = vector.load %arg12[%c168, %c0_49] : memref<216x512xf32, #tpu.memory_space<vmem>>, vector<8x512xf32>
    tpu.vector_store %arg12[%c168, %c0_49], %111 {strides = array<i32>} : memref<216x512xf32, #tpu.memory_space<vmem>>, vector<8x512xf32>,
    %113 = vector.extract_strided_slice %2 {offsets = [0, 64], sizes = [8, 512], strides = [1, 1]} : vector<8x1024xf32> to vector<8x512xf32>
    %c22 = arith.constant 22 : index
    %c0_50 = arith.constant 0 : index
    %114 = vector.load %arg2[%c22, %c0_50] : memref<27x512xf32, #tpu.memory_space<vmem>>, vector<1x512xf32>
    %115 = vector.broadcast %114 : vector<1x512xf32> to vector<8x512xf32>
    %116 = arith.mulf %113, %115 : vector<8x512xf32>
    %c176 = arith.constant 176 : index
    %c0_51 = arith.constant 0 : index
    %117 = vector.load %arg12[%c176, %c0_51] : memref<216x512xf32, #tpu.memory_space<vmem>>, vector<8x512xf32>
    tpu.vector_store %arg12[%c176, %c0_51], %116 {strides = array<i32>} : memref<216x512xf32, #tpu.memory_space<vmem>>, vector<8x512xf32>,
    %118 = vector.extract_strided_slice %2 {offsets = [0, 65], sizes = [8, 512], strides = [1, 1]} : vector<8x1024xf32> to vector<8x512xf32>
    %c23 = arith.constant 23 : index
    %c0_52 = arith.constant 0 : index
    %119 = vector.load %arg2[%c23, %c0_52] : memref<27x512xf32, #tpu.memory_space<vmem>>, vector<1x512xf32>
    %120 = vector.broadcast %119 : vector<1x512xf32> to vector<8x512xf32>
    %121 = arith.mulf %118, %120 : vector<8x512xf32>
    %c184 = arith.constant 184 : index
    %c0_53 = arith.constant 0 : index
    %122 = vector.load %arg12[%c184, %c0_53] : memref<216x512xf32, #tpu.memory_space<vmem>>, vector<8x512xf32>
    tpu.vector_store %arg12[%c184, %c0_53], %121 {strides = array<i32>} : memref<216x512xf32, #tpu.memory_space<vmem>>, vector<8x512xf32>,
    %123 = vector.extract_strided_slice %2 {offsets = [0, 71], sizes = [8, 512], strides = [1, 1]} : vector<8x1024xf32> to vector<8x512xf32>
    %c24_54 = arith.constant 24 : index
    %c0_55 = arith.constant 0 : index
    %124 = vector.load %arg2[%c24_54, %c0_55] : memref<27x512xf32, #tpu.memory_space<vmem>>, vector<1x512xf32>
    %125 = vector.broadcast %124 : vector<1x512xf32> to vector<8x512xf32>
    %126 = arith.mulf %123, %125 : vector<8x512xf32>
    %c192 = arith.constant 192 : index
    %c0_56 = arith.constant 0 : index
    %127 = vector.load %arg12[%c192, %c0_56] : memref<216x512xf32, #tpu.memory_space<vmem>>, vector<8x512xf32>
    tpu.vector_store %arg12[%c192, %c0_56], %126 {strides = array<i32>} : memref<216x512xf32, #tpu.memory_space<vmem>>, vector<8x512xf32>,
    %128 = vector.extract_strided_slice %2 {offsets = [0, 72], sizes = [8, 512], strides = [1, 1]} : vector<8x1024xf32> to vector<8x512xf32>
    %c25 = arith.constant 25 : index
    %c0_57 = arith.constant 0 : index
    %129 = vector.load %arg2[%c25, %c0_57] : memref<27x512xf32, #tpu.memory_space<vmem>>, vector<1x512xf32>
    %130 = vector.broadcast %129 : vector<1x512xf32> to vector<8x512xf32>
    %131 = arith.mulf %128, %130 : vector<8x512xf32>
    %c200 = arith.constant 200 : index
    %c0_58 = arith.constant 0 : index
    %132 = vector.load %arg12[%c200, %c0_58] : memref<216x512xf32, #tpu.memory_space<vmem>>, vector<8x512xf32>
    tpu.vector_store %arg12[%c200, %c0_58], %131 {strides = array<i32>} : memref<216x512xf32, #tpu.memory_space<vmem>>, vector<8x512xf32>,
    %133 = vector.extract_strided_slice %2 {offsets = [0, 73], sizes = [8, 512], strides = [1, 1]} : vector<8x1024xf32> to vector<8x512xf32>
    %c26 = arith.constant 26 : index
    %c0_59 = arith.constant 0 : index
    %134 = vector.load %arg2[%c26, %c0_59] : memref<27x512xf32, #tpu.memory_space<vmem>>, vector<1x512xf32>
    %135 = vector.broadcast %134 : vector<1x512xf32> to vector<8x512xf32>
    %136 = arith.mulf %133, %135 : vector<8x512xf32>
    %c208 = arith.constant 208 : index
    %c0_60 = arith.constant 0 : index
    %137 = vector.load %arg12[%c208, %c0_60] : memref<216x512xf32, #tpu.memory_space<vmem>>, vector<8x512xf32>
    tpu.vector_store %arg12[%c208, %c0_60], %136 {strides = array<i32>} : memref<216x512xf32, #tpu.memory_space<vmem>>, vector<8x512xf32>,
    %c0_61 = arith.constant 0 : index
    %c0_62 = arith.constant 0 : index
    %138 = vector.load %arg3[%c0_61, %c0_62] : memref<8x216xbf16, #tpu.memory_space<vmem>>, vector<8x216xbf16>
    %c0_63 = arith.constant 0 : index
    %c0_64 = arith.constant 0 : index
    %139 = vector.load %arg12[%c0_63, %c0_64] : memref<216x512xf32, #tpu.memory_space<vmem>>, vector<216x512xf32>
    %140 = arith.truncf %139 : vector<216x512xf32> to vector<216x512xbf16>
    %cst = arith.constant dense<0.000000e+00> : vector<8x512xf32>
    %141 = tpu.matmul %138, %140, %cst {dimension_numbers = #tpu.dot_dimension_numbers<[1], [0], [0], [1], [0, 0, 1, 1], [], []>} : vector<8x216xbf16>, vector<216x512xbf16>, vector<8x512xf32> -> vector<8x512xf32>
    %c0_65 = arith.constant 0 : index
    %c0_66 = arith.constant 0 : index
    %142 = vector.load %arg4[%c0_65, %c0_66] : memref<8x1xf32, #tpu.memory_space<vmem>>, vector<8x1xf32>
    %143 = vector.broadcast %142 : vector<8x1xf32> to vector<8x512xf32>
    %144 = arith.addf %141, %143 : vector<8x512xf32>
    %c0_67 = arith.constant 0 : index
    %c0_68 = arith.constant 0 : index
    %145 = vector.load %arg5[%c0_67, %c0_68] : memref<8x1xf32, #tpu.memory_space<vmem>>, vector<8x1xf32>
    %c0_69 = arith.constant 0 : index
    %c0_70 = arith.constant 0 : index
    %146 = vector.load %arg6[%c0_69, %c0_70] : memref<8x1xf32, #tpu.memory_space<vmem>>, vector<8x1xf32>
    %cst_71 = arith.constant dense<0.000000e+00> : vector<8xf32>
    %147 = vector.multi_reduction <add>, %144, %cst_71 [1] : vector<8x512xf32> to vector<8xf32>
    %148 = vector.shape_cast %147 : vector<8xf32> to vector<8x1xf32>
    %cst_72 = arith.constant 0.001953125 : f32
    %149 = vector.broadcast %cst_72 : f32 to vector<8x1xf32>
    %150 = arith.mulf %148, %149 : vector<8x1xf32>
    %151 = arith.mulf %144, %144 : vector<8x512xf32>
    %cst_73 = arith.constant dense<0.000000e+00> : vector<8xf32>
    %152 = vector.multi_reduction <add>, %151, %cst_73 [1] : vector<8x512xf32> to vector<8xf32>
    %153 = vector.shape_cast %152 : vector<8xf32> to vector<8x1xf32>
    %cst_74 = arith.constant 0.001953125 : f32
    %154 = vector.broadcast %cst_74 : f32 to vector<8x1xf32>
    %155 = arith.mulf %153, %154 : vector<8x1xf32>
    %156 = arith.mulf %150, %150 : vector<8x1xf32>
    %157 = arith.subf %155, %156 : vector<8x1xf32>
    %cst_75 = arith.constant 0.000000e+00 : f32
    %158 = vector.broadcast %cst_75 : f32 to vector<8x1xf32>
    %159 = arith.maximumf %157, %158 : vector<8x1xf32>
    %cst_76 = arith.constant 9.99999974E-6 : f32
    %160 = vector.broadcast %cst_76 : f32 to vector<8x1xf32>
    %161 = arith.addf %159, %160 : vector<8x1xf32>
    %162 = math.rsqrt %161 : vector<8x1xf32>
    %163 = vector.broadcast %150 : vector<8x1xf32> to vector<8x512xf32>
    %164 = arith.subf %144, %163 : vector<8x512xf32>
    %165 = arith.mulf %162, %145 : vector<8x1xf32>
    %166 = vector.broadcast %165 : vector<8x1xf32> to vector<8x512xf32>
    %167 = arith.mulf %164, %166 : vector<8x512xf32>
    %168 = vector.broadcast %146 : vector<8x1xf32> to vector<8x512xf32>
    %169 = arith.addf %167, %168 : vector<8x512xf32>
    %cst_77 = arith.constant 0.000000e+00 : f32
    %170 = vector.broadcast %cst_77 : f32 to vector<8x512xf32>
    %171 = arith.cmpf oge, %169, %170 : vector<8x512xf32>
    %cst_78 = arith.constant 0.00999999977 : f32
    %172 = vector.broadcast %cst_78 : f32 to vector<8x512xf32>
    %173 = arith.mulf %172, %169 : vector<8x512xf32>
    %174 = arith.select %171, %169, %173 : vector<8x512xi1>, vector<8x512xf32>
    %175 = tpu.concatenate %174, %174 in 1 : vector<8x512xf32>, vector<8x512xf32> -> vector<8x1024xf32>
    %176 = vector.extract_strided_slice %175 {offsets = [0, 439], sizes = [8, 512], strides = [1, 1]} : vector<8x1024xf32> to vector<8x512xf32>
    %c0_79 = arith.constant 0 : index
    %c0_80 = arith.constant 0 : index
    %177 = vector.load %arg2[%c0_79, %c0_80] : memref<27x512xf32, #tpu.memory_space<vmem>>, vector<1x512xf32>
    %178 = vector.broadcast %177 : vector<1x512xf32> to vector<8x512xf32>
    %179 = arith.mulf %176, %178 : vector<8x512xf32>
    %c0_81 = arith.constant 0 : index
    %c0_82 = arith.constant 0 : index
    %180 = vector.load %arg13[%c0_81, %c0_82] : memref<216x512xf32, #tpu.memory_space<vmem>>, vector<8x512xf32>
    tpu.vector_store %arg13[%c0_81, %c0_82], %179 {strides = array<i32>} : memref<216x512xf32, #tpu.memory_space<vmem>>, vector<8x512xf32>,
    %181 = vector.extract_strided_slice %175 {offsets = [0, 440], sizes = [8, 512], strides = [1, 1]} : vector<8x1024xf32> to vector<8x512xf32>
    %c1_83 = arith.constant 1 : index
    %c0_84 = arith.constant 0 : index
    %182 = vector.load %arg2[%c1_83, %c0_84] : memref<27x512xf32, #tpu.memory_space<vmem>>, vector<1x512xf32>
    %183 = vector.broadcast %182 : vector<1x512xf32> to vector<8x512xf32>
    %184 = arith.mulf %181, %183 : vector<8x512xf32>
    %c8_85 = arith.constant 8 : index
    %c0_86 = arith.constant 0 : index
    %185 = vector.load %arg13[%c8_85, %c0_86] : memref<216x512xf32, #tpu.memory_space<vmem>>, vector<8x512xf32>
    tpu.vector_store %arg13[%c8_85, %c0_86], %184 {strides = array<i32>} : memref<216x512xf32, #tpu.memory_space<vmem>>, vector<8x512xf32>,
    %186 = vector.extract_strided_slice %175 {offsets = [0, 441], sizes = [8, 512], strides = [1, 1]} : vector<8x1024xf32> to vector<8x512xf32>
    %c2_87 = arith.constant 2 : index
    %c0_88 = arith.constant 0 : index
    %187 = vector.load %arg2[%c2_87, %c0_88] : memref<27x512xf32, #tpu.memory_space<vmem>>, vector<1x512xf32>
    %188 = vector.broadcast %187 : vector<1x512xf32> to vector<8x512xf32>
    %189 = arith.mulf %186, %188 : vector<8x512xf32>
    %c16_89 = arith.constant 16 : index
    %c0_90 = arith.constant 0 : index
    %190 = vector.load %arg13[%c16_89, %c0_90] : memref<216x512xf32, #tpu.memory_space<vmem>>, vector<8x512xf32>
    tpu.vector_store %arg13[%c16_89, %c0_90], %189 {strides = array<i32>} : memref<216x512xf32, #tpu.memory_space<vmem>>, vector<8x512xf32>,
    %191 = vector.extract_strided_slice %175 {offsets = [0, 447], sizes = [8, 512], strides = [1, 1]} : vector<8x1024xf32> to vector<8x512xf32>
    %c3_91 = arith.constant 3 : index
    %c0_92 = arith.constant 0 : index
    %192 = vector.load %arg2[%c3_91, %c0_92] : memref<27x512xf32, #tpu.memory_space<vmem>>, vector<1x512xf32>
    %193 = vector.broadcast %192 : vector<1x512xf32> to vector<8x512xf32>
    %194 = arith.mulf %191, %193 : vector<8x512xf32>
    %c24_93 = arith.constant 24 : index
    %c0_94 = arith.constant 0 : index
    %195 = vector.load %arg13[%c24_93, %c0_94] : memref<216x512xf32, #tpu.memory_space<vmem>>, vector<8x512xf32>
    tpu.vector_store %arg13[%c24_93, %c0_94], %194 {strides = array<i32>} : memref<216x512xf32, #tpu.memory_space<vmem>>, vector<8x512xf32>,
    %196 = vector.extract_strided_slice %175 {offsets = [0, 448], sizes = [8, 512], strides = [1, 1]} : vector<8x1024xf32> to vector<8x512xf32>
    %c4_95 = arith.constant 4 : index
    %c0_96 = arith.constant 0 : index
    %197 = vector.load %arg2[%c4_95, %c0_96] : memref<27x512xf32, #tpu.memory_space<vmem>>, vector<1x512xf32>
    %198 = vector.broadcast %197 : vector<1x512xf32> to vector<8x512xf32>
    %199 = arith.mulf %196, %198 : vector<8x512xf32>
    %c32_97 = arith.constant 32 : index
    %c0_98 = arith.constant 0 : index
    %200 = vector.load %arg13[%c32_97, %c0_98] : memref<216x512xf32, #tpu.memory_space<vmem>>, vector<8x512xf32>
    tpu.vector_store %arg13[%c32_97, %c0_98], %199 {strides = array<i32>} : memref<216x512xf32, #tpu.memory_space<vmem>>, vector<8x512xf32>,
    %201 = vector.extract_strided_slice %175 {offsets = [0, 449], sizes = [8, 512], strides = [1, 1]} : vector<8x1024xf32> to vector<8x512xf32>
    %c5_99 = arith.constant 5 : index
    %c0_100 = arith.constant 0 : index
    %202 = vector.load %arg2[%c5_99, %c0_100] : memref<27x512xf32, #tpu.memory_space<vmem>>, vector<1x512xf32>
    %203 = vector.broadcast %202 : vector<1x512xf32> to vector<8x512xf32>
    %204 = arith.mulf %201, %203 : vector<8x512xf32>
    %c40_101 = arith.constant 40 : index
    %c0_102 = arith.constant 0 : index
    %205 = vector.load %arg13[%c40_101, %c0_102] : memref<216x512xf32, #tpu.memory_space<vmem>>, vector<8x512xf32>
    tpu.vector_store %arg13[%c40_101, %c0_102], %204 {strides = array<i32>} : memref<216x512xf32, #tpu.memory_space<vmem>>, vector<8x512xf32>,
    %206 = vector.extract_strided_slice %175 {offsets = [0, 455], sizes = [8, 512], strides = [1, 1]} : vector<8x1024xf32> to vector<8x512xf32>
    %c6_103 = arith.constant 6 : index
    %c0_104 = arith.constant 0 : index
    %207 = vector.load %arg2[%c6_103, %c0_104] : memref<27x512xf32, #tpu.memory_space<vmem>>, vector<1x512xf32>
    %208 = vector.broadcast %207 : vector<1x512xf32> to vector<8x512xf32>
    %209 = arith.mulf %206, %208 : vector<8x512xf32>
    %c48_105 = arith.constant 48 : index
    %c0_106 = arith.constant 0 : index
    %210 = vector.load %arg13[%c48_105, %c0_106] : memref<216x512xf32, #tpu.memory_space<vmem>>, vector<8x512xf32>
    tpu.vector_store %arg13[%c48_105, %c0_106], %209 {strides = array<i32>} : memref<216x512xf32, #tpu.memory_space<vmem>>, vector<8x512xf32>,
    %211 = vector.extract_strided_slice %175 {offsets = [0, 456], sizes = [8, 512], strides = [1, 1]} : vector<8x1024xf32> to vector<8x512xf32>
    %c7_107 = arith.constant 7 : index
    %c0_108 = arith.constant 0 : index
    %212 = vector.load %arg2[%c7_107, %c0_108] : memref<27x512xf32, #tpu.memory_space<vmem>>, vector<1x512xf32>
    %213 = vector.broadcast %212 : vector<1x512xf32> to vector<8x512xf32>
    %214 = arith.mulf %211, %213 : vector<8x512xf32>
    %c56_109 = arith.constant 56 : index
    %c0_110 = arith.constant 0 : index
    %215 = vector.load %arg13[%c56_109, %c0_110] : memref<216x512xf32, #tpu.memory_space<vmem>>, vector<8x512xf32>
    tpu.vector_store %arg13[%c56_109, %c0_110], %214 {strides = array<i32>} : memref<216x512xf32, #tpu.memory_space<vmem>>, vector<8x512xf32>,
    %216 = vector.extract_strided_slice %175 {offsets = [0, 457], sizes = [8, 512], strides = [1, 1]} : vector<8x1024xf32> to vector<8x512xf32>
    %c8_111 = arith.constant 8 : index
    %c0_112 = arith.constant 0 : index
    %217 = vector.load %arg2[%c8_111, %c0_112] : memref<27x512xf32, #tpu.memory_space<vmem>>, vector<1x512xf32>
    %218 = vector.broadcast %217 : vector<1x512xf32> to vector<8x512xf32>
    %219 = arith.mulf %216, %218 : vector<8x512xf32>
    %c64_113 = arith.constant 64 : index
    %c0_114 = arith.constant 0 : index
    %220 = vector.load %arg13[%c64_113, %c0_114] : memref<216x512xf32, #tpu.memory_space<vmem>>, vector<8x512xf32>
    tpu.vector_store %arg13[%c64_113, %c0_114], %219 {strides = array<i32>} : memref<216x512xf32, #tpu.memory_space<vmem>>, vector<8x512xf32>,
    %221 = vector.extract_strided_slice %175 {offsets = [0, 503], sizes = [8, 512], strides = [1, 1]} : vector<8x1024xf32> to vector<8x512xf32>
    %c9_115 = arith.constant 9 : index
    %c0_116 = arith.constant 0 : index
    %222 = vector.load %arg2[%c9_115, %c0_116] : memref<27x512xf32, #tpu.memory_space<vmem>>, vector<1x512xf32>
    %223 = vector.broadcast %222 : vector<1x512xf32> to vector<8x512xf32>
    %224 = arith.mulf %221, %223 : vector<8x512xf32>
    %c72_117 = arith.constant 72 : index
    %c0_118 = arith.constant 0 : index
    %225 = vector.load %arg13[%c72_117, %c0_118] : memref<216x512xf32, #tpu.memory_space<vmem>>, vector<8x512xf32>
    tpu.vector_store %arg13[%c72_117, %c0_118], %224 {strides = array<i32>} : memref<216x512xf32, #tpu.memory_space<vmem>>, vector<8x512xf32>,
    %226 = vector.extract_strided_slice %175 {offsets = [0, 504], sizes = [8, 512], strides = [1, 1]} : vector<8x1024xf32> to vector<8x512xf32>
    %c10_119 = arith.constant 10 : index
    %c0_120 = arith.constant 0 : index
    %227 = vector.load %arg2[%c10_119, %c0_120] : memref<27x512xf32, #tpu.memory_space<vmem>>, vector<1x512xf32>
    %228 = vector.broadcast %227 : vector<1x512xf32> to vector<8x512xf32>
    %229 = arith.mulf %226, %228 : vector<8x512xf32>
    %c80_121 = arith.constant 80 : index
    %c0_122 = arith.constant 0 : index
    %230 = vector.load %arg13[%c80_121, %c0_122] : memref<216x512xf32, #tpu.memory_space<vmem>>, vector<8x512xf32>
    tpu.vector_store %arg13[%c80_121, %c0_122], %229 {strides = array<i32>} : memref<216x512xf32, #tpu.memory_space<vmem>>, vector<8x512xf32>,
    %231 = vector.extract_strided_slice %175 {offsets = [0, 505], sizes = [8, 512], strides = [1, 1]} : vector<8x1024xf32> to vector<8x512xf32>
    %c11_123 = arith.constant 11 : index
    %c0_124 = arith.constant 0 : index
    %232 = vector.load %arg2[%c11_123, %c0_124] : memref<27x512xf32, #tpu.memory_space<vmem>>, vector<1x512xf32>
    %233 = vector.broadcast %232 : vector<1x512xf32> to vector<8x512xf32>
    %234 = arith.mulf %231, %233 : vector<8x512xf32>
    %c88_125 = arith.constant 88 : index
    %c0_126 = arith.constant 0 : index
    %235 = vector.load %arg13[%c88_125, %c0_126] : memref<216x512xf32, #tpu.memory_space<vmem>>, vector<8x512xf32>
    tpu.vector_store %arg13[%c88_125, %c0_126], %234 {strides = array<i32>} : memref<216x512xf32, #tpu.memory_space<vmem>>, vector<8x512xf32>,
    %236 = vector.extract_strided_slice %175 {offsets = [0, 511], sizes = [8, 512], strides = [1, 1]} : vector<8x1024xf32> to vector<8x512xf32>
    %c12_127 = arith.constant 12 : index
    %c0_128 = arith.constant 0 : index
    %237 = vector.load %arg2[%c12_127, %c0_128] : memref<27x512xf32, #tpu.memory_space<vmem>>, vector<1x512xf32>
    %238 = vector.broadcast %237 : vector<1x512xf32> to vector<8x512xf32>
    %239 = arith.mulf %236, %238 : vector<8x512xf32>
    %c96_129 = arith.constant 96 : index
    %c0_130 = arith.constant 0 : index
    %240 = vector.load %arg13[%c96_129, %c0_130] : memref<216x512xf32, #tpu.memory_space<vmem>>, vector<8x512xf32>
    tpu.vector_store %arg13[%c96_129, %c0_130], %239 {strides = array<i32>} : memref<216x512xf32, #tpu.memory_space<vmem>>, vector<8x512xf32>,
    %241 = vector.extract_strided_slice %175 {offsets = [0, 0], sizes = [8, 512], strides = [1, 1]} : vector<8x1024xf32> to vector<8x512xf32>
    %c13_131 = arith.constant 13 : index
    %c0_132 = arith.constant 0 : index
    %242 = vector.load %arg2[%c13_131, %c0_132] : memref<27x512xf32, #tpu.memory_space<vmem>>, vector<1x512xf32>
    %243 = vector.broadcast %242 : vector<1x512xf32> to vector<8x512xf32>
    %244 = arith.mulf %241, %243 : vector<8x512xf32>
    %c104_133 = arith.constant 104 : index
    %c0_134 = arith.constant 0 : index
    %245 = vector.load %arg13[%c104_133, %c0_134] : memref<216x512xf32, #tpu.memory_space<vmem>>, vector<8x512xf32>
    tpu.vector_store %arg13[%c104_133, %c0_134], %244 {strides = array<i32>} : memref<216x512xf32, #tpu.memory_space<vmem>>, vector<8x512xf32>,
    %246 = vector.extract_strided_slice %175 {offsets = [0, 1], sizes = [8, 512], strides = [1, 1]} : vector<8x1024xf32> to vector<8x512xf32>
    %c14_135 = arith.constant 14 : index
    %c0_136 = arith.constant 0 : index
    %247 = vector.load %arg2[%c14_135, %c0_136] : memref<27x512xf32, #tpu.memory_space<vmem>>, vector<1x512xf32>
    %248 = vector.broadcast %247 : vector<1x512xf32> to vector<8x512xf32>
    %249 = arith.mulf %246, %248 : vector<8x512xf32>
    %c112_137 = arith.constant 112 : index
    %c0_138 = arith.constant 0 : index
    %250 = vector.load %arg13[%c112_137, %c0_138] : memref<216x512xf32, #tpu.memory_space<vmem>>, vector<8x512xf32>
    tpu.vector_store %arg13[%c112_137, %c0_138], %249 {strides = array<i32>} : memref<216x512xf32, #tpu.memory_space<vmem>>, vector<8x512xf32>,
    %251 = vector.extract_strided_slice %175 {offsets = [0, 7], sizes = [8, 512], strides = [1, 1]} : vector<8x1024xf32> to vector<8x512xf32>
    %c15_139 = arith.constant 15 : index
    %c0_140 = arith.constant 0 : index
    %252 = vector.load %arg2[%c15_139, %c0_140] : memref<27x512xf32, #tpu.memory_space<vmem>>, vector<1x512xf32>
    %253 = vector.broadcast %252 : vector<1x512xf32> to vector<8x512xf32>
    %254 = arith.mulf %251, %253 : vector<8x512xf32>
    %c120_141 = arith.constant 120 : index
    %c0_142 = arith.constant 0 : index
    %255 = vector.load %arg13[%c120_141, %c0_142] : memref<216x512xf32, #tpu.memory_space<vmem>>, vector<8x512xf32>
    tpu.vector_store %arg13[%c120_141, %c0_142], %254 {strides = array<i32>} : memref<216x512xf32, #tpu.memory_space<vmem>>, vector<8x512xf32>,
    %256 = vector.extract_strided_slice %175 {offsets = [0, 8], sizes = [8, 512], strides = [1, 1]} : vector<8x1024xf32> to vector<8x512xf32>
    %c16_143 = arith.constant 16 : index
    %c0_144 = arith.constant 0 : index
    %257 = vector.load %arg2[%c16_143, %c0_144] : memref<27x512xf32, #tpu.memory_space<vmem>>, vector<1x512xf32>
    %258 = vector.broadcast %257 : vector<1x512xf32> to vector<8x512xf32>
    %259 = arith.mulf %256, %258 : vector<8x512xf32>
    %c128_145 = arith.constant 128 : index
    %c0_146 = arith.constant 0 : index
    %260 = vector.load %arg13[%c128_145, %c0_146] : memref<216x512xf32, #tpu.memory_space<vmem>>, vector<8x512xf32>
    tpu.vector_store %arg13[%c128_145, %c0_146], %259 {strides = array<i32>} : memref<216x512xf32, #tpu.memory_space<vmem>>, vector<8x512xf32>,
    %261 = vector.extract_strided_slice %175 {offsets = [0, 9], sizes = [8, 512], strides = [1, 1]} : vector<8x1024xf32> to vector<8x512xf32>
    %c17_147 = arith.constant 17 : index
    %c0_148 = arith.constant 0 : index
    %262 = vector.load %arg2[%c17_147, %c0_148] : memref<27x512xf32, #tpu.memory_space<vmem>>, vector<1x512xf32>
    %263 = vector.broadcast %262 : vector<1x512xf32> to vector<8x512xf32>
    %264 = arith.mulf %261, %263 : vector<8x512xf32>
    %c136_149 = arith.constant 136 : index
    %c0_150 = arith.constant 0 : index
    %265 = vector.load %arg13[%c136_149, %c0_150] : memref<216x512xf32, #tpu.memory_space<vmem>>, vector<8x512xf32>
    tpu.vector_store %arg13[%c136_149, %c0_150], %264 {strides = array<i32>} : memref<216x512xf32, #tpu.memory_space<vmem>>, vector<8x512xf32>,
    %266 = vector.extract_strided_slice %175 {offsets = [0, 55], sizes = [8, 512], strides = [1, 1]} : vector<8x1024xf32> to vector<8x512xf32>
    %c18_151 = arith.constant 18 : index
    %c0_152 = arith.constant 0 : index
    %267 = vector.load %arg2[%c18_151, %c0_152] : memref<27x512xf32, #tpu.memory_space<vmem>>, vector<1x512xf32>
    %268 = vector.broadcast %267 : vector<1x512xf32> to vector<8x512xf32>
    %269 = arith.mulf %266, %268 : vector<8x512xf32>
    %c144_153 = arith.constant 144 : index
    %c0_154 = arith.constant 0 : index
    %270 = vector.load %arg13[%c144_153, %c0_154] : memref<216x512xf32, #tpu.memory_space<vmem>>, vector<8x512xf32>
    tpu.vector_store %arg13[%c144_153, %c0_154], %269 {strides = array<i32>} : memref<216x512xf32, #tpu.memory_space<vmem>>, vector<8x512xf32>,
    %271 = vector.extract_strided_slice %175 {offsets = [0, 56], sizes = [8, 512], strides = [1, 1]} : vector<8x1024xf32> to vector<8x512xf32>
    %c19_155 = arith.constant 19 : index
    %c0_156 = arith.constant 0 : index
    %272 = vector.load %arg2[%c19_155, %c0_156] : memref<27x512xf32, #tpu.memory_space<vmem>>, vector<1x512xf32>
    %273 = vector.broadcast %272 : vector<1x512xf32> to vector<8x512xf32>
    %274 = arith.mulf %271, %273 : vector<8x512xf32>
    %c152_157 = arith.constant 152 : index
    %c0_158 = arith.constant 0 : index
    %275 = vector.load %arg13[%c152_157, %c0_158] : memref<216x512xf32, #tpu.memory_space<vmem>>, vector<8x512xf32>
    tpu.vector_store %arg13[%c152_157, %c0_158], %274 {strides = array<i32>} : memref<216x512xf32, #tpu.memory_space<vmem>>, vector<8x512xf32>,
    %276 = vector.extract_strided_slice %175 {offsets = [0, 57], sizes = [8, 512], strides = [1, 1]} : vector<8x1024xf32> to vector<8x512xf32>
    %c20_159 = arith.constant 20 : index
    %c0_160 = arith.constant 0 : index
    %277 = vector.load %arg2[%c20_159, %c0_160] : memref<27x512xf32, #tpu.memory_space<vmem>>, vector<1x512xf32>
    %278 = vector.broadcast %277 : vector<1x512xf32> to vector<8x512xf32>
    %279 = arith.mulf %276, %278 : vector<8x512xf32>
    %c160_161 = arith.constant 160 : index
    %c0_162 = arith.constant 0 : index
    %280 = vector.load %arg13[%c160_161, %c0_162] : memref<216x512xf32, #tpu.memory_space<vmem>>, vector<8x512xf32>
    tpu.vector_store %arg13[%c160_161, %c0_162], %279 {strides = array<i32>} : memref<216x512xf32, #tpu.memory_space<vmem>>, vector<8x512xf32>,
    %281 = vector.extract_strided_slice %175 {offsets = [0, 63], sizes = [8, 512], strides = [1, 1]} : vector<8x1024xf32> to vector<8x512xf32>
    %c21_163 = arith.constant 21 : index
    %c0_164 = arith.constant 0 : index
    %282 = vector.load %arg2[%c21_163, %c0_164] : memref<27x512xf32, #tpu.memory_space<vmem>>, vector<1x512xf32>
    %283 = vector.broadcast %282 : vector<1x512xf32> to vector<8x512xf32>
    %284 = arith.mulf %281, %283 : vector<8x512xf32>
    %c168_165 = arith.constant 168 : index
    %c0_166 = arith.constant 0 : index
    %285 = vector.load %arg13[%c168_165, %c0_166] : memref<216x512xf32, #tpu.memory_space<vmem>>, vector<8x512xf32>
    tpu.vector_store %arg13[%c168_165, %c0_166], %284 {strides = array<i32>} : memref<216x512xf32, #tpu.memory_space<vmem>>, vector<8x512xf32>,
    %286 = vector.extract_strided_slice %175 {offsets = [0, 64], sizes = [8, 512], strides = [1, 1]} : vector<8x1024xf32> to vector<8x512xf32>
    %c22_167 = arith.constant 22 : index
    %c0_168 = arith.constant 0 : index
    %287 = vector.load %arg2[%c22_167, %c0_168] : memref<27x512xf32, #tpu.memory_space<vmem>>, vector<1x512xf32>
    %288 = vector.broadcast %287 : vector<1x512xf32> to vector<8x512xf32>
    %289 = arith.mulf %286, %288 : vector<8x512xf32>
    %c176_169 = arith.constant 176 : index
    %c0_170 = arith.constant 0 : index
    %290 = vector.load %arg13[%c176_169, %c0_170] : memref<216x512xf32, #tpu.memory_space<vmem>>, vector<8x512xf32>
    tpu.vector_store %arg13[%c176_169, %c0_170], %289 {strides = array<i32>} : memref<216x512xf32, #tpu.memory_space<vmem>>, vector<8x512xf32>,
    %291 = vector.extract_strided_slice %175 {offsets = [0, 65], sizes = [8, 512], strides = [1, 1]} : vector<8x1024xf32> to vector<8x512xf32>
    %c23_171 = arith.constant 23 : index
    %c0_172 = arith.constant 0 : index
    %292 = vector.load %arg2[%c23_171, %c0_172] : memref<27x512xf32, #tpu.memory_space<vmem>>, vector<1x512xf32>
    %293 = vector.broadcast %292 : vector<1x512xf32> to vector<8x512xf32>
    %294 = arith.mulf %291, %293 : vector<8x512xf32>
    %c184_173 = arith.constant 184 : index
    %c0_174 = arith.constant 0 : index
    %295 = vector.load %arg13[%c184_173, %c0_174] : memref<216x512xf32, #tpu.memory_space<vmem>>, vector<8x512xf32>
    tpu.vector_store %arg13[%c184_173, %c0_174], %294 {strides = array<i32>} : memref<216x512xf32, #tpu.memory_space<vmem>>, vector<8x512xf32>,
    %296 = vector.extract_strided_slice %175 {offsets = [0, 71], sizes = [8, 512], strides = [1, 1]} : vector<8x1024xf32> to vector<8x512xf32>
    %c24_175 = arith.constant 24 : index
    %c0_176 = arith.constant 0 : index
    %297 = vector.load %arg2[%c24_175, %c0_176] : memref<27x512xf32, #tpu.memory_space<vmem>>, vector<1x512xf32>
    %298 = vector.broadcast %297 : vector<1x512xf32> to vector<8x512xf32>
    %299 = arith.mulf %296, %298 : vector<8x512xf32>
    %c192_177 = arith.constant 192 : index
    %c0_178 = arith.constant 0 : index
    %300 = vector.load %arg13[%c192_177, %c0_178] : memref<216x512xf32, #tpu.memory_space<vmem>>, vector<8x512xf32>
    tpu.vector_store %arg13[%c192_177, %c0_178], %299 {strides = array<i32>} : memref<216x512xf32, #tpu.memory_space<vmem>>, vector<8x512xf32>,
    %301 = vector.extract_strided_slice %175 {offsets = [0, 72], sizes = [8, 512], strides = [1, 1]} : vector<8x1024xf32> to vector<8x512xf32>
    %c25_179 = arith.constant 25 : index
    %c0_180 = arith.constant 0 : index
    %302 = vector.load %arg2[%c25_179, %c0_180] : memref<27x512xf32, #tpu.memory_space<vmem>>, vector<1x512xf32>
    %303 = vector.broadcast %302 : vector<1x512xf32> to vector<8x512xf32>
    %304 = arith.mulf %301, %303 : vector<8x512xf32>
    %c200_181 = arith.constant 200 : index
    %c0_182 = arith.constant 0 : index
    %305 = vector.load %arg13[%c200_181, %c0_182] : memref<216x512xf32, #tpu.memory_space<vmem>>, vector<8x512xf32>
    tpu.vector_store %arg13[%c200_181, %c0_182], %304 {strides = array<i32>} : memref<216x512xf32, #tpu.memory_space<vmem>>, vector<8x512xf32>,
    %306 = vector.extract_strided_slice %175 {offsets = [0, 73], sizes = [8, 512], strides = [1, 1]} : vector<8x1024xf32> to vector<8x512xf32>
    %c26_183 = arith.constant 26 : index
    %c0_184 = arith.constant 0 : index
    %307 = vector.load %arg2[%c26_183, %c0_184] : memref<27x512xf32, #tpu.memory_space<vmem>>, vector<1x512xf32>
    %308 = vector.broadcast %307 : vector<1x512xf32> to vector<8x512xf32>
    %309 = arith.mulf %306, %308 : vector<8x512xf32>
    %c208_185 = arith.constant 208 : index
    %c0_186 = arith.constant 0 : index
    %310 = vector.load %arg13[%c208_185, %c0_186] : memref<216x512xf32, #tpu.memory_space<vmem>>, vector<8x512xf32>
    tpu.vector_store %arg13[%c208_185, %c0_186], %309 {strides = array<i32>} : memref<216x512xf32, #tpu.memory_space<vmem>>, vector<8x512xf32>,
    %c0_187 = arith.constant 0 : index
    %c0_188 = arith.constant 0 : index
    %311 = vector.load %arg7[%c0_187, %c0_188] : memref<8x216xbf16, #tpu.memory_space<vmem>>, vector<8x216xbf16>
    %c0_189 = arith.constant 0 : index
    %c0_190 = arith.constant 0 : index
    %312 = vector.load %arg13[%c0_189, %c0_190] : memref<216x512xf32, #tpu.memory_space<vmem>>, vector<216x512xf32>
    %313 = arith.truncf %312 : vector<216x512xf32> to vector<216x512xbf16>
    %cst_191 = arith.constant dense<0.000000e+00> : vector<8x512xf32>
    %314 = tpu.matmul %311, %313, %cst_191 {dimension_numbers = #tpu.dot_dimension_numbers<[1], [0], [0], [1], [0, 0, 1, 1], [], []>} : vector<8x216xbf16>, vector<216x512xbf16>, vector<8x512xf32> -> vector<8x512xf32>
    %c0_192 = arith.constant 0 : index
    %c0_193 = arith.constant 0 : index
    %315 = vector.load %arg8[%c0_192, %c0_193] : memref<8x1xf32, #tpu.memory_space<vmem>>, vector<8x1xf32>
    %316 = vector.broadcast %315 : vector<8x1xf32> to vector<8x512xf32>
    %317 = arith.addf %314, %316 : vector<8x512xf32>
    %c0_194 = arith.constant 0 : index
    %c0_195 = arith.constant 0 : index
    %318 = vector.load %arg9[%c0_194, %c0_195] : memref<8x1xf32, #tpu.memory_space<vmem>>, vector<8x1xf32>
    %c0_196 = arith.constant 0 : index
    %c0_197 = arith.constant 0 : index
    %319 = vector.load %arg10[%c0_196, %c0_197] : memref<8x1xf32, #tpu.memory_space<vmem>>, vector<8x1xf32>
    %cst_198 = arith.constant dense<0.000000e+00> : vector<8xf32>
    %320 = vector.multi_reduction <add>, %317, %cst_198 [1] : vector<8x512xf32> to vector<8xf32>
    %321 = vector.shape_cast %320 : vector<8xf32> to vector<8x1xf32>
    %cst_199 = arith.constant 0.001953125 : f32
    %322 = vector.broadcast %cst_199 : f32 to vector<8x1xf32>
    %323 = arith.mulf %321, %322 : vector<8x1xf32>
    %324 = arith.mulf %317, %317 : vector<8x512xf32>
    %cst_200 = arith.constant dense<0.000000e+00> : vector<8xf32>
    %325 = vector.multi_reduction <add>, %324, %cst_200 [1] : vector<8x512xf32> to vector<8xf32>
    %326 = vector.shape_cast %325 : vector<8xf32> to vector<8x1xf32>
    %cst_201 = arith.constant 0.001953125 : f32
    %327 = vector.broadcast %cst_201 : f32 to vector<8x1xf32>
    %328 = arith.mulf %326, %327 : vector<8x1xf32>
    %329 = arith.mulf %323, %323 : vector<8x1xf32>
    %330 = arith.subf %328, %329 : vector<8x1xf32>
    %cst_202 = arith.constant 0.000000e+00 : f32
    %331 = vector.broadcast %cst_202 : f32 to vector<8x1xf32>
    %332 = arith.maximumf %330, %331 : vector<8x1xf32>
    %cst_203 = arith.constant 9.99999974E-6 : f32
    %333 = vector.broadcast %cst_203 : f32 to vector<8x1xf32>
    %334 = arith.addf %332, %333 : vector<8x1xf32>
    %335 = math.rsqrt %334 : vector<8x1xf32>
    %336 = vector.broadcast %323 : vector<8x1xf32> to vector<8x512xf32>
    %337 = arith.subf %317, %336 : vector<8x512xf32>
    %338 = arith.mulf %335, %318 : vector<8x1xf32>
    %339 = vector.broadcast %338 : vector<8x1xf32> to vector<8x512xf32>
    %340 = arith.mulf %337, %339 : vector<8x512xf32>
    %341 = vector.broadcast %319 : vector<8x1xf32> to vector<8x512xf32>
    %342 = arith.addf %340, %341 : vector<8x512xf32>
    %cst_204 = arith.constant 0.000000e+00 : f32
    %343 = vector.broadcast %cst_204 : f32 to vector<8x512xf32>
    %344 = arith.cmpf oge, %342, %343 : vector<8x512xf32>
    %cst_205 = arith.constant 0.00999999977 : f32
    %345 = vector.broadcast %cst_205 : f32 to vector<8x512xf32>
    %346 = arith.mulf %345, %342 : vector<8x512xf32>
    %347 = arith.select %344, %342, %346 : vector<8x512xi1>, vector<8x512xf32>
    %c0_206 = arith.constant 0 : index
    %c0_207 = arith.constant 0 : index
    %c0_208 = arith.constant 0 : index
    %348 = vector.load %arg11[%c0_206, %c0_207, %c0_208] : memref<1x8x512xf32, #tpu.memory_space<vmem>>, vector<1x8x512xf32>
    %349 = vector.shape_cast %348 : vector<1x8x512xf32> to vector<8x512xf32>
    %350 = vector.shape_cast %347 : vector<8x512xf32> to vector<1x8x512xf32>
    tpu.vector_store %arg11[%c0_206, %c0_207, %c0_208], %350 {strides = array<i32>} : memref<1x8x512xf32, #tpu.memory_space<vmem>>, vector<1x8x512xf32>,
    return
  }
  func.func @transform_0(%arg0: i32) -> (i32, i32, i32) {
    %c0_i32 = arith.constant 0 : i32
    %c0_i32_0 = arith.constant 0 : i32
    %c0_i32_1 = arith.constant 0 : i32
    return %arg0, %c0_i32, %c0_i32_0 : i32, i32, i32
  }
  func.func @transform_1(%arg0: i32) -> (i32, i32) {
    %c0_i32 = arith.constant 0 : i32
    %c0_i32_0 = arith.constant 0 : i32
    %c0_i32_1 = arith.constant 0 : i32
    return %c0_i32, %c0_i32_0 : i32, i32
  }
  func.func @transform_2(%arg0: i32) -> (i32, i32) {
    %c0_i32 = arith.constant 0 : i32
    %c0_i32_0 = arith.constant 0 : i32
    %c0_i32_1 = arith.constant 0 : i32
    return %c0_i32, %c0_i32_0 : i32, i32
  }
  func.func @transform_3(%arg0: i32) -> (i32, i32) {
    %c0_i32 = arith.constant 0 : i32
    %c0_i32_0 = arith.constant 0 : i32
    %c0_i32_1 = arith.constant 0 : i32
    return %c0_i32, %c0_i32_0 : i32, i32
  }
  func.func @transform_4(%arg0: i32) -> (i32, i32) {
    %c0_i32 = arith.constant 0 : i32
    %c0_i32_0 = arith.constant 0 : i32
    %c0_i32_1 = arith.constant 0 : i32
    return %c0_i32, %c0_i32_0 : i32, i32
  }
  func.func @transform_5(%arg0: i32) -> (i32, i32) {
    %c0_i32 = arith.constant 0 : i32
    %c0_i32_0 = arith.constant 0 : i32
    %c0_i32_1 = arith.constant 0 : i32
    return %c0_i32, %c0_i32_0 : i32, i32
  }
  func.func @transform_6(%arg0: i32) -> (i32, i32) {
    %c0_i32 = arith.constant 0 : i32
    %c0_i32_0 = arith.constant 0 : i32
    %c0_i32_1 = arith.constant 0 : i32
    return %c0_i32, %c0_i32_0 : i32, i32
  }
  func.func @transform_7(%arg0: i32) -> (i32, i32) {
    %c0_i32 = arith.constant 0 : i32
    %c0_i32_0 = arith.constant 0 : i32
    %c0_i32_1 = arith.constant 0 : i32
    return %c0_i32, %c0_i32_0 : i32, i32
  }
  func.func @transform_8(%arg0: i32) -> (i32, i32) {
    %c0_i32 = arith.constant 0 : i32
    %c0_i32_0 = arith.constant 0 : i32
    %c0_i32_1 = arith.constant 0 : i32
    return %c0_i32, %c0_i32_0 : i32, i32
  }
  func.func @transform_9(%arg0: i32) -> (i32, i32) {
    %c0_i32 = arith.constant 0 : i32
    %c0_i32_0 = arith.constant 0 : i32
    %c0_i32_1 = arith.constant 0 : i32
    return %c0_i32, %c0_i32_0 : i32, i32
  }
  func.func @transform_10(%arg0: i32) -> (i32, i32, i32) {
    %c0_i32 = arith.constant 0 : i32
    %c0_i32_0 = arith.constant 0 : i32
    %c0_i32_1 = arith.constant 0 : i32
    return %arg0, %c0_i32, %c0_i32_0 : i32, i32, i32
  }
}

</mosaic_0001>

<bundles_post_ra>
// kernel: double_conv.1
= control target key start
LH: loop header
LB: loop body
LE: loop exit
PB: predicated region body
PF: predicated region fallthrough
CT: control target
= control target key end

     0   :  { %s5403_s13 = smov 0   ;;  %s8376_s0 = inlined_call_operand.vmem [shape: f32[2,8,512], index: 0, kind: input, shape index: {}]   ;;  %s8377_s1 = inlined_call_operand.vmem [shape: f32[27,512], index: 1, kind: input, shape index: {}]   ;;  %s8378_s2 = inlined_call_operand.vmem [shape: bf16[8,216], index: 2, kind: input, shape index: {}]   ;;  %s8379_s3 = inlined_call_operand.vmem [shape: f32[8,1], index: 3, kind: input, shape index: {}]   ;;  %s8380_s4 = inlined_call_operand.vmem [shape: f32[8,1], index: 4, kind: input, shape index: {}]   ;;  %s8381_s5 = inlined_call_operand.vmem [shape: f32[8,1], index: 5, kind: input, shape index: {}]   ;;  %s8382_s6 = inlined_call_operand.vmem [shape: bf16[8,216], index: 6, kind: input, shape index: {}]   ;;  %s8383_s7 = inlined_call_operand.vmem [shape: f32[8,1], index: 7, kind: input, shape index: {}]   ;;  %s8384_s8 = inlined_call_operand.vmem [shape: f32[8,1], index: 8, kind: input, shape index: {}]   ;;  %s8385_s9 = inlined_call_operand.vmem [shape: f32[8,1], index: 9, kind: input, shape index: {}]   ;;  %s8386_s10 = inlined_call_operand.vmem [shape: f32[2,8,512], index: 10, kind: output, shape index: {}]  }
   0x1 LB: > { %s4625_s14 = sadd.s32 4294967295, %s5328_s13   ;;  %p4629_p0 = scmp.ge.s32.totalorder %s5328_s13, 1  ;;  %s5328_s13 = sphi %s5403_s13, %s20_s13  }
   0x2   : > { %p312_p1 = scmp.lt.s32.totalorder %s5328_s13, 3 }
   0x4   : > { %p313_p2 = pnand %p4629_p0, %p312_p1 }
   0x6   : > { %316 = sbr.rel (%p313_p2) target bundleno = 1872 (0x750), region = 60 }
   0xd   : > { %v367_v0 = vlaneseq  ;;  %v365_v2 = vld [vmem:[%s8377_s1] ss:$8 sm:$0xf]  ;;  %v4634_v6 = vld [vmem:[%s8377_s1 + $0x1] ss:$8 sm:$0xf] }
   0xe   : > { %s8442_s19 = smov 55   ;;  %s5331_s20 = smov 56   ;;  %v4635_v16 = vld [vmem:[%s8377_s1 + $0x2] ss:$8 sm:$0xf]  ;;  %vm391_vm0 = vcmask 449536  }
   0xf   : > { %v368_v1 = vshrl.u32 %v367_v0, 7  ;;  %v4636_v19 = vld [vmem:[%s8377_s1 + $0x3] ss:$8 sm:$0xf]  ;;  %s5332_s25 = smov 57   ;;  %s5333_s26 = smov 63  }
  0x10   : > { %v4637_v26 = vld [vmem:[%s8377_s1 + $0x4] ss:$8 sm:$0xf]  ;;  %v4638_v29 = vld [vmem:[%s8377_s1 + $0x5] ss:$8 sm:$0xf] }
  0x11   : > { %v5414_v3 = vsub.s32 2, %v368_v1  ;;  %v5416_v4 = vsub.s32 0, %v368_v1  ;;  %v5418_v5 = vsub.s32 1, %v368_v1  ;;  %v5433_v13 = vsub.s32 3, %v368_v1  ;;  %s5334_s11 = smov 64   ;;  %s5335_s12 = smov 65  }
  0x12   : > { %v4639_v36 = vld [vmem:[%s8377_s1 + $0x6] ss:$8 sm:$0xf]  ;;  %v4640_v39 = vld [vmem:[%s8377_s1 + $0x7] ss:$8 sm:$0xf] }
  0x13   : > { %8532 = vst [vmem:[#allocation4_spill] sm:$0xff] %v5414_v3  ;;  %8533 = vst [vmem:[#allocation5_spill] sm:$0xff] %v5416_v4  ;;  %v378_v7 = vrot.slane %v365_v2, %v5414_v3  ;;  %v370_v8 = vrot.slane %v365_v2, %v5416_v4  ;;  %v439_v9 = vrot.slane %v4634_v6, %v5416_v4  ;;  %s8440_s21 = smov 71   ;;  %s8438_s22 = smov 72   ;;  %vm460_vm1 = vcmask 457728  }
  0x14   : > { %8534 = vst [vmem:[#allocation6_spill] sm:$0xff] %v5418_v5  ;;  %v374_v10 = vrot.slane %v365_v2, %v5418_v5  ;;  %v447_v11 = vrot.slane %v4634_v6, %v5414_v3  ;;  %v443_v12 = vrot.slane %v4634_v6, %v5418_v5  ;;  %8535 = vst [vmem:[#allocation7_spill] sm:$0xff] %v5433_v13  ;;  %v4641_v46 = vld [vmem:[%s8377_s1 + $0x20] ss:$8 sm:$0xf]  ;;  %s8436_s29 = smov 73  }
  0x15   : > { %387 = vrot.lane.b32.xlu1 %v378_v7, %s8442_s19  ;;  %383 = vrot.lane.b32.xlu0 %v370_v8, %s8442_s19  ;;  %v451_v14 = vrot.slane %v4634_v6, %v5433_v13  ;;  %v382_v15 = vrot.slane %v365_v2, %v5433_v13  ;;  %v512_v17 = vrot.slane %v4635_v16, %v5418_v5  ;;  %v4642_v49 = vld [vmem:[%s8377_s1 + $0x21] ss:$8 sm:$0xf]  ;;  %s8389_s30 = smov 119   ;;  %s8387_s23 = smov 120   ;;  %vm529_vm2 = vcmask 465920  }
  0x16   : > { %v508_v18 = vrot.slane %v4635_v16, %v5416_v4  ;;  %v577_v20 = vrot.slane %v4636_v19, %v5416_v4  ;;  %v516_v21 = vrot.slane %v4635_v16, %v5414_v3  ;;  %v585_v22 = vrot.slane %v4636_v19, %v5414_v3  ;;  %v4643_v56 = vld [vmem:[%s8377_s1 + $0x22] ss:$8 sm:$0xf]  ;;  %v4644_v59 = vld [vmem:[%s8377_s1 + $0x23] ss:$8 sm:$0xf] }
  0x17   : > { %v581_v23 = vrot.slane %v4636_v19, %v5418_v5  ;;  %v589_v24 = vrot.slane %v4636_v19, %v5433_v13  ;;  %v520_v25 = vrot.slane %v4635_v16, %v5433_v13  ;;  %v650_v27 = vrot.slane %v4637_v26, %v5418_v5  ;;  %s8393_s24 = smov 121   ;;  %v4645_v2 = vld [vmem:[%s8377_s1 + $0x24] ss:$8 sm:$0xf]  ;;  %s8391_s15 = smov 127  }
  0x18   : > { %v646_v28 = vrot.slane %v4637_v26, %v5416_v4  ;;  %v714_v30 = vrot.slane %v4638_v29, %v5416_v4  ;;  %v654_v31 = vrot.slane %v4637_v26, %v5414_v3  ;;  %v722_v32 = vrot.slane %v4638_v29, %v5414_v3  ;;  %s8432_s28 = smov 1   ;;  %s8430_s16 = smov 7  }
  0x19   : > { %452 = vrot.lane.b32.xlu1 %v439_v9, %s5331_s20  ;;  %385 = vrot.lane.b32.xlu0 %v374_v10, %s8442_s19  ;;  %v718_v33 = vrot.slane %v4638_v29, %v5418_v5  ;;  %v726_v34 = vrot.slane %v4638_v29, %v5433_v13  ;;  %v658_v35 = vrot.slane %v4637_v26, %v5433_v13  ;;  %v4647_v10 = vld [vmem:[%s8377_s1 + $0x26] ss:$8 sm:$0xf]  ;;  %v4650_v26 = vld [vmem:[%s8377_s1 + $0x41] ss:$8 sm:$0xf] }
  0x1a   : > { %v785_v37 = vrot.slane %v4639_v36, %v5418_v5  ;;  %v781_v38 = vrot.slane %v4639_v36, %v5416_v4  ;;  %v848_v40 = vrot.slane %v4640_v39, %v5416_v4  ;;  %v789_v41 = vrot.slane %v4639_v36, %v5414_v3  ;;  %s8427_s17 = smov 8   ;;  %s8425_s18 = smov 9  }
  0x1b   : > { %v856_v42 = vrot.slane %v4640_v39, %v5414_v3  ;;  %v852_v43 = vrot.slane %v4640_v39, %v5418_v5  ;;  %v860_v44 = vrot.slane %v4640_v39, %v5433_v13  ;;  %v793_v45 = vrot.slane %v4639_v36, %v5433_v13  ;;  %v4651_v39 = vld [vmem:[%s8377_s1 + $0x42] ss:$8 sm:$0xf]  ;;  %p350_p3 = scmp.lt.s32.totalorder %s4625_s14, 1  ;;  %s8570_s27 = smov 119  }
  0x1c   : > { %v919_v47 = vrot.slane %v4641_v46, %v5418_v5  ;;  %v915_v48 = vrot.slane %v4641_v46, %v5416_v4  ;;  %v982_v50 = vrot.slane %v4642_v49, %v5416_v4  ;;  %v923_v51 = vrot.slane %v4641_v46, %v5414_v3 }
  0x1d   : > { %456 = vrot.lane.b32.xlu1 %v447_v11, %s5331_s20  ;;  %454 = vrot.lane.b32.xlu0 %v443_v12, %s5331_s20  ;;  %v990_v52 = vrot.slane %v4642_v49, %v5414_v3  ;;  %v986_v53 = vrot.slane %v4642_v49, %v5418_v5  ;;  %v994_v54 = vrot.slane %v4642_v49, %v5433_v13  ;;  %s8923_s14 = smov (!%p350_p3, %s4625_s14), 1  ;;  %vm598_vm3 = vcmask 515072  }
  0x1e   : > { %v927_v55 = vrot.slane %v4641_v46, %v5433_v13  ;;  %v1055_v57 = vrot.slane %v4643_v56, %v5418_v5  ;;  %v1051_v58 = vrot.slane %v4643_v56, %v5416_v4  ;;  %v1120_v60 = vrot.slane %v4644_v59, %v5416_v4 }
  0x1f   : > { %v1059_v61 = vrot.slane %v4643_v56, %v5414_v3  ;;  %v1128_v62 = vrot.slane %v4644_v59, %v5414_v3  ;;  %v1124_v63 = vrot.slane %v4644_v59, %v5418_v5  ;;  %v1132_v0 = vrot.slane %v4644_v59, %v5433_v13 }
  0x20   : > { %v1063_v1 = vrot.slane %v4643_v56, %v5433_v13  ;;  %v1193_v6 = vrot.slane %v4645_v2, %v5418_v5  ;;  %v1189_v7 = vrot.slane %v4645_v2, %v5416_v4  ;;  %v1201_v8 = vrot.slane %v4645_v2, %v5433_v13 }
  0x21   : > { %458 = vrot.lane.b32.xlu1 %v451_v14, %s5331_s20  ;;  %389 = vrot.lane.b32.xlu0 %v382_v15, %s8442_s19  ;;  %v1197_v9 = vrot.slane %v4645_v2, %v5414_v3  ;;  %v1293_v11 = vrot.slane %v4647_v10, %v5418_v5  ;;  %v1289_v12 = vrot.slane %v4647_v10, %v5416_v4  ;;  %v4648_v14 = vld [vmem:[%s8377_s1 + $0x27] ss:$8 sm:$0xf]  ;;  %vm667_vm4 = vcmask 523264  }
  0x22   : > { %v1356_v15 = vrot.slane %v4648_v14, %v5416_v4  ;;  %v1297_v16 = vrot.slane %v4647_v10, %v5414_v3  ;;  %v1368_v19 = vrot.slane %v4648_v14, %v5433_v13  ;;  %v1490_v29 = vrot.slane %v4650_v26, %v5416_v4 }
  0x23   : > { %v1569_v56 = vrot.slane %v4651_v39, %v5433_v13  ;;  %vm627_vm5 = vcmask 531456   ;;  %vm558_vm6 = vcmask 580608   ;;  %vm8429_vm7 = vcmask 588800  }
  0x24   : > { %vm420_vm8 = vcmask 596992   ;;  %vm8423_vm9 = vcmask 973824   ;;  %vm8504_vm10 = vcmask 982016   ;;  %vm8435_vm11 = vcmask 990208  }
  0x25   : > { %523 = vrot.lane.b32.xlu1 %v512_v17, %s5332_s25  ;;  %521 = vrot.lane.b32.xlu0 %v508_v18, %s5332_s25  ;;  %v1364_v17 = vrot.slane %v4648_v14, %v5414_v3  ;;  %v1360_v18 = vrot.slane %v4648_v14, %v5418_v5  ;;  %vm8505_vm12 = vcmask 1039360   ;;  %vm8508_vm13 = vcmask 56320  }
  0x26   : > { %vm8506_vm14 = vcmask 7168   ;;  %vm1032_vm15 = vcmask 72704  }
  0x29   : > { %590 = vrot.lane.b32.xlu1 %v577_v20, %s5333_s26  ;;  %525 = vrot.lane.b32.xlu0 %v516_v21, %s5332_s25  ;;  %v1301_v20 = vrot.slane %v4647_v10, %v5433_v13  ;;  %v4649_v21 = vld [vmem:[%s8377_s1 + $0x40] ss:$8 sm:$0xf] }
  0x2d   : > { %594 = vrot.lane.b32.xlu1 %v585_v22, %s5333_s26  ;;  %592 = vrot.lane.b32.xlu0 %v581_v23, %s5333_s26 }
  0x31   : > { %596 = vrot.lane.b32.xlu1 %v589_v24, %s5333_s26  ;;  %527 = vrot.lane.b32.xlu0 %v520_v25, %s5332_s25  ;;  %v1427_v24 = vrot.slane %v4649_v21, %v5418_v5  ;;  %v1423_v25 = vrot.slane %v4649_v21, %v5416_v4 }
  0x35   : > { %661 = vrot.lane.b32.xlu1 %v650_v27, %s5334_s11  ;;  %659 = vrot.lane.b32.xlu0 %v646_v28, %s5334_s11 }
  0x39   : > { %727 = vrot.lane.b32.xlu1 %v714_v30, %s5335_s12  ;;  %663 = vrot.lane.b32.xlu0 %v654_v31, %s5334_s11  ;;  %v1431_v30 = vrot.slane %v4649_v21, %v5414_v3 }
  0x3d   : > { %731 = vrot.lane.b32.xlu1 %v722_v32, %s5335_s12  ;;  %729 = vrot.lane.b32.xlu0 %v718_v33, %s5335_s12  ;;  %v1498_v33 = vrot.slane %v4650_v26, %v5414_v3 }
  0x41   : > { %733 = vrot.lane.b32.xlu1 %v726_v34, %s5335_s12  ;;  %665 = vrot.lane.b32.xlu0 %v658_v35, %s5334_s11  ;;  %v1494_v34 = vrot.slane %v4650_v26, %v5418_v5 }
  0x45   : > { %796 = vrot.lane.b32.xlu1 %v785_v37, %s8440_s21  ;;  %794 = vrot.lane.b32.xlu0 %v781_v38, %s8440_s21  ;;  %v1502_v37 = vrot.slane %v4650_v26, %v5433_v13  ;;  %v1435_v38 = vrot.slane %v4649_v21, %v5433_v13 }
  0x49   : > { %861 = vrot.lane.b32.xlu1 %v848_v40, %s8438_s22  ;;  %798 = vrot.lane.b32.xlu0 %v789_v41, %s8440_s21 }
  0x4d   : > { %865 = vrot.lane.b32.xlu1 %v856_v42, %s8438_s22  ;;  %863 = vrot.lane.b32.xlu0 %v852_v43, %s8438_s22  ;;  %v1561_v42 = vrot.slane %v4651_v39, %v5418_v5  ;;  %v1557_v43 = vrot.slane %v4651_v39, %v5416_v4 }
  0x51   : > { %867 = vrot.lane.b32.xlu1 %v860_v44, %s8438_s22  ;;  %800 = vrot.lane.b32.xlu0 %v793_v45, %s8440_s21  ;;  %v4652_v44 = vld [vmem:[%s8377_s1 + $0x43] ss:$8 sm:$0xf] }
  0x55   : > { %930 = vrot.lane.b32.xlu1 %v919_v47, %s8436_s29  ;;  %928 = vrot.lane.b32.xlu0 %v915_v48, %s8436_s29  ;;  %v1624_v47 = vrot.slane %v4652_v44, %v5416_v4  ;;  %v1565_v48 = vrot.slane %v4651_v39, %v5414_v3 }
  0x59   : > { %995 = vrot.lane.b32.xlu1 %v982_v50, %s8389_s30  ;;  %932 = vrot.lane.b32.xlu0 %v923_v51, %s8436_s29  ;;  %v1632_v51 = vrot.slane %v4652_v44, %v5414_v3 }
  0x5d   : > { %999 = vrot.lane.b32.xlu1 %v990_v52, %s8389_s30  ;;  %997 = vrot.lane.b32.xlu0 %v986_v53, %s8389_s30  ;;  %v1628_v52 = vrot.slane %v4652_v44, %v5418_v5 }
  0x61   : > { %1001 = vrot.lane.b32.xlu1 %v994_v54, %s8389_s30  ;;  %934 = vrot.lane.b32.xlu0 %v927_v55, %s8436_s29  ;;  %v1636_v55 = vrot.slane %v4652_v44, %v5433_v13 }
  0x65   : > { %1066 = vrot.lane.b32.xlu1 %v1055_v57, %s8387_s23  ;;  %1064 = vrot.lane.b32.xlu0 %v1051_v58, %s8387_s23  ;;  %v4653_v57 = vld [vmem:[%s8377_s1 + $0x44] ss:$8 sm:$0xf] }
  0x66   : > { %v1699_v2 = vrot.slane %v4653_v57, %v5414_v3  ;;  %v1703_v14 = vrot.slane %v4653_v57, %v5433_v13 }
  0x69   : > { %1133 = vrot.lane.b32.xlu1 %v1120_v60, %s8393_s24  ;;  %1068 = vrot.lane.b32.xlu0 %v1059_v61, %s8387_s23  ;;  %v1695_v60 = vrot.slane %v4653_v57, %v5418_v5  ;;  %v1691_v61 = vrot.slane %v4653_v57, %v5416_v4 }
  0x6d   : > { %1137 = vrot.lane.b32.xlu1 %v1128_v62, %s8393_s24  ;;  %1135 = vrot.lane.b32.xlu0 %v1124_v63, %s8393_s24  ;;  %v4654_v62 = vld [vmem:[%s8377_s1 + $0x45] ss:$8 sm:$0xf] }
  0x71   : > { %1139 = vrot.lane.b32.xlu1 %v1132_v0, %s8393_s24  ;;  %1070 = vrot.lane.b32.xlu0 %v1063_v1, %s8387_s23  ;;  %v1758_v1 = vrot.slane %v4654_v62, %v5416_v4  ;;  %s8424_s23 = sshll.u32 %s8923_s14, 5  ;;  %s8560_s24 = smov 121  }
  0x72   : > { %s5795_s30 = scalar_lea.vmem %s8376_s0, %s8424_s23  ;;  %s8572_s23 = smov 120  }
  0x75   : > { %1204 = vrot.lane.b32.xlu1 %v1193_v6, %s8391_s15  ;;  %1202 = vrot.lane.b32.xlu0 %v1189_v7, %s8391_s15 }
  0x79   : > { %1208 = vrot.lane.b32.xlu1 %v1201_v8, %s8391_s15  ;;  %1206 = vrot.lane.b32.xlu0 %v1197_v9, %s8391_s15  ;;  %v1766_v8 = vrot.slane %v4654_v62, %v5414_v3  ;;  %v1762_v9 = vrot.slane %v4654_v62, %v5418_v5  ;;  %s8564_s15 = smov 127  }
  0x7d   : > { %1304 = vrot.lane.b32.xlu1 %v1293_v11, %s8432_s28  ;;  %1302 = vrot.lane.b32.xlu0 %v1289_v12, %s8432_s28  ;;  %v1770_v12 = vrot.slane %v4654_v62, %v5433_v13 }
  0x81   : > { %1369 = vrot.lane.b32.xlu1 %v1356_v15, %s8430_s16  ;;  %1306 = vrot.lane.b32.xlu0 %v1297_v16, %s8432_s28  ;;  %v4655_v15 = vld [vmem:[%s8377_s1 + $0x46] ss:$8 sm:$0xf] }
  0x82   : > { %v1833_v26 = vrot.slane %v4655_v15, %v5414_v3 }
  0x85   : > { %1373 = vrot.lane.b32.xlu1 %v1364_v17, %s8430_s16  ;;  %1371 = vrot.lane.b32.xlu0 %v1360_v18, %s8430_s16  ;;  %v1829_v18 = vrot.slane %v4655_v15, %v5418_v5 }
  0x87   : > { %v5585_v22 = vpop.permute.xlu1 %387  ;;  %v5587_v23 = vpop.permute.xlu0 %383 }
  0x89   : > { %1375 = vrot.lane.b32.xlu1 %v1368_v19, %s8430_s16  ;;  %1308 = vrot.lane.b32.xlu0 %v1301_v20, %s8432_s28  ;;  %v1825_v19 = vrot.slane %v4655_v15, %v5416_v4  ;;  %v4656_v20 = vld [vmem:[%s8377_s1 + $0x47] ss:$8 sm:$0xf] }
  0x8a   : > { %v1904_v39 = vrot.slane %v4656_v20, %v5433_v13 }
  0x8b   : > { %v5596_v27 = vpop.permute.xlu1 %452  ;;  %v5598_v28 = vpop.permute.xlu0 %385 }
  0x8d   : > { %1438 = vrot.lane.b32.xlu1 %v1427_v24, %s8427_s17  ;;  %1436 = vrot.lane.b32.xlu0 %v1423_v25, %s8427_s17  ;;  %v1892_v25 = vrot.slane %v4656_v20, %v5416_v4 }
  0x8f   : > { %v5604_v31 = vpop.permute.xlu1 %456  ;;  %v5606_v32 = vpop.permute.xlu0 %454 }
  0x91   : > { %1503 = vrot.lane.b32.xlu1 %v1490_v29, %s8425_s18  ;;  %1440 = vrot.lane.b32.xlu0 %v1431_v30, %s8427_s17 }
  0x93   : > { %v5612_v35 = vpop.permute.xlu1 %458  ;;  %v5614_v36 = vpop.permute.xlu0 %389 }
  0x95   : > { %1507 = vrot.lane.b32.xlu1 %v1498_v33, %s8425_s18  ;;  %1505 = vrot.lane.b32.xlu0 %v1494_v34, %s8425_s18  ;;  %v1900_v33 = vrot.slane %v4656_v20, %v5414_v3  ;;  %v1896_v34 = vrot.slane %v4656_v20, %v5418_v5 }
  0x97   : > { %v5623_v40 = vpop.permute.xlu1 %523  ;;  %v5625_v41 = vpop.permute.xlu0 %521 }
  0x99   : > { %1509 = vrot.lane.b32.xlu1 %v1502_v37, %s8425_s18  ;;  %1442 = vrot.lane.b32.xlu0 %v1435_v38, %s8427_s17 }
  0x9b   : > { %v5634_v45 = vpop.permute.xlu1 %590  ;;  %v5636_v46 = vpop.permute.xlu0 %525 }
  0x9d   : > { %1572 = vrot.lane.b32.xlu1 %v1561_v42, %s8442_s19  ;;  %1570 = vrot.lane.b32.xlu0 %v1557_v43, %s8442_s19  ;;  %v1837_v42 = vrot.slane %v4655_v15, %v5433_v13  ;;  %v4657_v43 = vld [vmem:[%s8377_s1 + $0x60] ss:$8 sm:$0xf]  ;;  %v4659_v15 = vld [vmem:[%s8377_s1 + $0x62] ss:$8 sm:$0xf] }
  0x9e   : > { %v2097_v20 = vrot.slane %v4659_v15, %v5418_v5 }
  0x9f   : > { %v5642_v49 = vpop.permute.xlu1 %594  ;;  %v5644_v50 = vpop.permute.xlu0 %592 }
  0xa1   : > { %1637 = vrot.lane.b32.xlu1 %v1624_v47, %s5331_s20  ;;  %1574 = vrot.lane.b32.xlu0 %v1565_v48, %s8442_s19  ;;  %v1963_v48 = vrot.slane %v4657_v43, %v5418_v5 }
  0xa3   : > { %v5650_v53 = vpop.permute.xlu1 %596  ;;  %v5652_v54 = vpop.permute.xlu0 %527 }
  0xa5   : > { %1641 = vrot.lane.b32.xlu1 %v1632_v51, %s5331_s20  ;;  %1639 = vrot.lane.b32.xlu0 %v1628_v52, %s5331_s20  ;;  %v1959_v51 = vrot.slane %v4657_v43, %v5416_v4  ;;  %v4658_v52 = vld [vmem:[%s8377_s1 + $0x61] ss:$8 sm:$0xf] }
  0xa6   : > { %v2026_v57 = vrot.slane %v4658_v52, %v5416_v4 }
  0xa7   : > { %v5661_v58 = vpop.permute.xlu1 %661  ;;  %v5663_v59 = vpop.permute.xlu0 %659 }
  0xa9   : > { %1643 = vrot.lane.b32.xlu1 %v1636_v55, %s5331_s20  ;;  %1576 = vrot.lane.b32.xlu0 %v1569_v56, %s8442_s19 }
  0xab   : > { %v5672_v63 = vpop.permute.xlu1 %727  ;;  %v5674_v0 = vpop.permute.xlu0 %663 }
  0xad   : > { %1706 = vrot.lane.b32.xlu1 %v1695_v60, %s5332_s25  ;;  %1704 = vrot.lane.b32.xlu0 %v1691_v61, %s5332_s25  ;;  %v1967_v60 = vrot.slane %v4657_v43, %v5414_v3 }
  0xaf   : > { %v5680_v6 = vpop.permute.xlu1 %731  ;;  %v5682_v7 = vpop.permute.xlu0 %729 }
  0xb1   : > { %1771 = vrot.lane.b32.xlu1 %v1758_v1, %s5333_s26  ;;  %1708 = vrot.lane.b32.xlu0 %v1699_v2, %s5332_s25  ;;  %v2034_v1 = vrot.slane %v4658_v52, %v5414_v3  ;;  %v2030_v2 = vrot.slane %v4658_v52, %v5418_v5 }
  0xb3   : > { %v5688_v10 = vpop.permute.xlu1 %733  ;;  %v5690_v11 = vpop.permute.xlu0 %665 }
  0xb5   : > { %1775 = vrot.lane.b32.xlu1 %v1766_v8, %s5333_s26  ;;  %1773 = vrot.lane.b32.xlu0 %v1762_v9, %s5333_s26 }
  0xb7   : > { %v5699_v16 = vpop.permute.xlu1 %796  ;;  %v5701_v17 = vpop.permute.xlu0 %794 }
  0xb9   : > { %1777 = vrot.lane.b32.xlu1 %v1770_v12, %s5333_s26  ;;  %1710 = vrot.lane.b32.xlu0 %v1703_v14, %s5332_s25  ;;  %v2038_v12 = vrot.slane %v4658_v52, %v5433_v13  ;;  %v1971_v14 = vrot.slane %v4657_v43, %v5433_v13  ;;  %v393_v43 = vsel %vm391_vm0, %v5598_v28, %v5585_v22 }
  0xba   : > { %v2105_v52 = vrot.slane %v4659_v15, %v5433_v13 }
  0xbb   : > { %v5710_v21 = vpop.permute.xlu1 %861  ;;  %v5712_v24 = vpop.permute.xlu0 %798 }
  0xbd   : > { %1840 = vrot.lane.b32.xlu1 %v1829_v18, %s5334_s11  ;;  %1838 = vrot.lane.b32.xlu0 %v1825_v19, %s5334_s11 }
  0xbf   : > { %v5718_v29 = vpop.permute.xlu1 %865  ;;  %v5720_v30 = vpop.permute.xlu0 %863 }
  0xc1   : > { %1905 = vrot.lane.b32.xlu1 %v1892_v25, %s5335_s12  ;;  %1842 = vrot.lane.b32.xlu0 %v1833_v26, %s5334_s11  ;;  %v2093_v25 = vrot.slane %v4659_v15, %v5416_v4 }
  0xc3   : > { %v5726_v37 = vpop.permute.xlu1 %867  ;;  %v5728_v38 = vpop.permute.xlu0 %800 }
  0xc5   : > { %1909 = vrot.lane.b32.xlu1 %v1900_v33, %s5335_s12  ;;  %1907 = vrot.lane.b32.xlu0 %v1896_v34, %s5335_s12  ;;  %v5802_v34 = vld [vmem:[%s5795_s30] sm:$0xff] }
  0xc7   : > { %v5737_v44 = vpop.permute.xlu1 %930  ;;  %v5739_v47 = vpop.permute.xlu0 %928 }
  0xc9   : > { %1911 = vrot.lane.b32.xlu1 %v1904_v39, %s5335_s12  ;;  %1844 = vrot.lane.b32.xlu0 %v1837_v42, %s5334_s11  ;;  %v5805_v39 = vld [vmem:[%s5795_s30 + $0x8] sm:$0xff]  ;;  %v392_v42 = vsel %vm391_vm0, %v5587_v23, %v5598_v28 }
  0xca   : > { %v402_v28 = vmul.f32 %v393_v43, %v5805_v39 }
  0xcb   : > { %v5748_v55 = vpop.permute.xlu1 %995  ;;  %v5750_v56 = vpop.permute.xlu0 %932 }
  0xcd   : > { %1974 = vrot.lane.b32.xlu1 %v1963_v48, %s8440_s21  ;;  %1972 = vrot.lane.b32.xlu0 %v1959_v51, %s8440_s21  ;;  %v461_v48 = vsel %vm460_vm1, %v5596_v27, %v5606_v32  ;;  %v462_v51 = vsel %vm460_vm1, %v5606_v32, %v5604_v31 }
  0xcf   : > { %v5756_v61 = vpop.permute.xlu1 %999  ;;  %v5758_v62 = vpop.permute.xlu0 %997 }
  0xd1   : > { %2039 = vrot.lane.b32.xlu1 %v2026_v57, %s8438_s22  ;;  %1976 = vrot.lane.b32.xlu0 %v1967_v60, %s8440_s21  ;;  %v2101_v57 = vrot.slane %v4659_v15, %v5414_v3  ;;  %v401_v60 = vmul.f32 %v392_v42, %v5802_v34  ;;  %v394_v15 = vsel %vm391_vm0, %v5585_v22, %v5614_v36 }
  0xd3   : > { %v5766_v8 = vpop.permute.xlu1 %1001  ;;  %v5768_v9 = vpop.permute.xlu0 %934  ;;  %v4728_v42 = vpack.i.bf16 %v402_v28, %v401_v60 }
  0xd5   : > { %2043 = vrot.lane.b32.xlu1 %v2034_v1, %s8438_s22  ;;  %2041 = vrot.lane.b32.xlu0 %v2030_v2, %s8438_s22  ;;  %v470_v1 = vmul.f32 %v461_v48, %v5802_v34  ;;  %v471_v2 = vmul.f32 %v462_v51, %v5805_v39 }
  0xd7   : > { %v5781_v18 = vpop.permute.xlu1 %1066  ;;  %v5783_v19 = vpop.permute.xlu0 %1064  ;;  %v4733_v43 = vpack.i.bf16 %v471_v2, %v470_v1 }
  0xd9   : > { %2045 = vrot.lane.b32.xlu1 %v2038_v12, %s8438_s22  ;;  %1978 = vrot.lane.b32.xlu0 %v1971_v14, %s8440_s21  ;;  %v5832_v14 = vld [vmem:[%s5795_s30 + $0x10] sm:$0xff] }
  0xda   : > { %v403_v51 = vmul.f32 %v394_v15, %v5832_v14 }
  0xdb   : > { %v5797_v26 = vpop.permute.xlu1 %1133  ;;  %v5799_v33 = vpop.permute.xlu0 %1068 }
  0xdd   : > { %2108 = vrot.lane.b32.xlu1 %v2097_v20, %s8436_s29  ;;  %2106 = vrot.lane.b32.xlu0 %v2093_v25, %s8436_s29  ;;  %v463_v20 = vsel %vm460_vm1, %v5604_v31, %v5612_v35  ;;  %v5843_v25 = vld [vmem:[%s5795_s30 + $0x18] sm:$0xff] }
  0xde   : > { %v472_v48 = vmul.f32 %v463_v20, %v5832_v14  ;;  %v400_v31 = vmul.f32 %v5587_v23, %v5843_v25  ;;  %v469_v22 = vmul.f32 %v5596_v27, %v5843_v25 }
  0xdf   : > { %v5827_v12 = vpop.permute.xlu1 %1137  ;;  %v5829_v32 = vpop.permute.xlu0 %1135 }
  0xe1   : > { %2112 = vrot.lane.b32.xlu1 %v2105_v52, %s8436_s29  ;;  %2110 = vrot.lane.b32.xlu0 %v2101_v57, %s8436_s29  ;;  %v4743_v52 = vpack.i.bf16 %v472_v48, %v469_v22  ;;  %v4738_v57 = vpack.i.bf16 %v403_v51, %v400_v31 }
  0xe3   : > { %v5847_v13 = vpop.permute.xlu1 %1139  ;;  %v5849_v5 = vpop.permute.xlu0 %1070 }
  0xe5   : > { %4734 = vrot.lane.b32.xlu1 %v4733_v43, %s8438_s22  ;;  %4729 = vrot.lane.b32.xlu0 %v4728_v42, %s8436_s29 }
  0xe7   : > { %v5857_v60 = vpop.permute.xlu1 %1204  ;;  %v5859_v28 = vpop.permute.xlu0 %1202 }
  0xe9   : > { %4744 = vrot.lane.b32.xlu1 %v4743_v52, %s8438_s22  ;;  %4739 = vrot.lane.b32.xlu0 %v4738_v57, %s8436_s29 }
  0xeb   : > { %v5863_v1 = vpop.permute.xlu1 %1208  ;;  %v5865_v23 = vpop.permute.xlu0 %1206 }
  0xef   : > { %v5867_v2 = vpop.permute.xlu1 %1304  ;;  %v5869_v27 = vpop.permute.xlu0 %1302 }
  0xf0   : > { %8536 = vst [vmem:[#allocation8_spill] sm:$0xff] %v5867_v2  ;;  %8537 = vst [vmem:[#allocation9_spill] sm:$0xff] %v5869_v27 }
  0xf3   : > { %v5871_v20 = vpop.permute.xlu1 %1369  ;;  %v5873_v15 = vpop.permute.xlu0 %1306 }
  0xf4   : > { %8538 = vst [vmem:[#allocation10_spill] sm:$0xff] %v5873_v15 }
  0xf7   : > { %v5875_v42 = vpop.permute.xlu1 %1373  ;;  %v5877_v43 = vpop.permute.xlu0 %1371 }
  0xf8   : > { %8539 = vst [vmem:[#allocation11_spill] sm:$0xff] %v5875_v42 }
  0xfb   : > { %v5879_v48 = vpop.permute.xlu1 %1375  ;;  %v5881_v51 = vpop.permute.xlu0 %1308 }
  0xfc   : > { %8540 = vst [vmem:[#allocation12_spill] sm:$0xff] %v5879_v48  ;;  %8541 = vst [vmem:[#allocation13_spill] sm:$0xff] %v5881_v51 }
  0xff   : > { %v5883_v31 = vpop.permute.xlu1 %1438  ;;  %v5885_v22 = vpop.permute.xlu0 %1436 }
 0x100   : > { %8542 = vst [vmem:[#allocation14_spill] sm:$0xff] %v5883_v31  ;;  %8543 = vst [vmem:[#allocation15_spill] sm:$0xff] %v5885_v22  ;;  %v531_v22 = vsel %vm529_vm2, %v5623_v40, %v5636_v46 }
 0x103   : > { %v5887_v52 = vpop.permute.xlu1 %1503  ;;  %v5889_v57 = vpop.permute.xlu0 %1440 }
 0x104   : > { %8544 = vst [vmem:[#allocation16_spill] sm:$0xff] %v5887_v52  ;;  %8545 = vst [vmem:[#allocation17_spill] sm:$0xff] %v5889_v57  ;;  %v404_v57 = vmul.f32 %v5614_v36, %v5843_v25 }
 0x107   : > { %v5891_v3 = vpop.permute.xlu1 %1507  ;;  %v5893_v4 = vpop.permute.xlu0 %1505 }
 0x108   : > { %8546 = vst [vmem:[#allocation18_spill] sm:$0xff] %v5891_v3  ;;  %8547 = vst [vmem:[#allocation19_spill] sm:$0xff] %v5893_v4  ;;  %v540_v3 = vmul.f32 %v531_v22, %v5805_v39 }
 0x10b   : > { %v5895_v27 = vpop.permute.xlu1 %1509  ;;  %v5897_v2 = vpop.permute.xlu0 %1442 }
 0x10c   : > { %8548 = vst [vmem:[#allocation20_spill] sm:$0xff] %v5895_v27  ;;  %8549 = vst [vmem:[#allocation21_spill] sm:$0xff] %v5897_v2  ;;  %v530_v2 = vsel %vm529_vm2, %v5625_v41, %v5623_v40 }
 0x10f   : > { %v5899_v48 = vpop.permute.xlu1 %1572  ;;  %v5901_v51 = vpop.permute.xlu0 %1570 }
 0x110   : > { %8550 = vst [vmem:[#allocation22_spill] sm:$0xff] %v5899_v48  ;;  %8551 = vst [vmem:[#allocation23_spill] sm:$0xff] %v5901_v51  ;;  %v1578_v31 = vsel %vm391_vm0, %v5901_v51, %v5899_v48  ;;  %v532_v51 = vsel %vm529_vm2, %v5636_v46, %v5652_v54  ;;  %v539_v48 = vmul.f32 %v530_v2, %v5802_v34 }
 0x111   : > { %v1587_v27 = vmul.f32 %v1578_v31, %v5805_v39  ;;  %v541_v31 = vmul.f32 %v532_v51, %v5832_v14  ;;  %v600_v46 = vsel %vm598_vm3, %v5644_v50, %v5642_v49 }
 0x112   : > { %v4758_v36 = vpack.i.bf16 %v540_v3, %v539_v48  ;;  %v473_v3 = vmul.f32 %v5612_v35, %v5843_v25  ;;  %v538_v48 = vmul.f32 %v5625_v41, %v5843_v25  ;;  %v601_v35 = vsel %vm598_vm3, %v5642_v49, %v5650_v53 }
 0x113   : > { %v4748_v52 = vpack.i.bf16 %v1587_v27, %v404_v57  ;;  %v5916_v4 = vpop.permute.xlu1 %1637  ;;  %v5918_v15 = vpop.permute.xlu0 %1574  ;;  %v599_v27 = vsel %vm598_vm3, %v5634_v45, %v5644_v50  ;;  %v609_v57 = vmul.f32 %v600_v46, %v5805_v39  ;;  %v669_v46 = vsel %vm667_vm4, %v5661_v58, %v5674_v0 }
 0x114   : > { %8552 = vst [vmem:[#allocation24_spill] sm:$0xff] %v5918_v15  ;;  %v4768_v15 = vpack.i.bf16 %v541_v31, %v538_v48  ;;  %v668_v48 = vsel %vm667_vm4, %v5663_v59, %v5661_v58 }
 0x115   : > { %4749 = vrot.lane.b32.xlu0 %v4748_v52, %s8436_s29  ;;  %v608_v52 = vmul.f32 %v599_v27, %v5802_v34 }
 0x117   : > { %v5926_v40 = vpop.permute.xlu1 %1641  ;;  %v5928_v22 = vpop.permute.xlu0 %1639  ;;  %v4763_v41 = vpack.i.bf16 %v609_v57, %v608_v52  ;;  %v678_v52 = vmul.f32 %v669_v46, %v5805_v39 }
 0x118   : > { %8553 = vst [vmem:[#allocation25_spill] sm:$0xff] %v5926_v40  ;;  %v1645_v2 = vsel %vm460_vm1, %v5916_v4, %v5928_v22 }
 0x119   : > { %v1654_v51 = vmul.f32 %v1645_v2, %v5805_v39  ;;  %4759 = vrot.lane.b32.xlu0 %v4758_v36, %s8440_s21  ;;  %v610_v36 = vmul.f32 %v601_v35, %v5832_v14  ;;  %v607_v2 = vmul.f32 %v5634_v45, %v5843_v25  ;;  %v670_v45 = vsel %vm667_vm4, %v5674_v0, %v5690_v11 }
 0x11a   : > { %v736_v0 = vsel %vm627_vm5, %v5682_v7, %v5680_v6 }
 0x11b   : > { %v4753_v50 = vpack.i.bf16 %v1654_v51, %v473_v3  ;;  %v5947_v40 = vpop.permute.xlu1 %1643  ;;  %v5949_v42 = vpop.permute.xlu0 %1576  ;;  %v4773_v51 = vpack.i.bf16 %v610_v36, %v607_v2 }
 0x11d   : > { %4754 = vrot.lane.b32.xlu1 %v4753_v50, %s8438_s22  ;;  %4769 = vrot.lane.b32.xlu0 %v4768_v15, %s8440_s21  ;;  %v542_v15 = vmul.f32 %v5652_v54, %v5843_v25  ;;  %v677_v54 = vmul.f32 %v668_v48, %v5802_v34 }
 0x11f   : > { %v5957_v27 = vpop.permute.xlu1 %1706  ;;  %v5959_v31 = vpop.permute.xlu0 %1704  ;;  %v4788_v58 = vpack.i.bf16 %v678_v52, %v677_v54  ;;  %v745_v52 = vmul.f32 %v736_v0, %v5805_v39  ;;  %v803_v0 = vsel %vm558_vm6, %v5699_v16, %v5712_v24 }
 0x120   : > { %v1712_v49 = vsel %vm529_vm2, %v5959_v31, %v5957_v27 }
 0x121   : > { %v1721_v3 = vmul.f32 %v1712_v49, %v5805_v39  ;;  %4764 = vrot.lane.b32.xlu1 %v4763_v41, %s5335_s12  ;;  %v679_v41 = vmul.f32 %v670_v45, %v5832_v14  ;;  %v735_v49 = vsel %vm627_vm5, %v5672_v63, %v5682_v7 }
 0x123   : > { %v4778_v57 = vpack.i.bf16 %v1721_v3, %v542_v15  ;;  %v5977_v50 = vpop.permute.xlu1 %1771  ;;  %v5979_v35 = vpop.permute.xlu0 %1708  ;;  %v611_v15 = vmul.f32 %v5650_v53, %v5843_v25  ;;  %v676_v3 = vmul.f32 %v5663_v59, %v5843_v25  ;;  %v737_v53 = vsel %vm627_vm5, %v5680_v6, %v5688_v10 }
 0x125   : > { %4774 = vrot.lane.b32.xlu1 %v4773_v51, %s5335_s12  ;;  %4779 = vrot.lane.b32.xlu0 %v4778_v57, %s8440_s21  ;;  %v744_v51 = vmul.f32 %v735_v49, %v5802_v34  ;;  %v4798_v57 = vpack.i.bf16 %v679_v41, %v676_v3 }
 0x127   : > { %v5988_v36 = vpop.permute.xlu1 %1775  ;;  %v5990_v46 = vpop.permute.xlu0 %1773  ;;  %v4793_v59 = vpack.i.bf16 %v745_v52, %v744_v51  ;;  %v812_v52 = vmul.f32 %v803_v0, %v5805_v39 }
 0x128   : > { %v1779_v2 = vsel %vm598_vm3, %v5977_v50, %v5990_v46 }
 0x129   : > { %v1788_v48 = vmul.f32 %v1779_v2, %v5805_v39  ;;  %4789 = vrot.lane.b32.xlu0 %v4788_v58, %s5334_s11  ;;  %v746_v58 = vmul.f32 %v737_v53, %v5832_v14  ;;  %v743_v2 = vmul.f32 %v5672_v63, %v5843_v25  ;;  %v804_v63 = vsel %vm558_vm6, %v5712_v24, %v5728_v38 }
 0x12a   : > { %v870_v24 = vsel %vm8429_vm7, %v5720_v30, %v5718_v29 }
 0x12b   : > { %v4783_v7 = vpack.i.bf16 %v1788_v48, %v611_v15  ;;  %v6009_v45 = vpop.permute.xlu1 %1777  ;;  %v6011_v54 = vpop.permute.xlu0 %1710  ;;  %v680_v15 = vmul.f32 %v5690_v11, %v5843_v25  ;;  %v802_v48 = vsel %vm558_vm6, %v5701_v17, %v5699_v16  ;;  %v4803_v51 = vpack.i.bf16 %v746_v58, %v743_v2 }
 0x12c   : > { %v811_v11 = vmul.f32 %v802_v48, %v5802_v34 }
 0x12d   : > { %4784 = vrot.lane.b32.xlu1 %v4783_v7, %s5335_s12  ;;  %4799 = vrot.lane.b32.xlu0 %v4798_v57, %s5334_s11 }
 0x12e   : > { %v4818_v16 = vpack.i.bf16 %v812_v52, %v811_v11  ;;  %v879_v52 = vmul.f32 %v870_v24, %v5805_v39  ;;  %v814_v24 = vmul.f32 %v5728_v38, %v5843_v25 }
 0x12f   : > { %v6019_v49 = vpop.permute.xlu1 %1840  ;;  %v6021_v41 = vpop.permute.xlu0 %1838 }
 0x130   : > { %v1846_v6 = vsel %vm667_vm4, %v6021_v41, %v6019_v49 }
 0x131   : > { %v1855_v3 = vmul.f32 %v1846_v6, %v5805_v39  ;;  %4794 = vrot.lane.b32.xlu1 %v4793_v59, %s5333_s26  ;;  %v813_v59 = vmul.f32 %v804_v63, %v5832_v14  ;;  %v869_v6 = vsel %vm8429_vm7, %v5710_v21, %v5720_v30 }
 0x133   : > { %v4808_v57 = vpack.i.bf16 %v1855_v3, %v680_v15  ;;  %v6039_v7 = vpop.permute.xlu1 %1905  ;;  %v6041_v53 = vpop.permute.xlu0 %1842  ;;  %v747_v15 = vmul.f32 %v5688_v10, %v5843_v25  ;;  %v810_v3 = vmul.f32 %v5701_v17, %v5843_v25  ;;  %v871_v10 = vsel %vm8429_vm7, %v5718_v29, %v5726_v37 }
 0x134   : > { %v937_v17 = vsel %vm420_vm8, %v5737_v44, %v5750_v56 }
 0x135   : > { %4804 = vrot.lane.b32.xlu1 %v4803_v51, %s5333_s26  ;;  %4809 = vrot.lane.b32.xlu0 %v4808_v57, %s5334_s11  ;;  %v878_v51 = vmul.f32 %v869_v6, %v5802_v34  ;;  %v4828_v30 = vpack.i.bf16 %v813_v59, %v810_v3  ;;  %v880_v6 = vmul.f32 %v871_v10, %v5832_v14 }
 0x136   : > { %v946_v29 = vmul.f32 %v937_v17, %v5805_v39  ;;  %v938_v3 = vsel %vm420_vm8, %v5750_v56, %v5768_v9  ;;  %v1004_v56 = vsel %vm8423_vm9, %v5748_v55, %v5758_v62  ;;  %v944_v10 = vmul.f32 %v5739_v47, %v5843_v25 }
 0x137   : > { %v6050_v58 = vpop.permute.xlu1 %1909  ;;  %v6052_v0 = vpop.permute.xlu0 %1907  ;;  %v4823_v59 = vpack.i.bf16 %v879_v52, %v878_v51  ;;  %v947_v52 = vmul.f32 %v938_v3, %v5832_v14  ;;  %v881_v17 = vmul.f32 %v5726_v37, %v5843_v25  ;;  %v1073_v37 = vsel %vm8504_vm10, %v5783_v19, %v5781_v18 }
 0x138   : > { %v1913_v2 = vsel %vm627_vm5, %v6039_v7, %v6052_v0 }
 0x139   : > { %v1922_v48 = vmul.f32 %v1913_v2, %v5805_v39  ;;  %4819 = vrot.lane.b32.xlu0 %v4818_v16, %s5332_s25  ;;  %v936_v16 = vsel %vm420_vm8, %v5739_v47, %v5737_v44  ;;  %v1006_v47 = vsel %vm8423_vm9, %v5756_v61, %v5766_v8 }
 0x13a   : > { %v945_v44 = vmul.f32 %v936_v16, %v5802_v34  ;;  %v1013_v16 = vmul.f32 %v1004_v56, %v5802_v34  ;;  %v1012_v56 = vmul.f32 %v5748_v55, %v5843_v25  ;;  %v1143_v55 = vsel %vm8435_vm11, %v5829_v32, %v5827_v12 }
 0x13b   : > { %v4813_v57 = vpack.i.bf16 %v1922_v48, %v747_v15  ;;  %v6071_v63 = vpop.permute.xlu1 %1911  ;;  %v6073_v11 = vpop.permute.xlu0 %1844  ;;  %v877_v48 = vmul.f32 %v5710_v21, %v5843_v25  ;;  %v1005_v21 = vsel %vm8423_vm9, %v5758_v62, %v5756_v61  ;;  %v1074_v62 = vsel %vm8504_vm10, %v5781_v18, %v5799_v33 }
 0x13c   : > { %v4838_v51 = vpack.i.bf16 %v946_v29, %v945_v44  ;;  %v948_v44 = vmul.f32 %v5768_v9, %v5843_v25  ;;  %v1083_v61 = vmul.f32 %v1074_v62, %v5805_v39  ;;  %v1082_v18 = vmul.f32 %v1073_v37, %v5802_v34 }
 0x13d   : > { %4814 = vrot.lane.b32.xlu1 %v4813_v57, %s5333_s26  ;;  %4829 = vrot.lane.b32.xlu0 %v4828_v30, %s5332_s25  ;;  %v4833_v38 = vpack.i.bf16 %v880_v6, %v877_v48  ;;  %v4848_v6 = vpack.i.bf16 %v947_v52, %v944_v10  ;;  %v1015_v48 = vmul.f32 %v1006_v47, %v5832_v14  ;;  %vm8507_vm9 = vcmask 64512  }
 0x13e   : > { %v1075_v52 = vsel %vm8504_vm10, %v5799_v33, %v5849_v5  ;;  %v1142_v33 = vsel %vm8435_vm11, %v5797_v26, %v5829_v32  ;;  %v1152_v62 = vmul.f32 %v1143_v55, %v5805_v39  ;;  %v1212_v32 = vsel %vm8505_vm12, %v5857_v60, %v5865_v23 }
 0x13f   : > { %v6090_v2 = vpop.permute.xlu1 %1974  ;;  %v6092_v15 = vpop.permute.xlu0 %1972  ;;  %v4853_v9 = vpack.i.bf16 %v1015_v48, %v1012_v56  ;;  %v1084_v10 = vmul.f32 %v1075_v52, %v5832_v14  ;;  %v1151_v47 = vmul.f32 %v1142_v33, %v5802_v34  ;;  %v1085_v52 = vmul.f32 %v5849_v5, %v5843_v25 }
 0x140   : > { %v1150_v33 = vmul.f32 %v5797_v26, %v5843_v25  ;;  %v1213_v26 = vsel %vm8505_vm12, %v5865_v23, %v5863_v1  ;;  %v1154_v23 = vmul.f32 %v5847_v13, %v5843_v25 }
 0x141   : > { %4824 = vrot.lane.b32.xlu1 %v4823_v59, %s5331_s20  ;;  %828 = vrot.lane.b32.xlu0 %v814_v24, %s5332_s25  ;;  %v1014_v59 = vmul.f32 %v1005_v21, %v5805_v39  ;;  %v4858_v21 = vpack.i.bf16 %v1083_v61, %v1082_v18 }
 0x143   : > { %v6103_v30 = vpop.permute.xlu1 %2039  ;;  %v6105_v57 = vpop.permute.xlu0 %1976  ;;  %v4843_v3 = vpack.i.bf16 %v1014_v59, %v1013_v16  ;;  %v1081_v59 = vmul.f32 %v5783_v19, %v5843_v25  ;;  %v1144_v19 = vsel %vm8435_vm11, %v5827_v12, %v5847_v13  ;;  %v1221_v12 = vmul.f32 %v1212_v32, %v5805_v39  ;;  %v8557_v13 = vld [vmem:[#allocation12_spill] sm:$0xff] }
 0x144   : > { %v1153_v61 = vmul.f32 %v1144_v19, %v5832_v14  ;;  %v1377_v32 = vsel %vm8508_vm13, %v5871_v20, %v5877_v43 }
 0x145   : > { %4834 = vrot.lane.b32.xlu1 %v4833_v38, %s5331_s20  ;;  %4839 = vrot.lane.b32.xlu0 %v4838_v51, %s8442_s19  ;;  %v4868_v37 = vpack.i.bf16 %v1084_v10, %v1081_v59 }
 0x147   : > { %v6121_v24 = vpop.permute.xlu1 %2043  ;;  %v6123_v29 = vpop.permute.xlu0 %2041 }
 0x149   : > { %895 = vrot.lane.b32.xlu1 %v881_v17, %s5331_s20  ;;  %4849 = vrot.lane.b32.xlu0 %v4848_v6, %s8442_s19  ;;  %v1016_v6 = vmul.f32 %v5766_v8, %v5843_v25  ;;  %v1211_v8 = vsel %vm8505_vm12, %v5859_v28, %v5857_v60 }
 0x14a   : > { %v1220_v55 = vmul.f32 %v1211_v8, %v5802_v34  ;;  %v8554_v8 = vld [vmem:[#allocation11_spill] sm:$0xff] }
 0x14b   : > { %v6140_v38 = vpop.permute.xlu1 %2045  ;;  %v6142_v51 = vpop.permute.xlu0 %1978 }
 0x14d   : > { %4844 = vrot.lane.b32.xlu1 %v4843_v3, %s8425_s18  ;;  %962 = vrot.lane.b32.xlu0 %v948_v44, %s8442_s19  ;;  %v4863_v44 = vpack.i.bf16 %v1152_v62, %v1151_v47  ;;  %v4878_v47 = vpack.i.bf16 %v1221_v12, %v1220_v55  ;;  %v1223_v12 = vmul.f32 %v5863_v1, %v5843_v25 }
 0x14e   : > { %v1222_v55 = vmul.f32 %v1213_v26, %v5832_v14  ;;  %v1379_v1 = vsel %vm8508_vm13, %v8554_v8, %v8557_v13 }
 0x14f   : > { %v6153_v17 = vpop.permute.xlu1 %2108  ;;  %v6155_v16 = vpop.permute.xlu0 %2106 }
 0x151   : > { %4854 = vrot.lane.b32.xlu1 %v4853_v9, %s8425_s18  ;;  %4859 = vrot.lane.b32.xlu0 %v4858_v21, %s8427_s17 }
 0x153   : > { %v6171_v3 = vpop.permute.xlu1 %2112  ;;  %v6173_v48 = vpop.permute.xlu0 %2110 }
 0x155   : > { %1030 = vrot.lane.b32.xlu1 %v1016_v6, %s8425_s18  ;;  %4869 = vrot.lane.b32.xlu0 %v4868_v37, %s8427_s17  ;;  %v4873_v6 = vpack.i.bf16 %v1153_v61, %v1150_v33  ;;  %s8589_s18 = smov 7  }
 0x157   : > { %v6190_v56 = vpop.permute.xlu1 %4734  ;;  %v6192_v18 = vpop.permute.xlu0 %4729 }
 0x158   : > { %v8421_v9 = vunpack.i.h.bf16 %v6190_v56  ;;  %v4736_v21 = vunpack.i.l.bf16 %v6190_v56  ;;  %v8422_v10 = vunpack.i.h.bf16 %v6192_v18  ;;  %v4731_v60 = vunpack.i.l.bf16 %v6192_v18 }
 0x159   : > { %4864 = vrot.lane.b32.xlu1 %v4863_v44, %s8430_s16  ;;  %1099 = vrot.lane.b32.xlu0 %v1085_v52, %s8427_s17  ;;  %v1378_v44 = vsel %vm8508_vm13, %v5877_v43, %v8554_v8 }
 0x15a   : > { %v422_v5 = vsel %vm420_vm8, %v4731_v60, %v8422_v10  ;;  %v491_v59 = vsel %vm8429_vm7, %v4736_v21, %v8421_v9  ;;  %v8555_v9 = vld [vmem:[#allocation10_spill] sm:$0xff] }
 0x15b   : > { %v6212_v62 = vpop.permute.xlu1 %4744  ;;  %v6214_v37 = vpop.permute.xlu0 %4739  ;;  %v2264_v19 = vpack.c.bf16 %v491_v59, %v422_v5  ;;  %v1386_v5 = vmul.f32 %v1377_v32, %v5805_v39  ;;  %v1387_v59 = vmul.f32 %v1378_v44, %v5832_v14 }
 0x15c   : > { %v4746_v61 = vunpack.i.l.bf16 %v6212_v62  ;;  %v4741_v52 = vunpack.i.l.bf16 %v6214_v37 }
 0x15d   : > { %4874 = vrot.lane.b32.xlu1 %v4873_v6, %s8430_s16  ;;  %4879 = vrot.lane.b32.xlu0 %v4878_v47, %s8432_s28  ;;  %v8556_v47 = vld [vmem:[#allocation8_spill] sm:$0xff]  ;;  %v4893_v44 = vpack.i.bf16 %v1387_v59, %v1386_v5  ;;  %v8563_v59 = vld [vmem:[#allocation18_spill] sm:$0xff] }
 0x15e   : > { %2348 = vmatprep.subr.bf16.mxu0 %v2264_v19  ;;  %v421_v33 = vsel %vm420_vm8, %v4741_v52, %v4731_v60  ;;  %v490_v43 = vsel %vm8429_vm7, %v4746_v61, %v4736_v21  ;;  %v1311_v10 = vsel %vm8506_vm14, %v8556_v47, %v8555_v9  ;;  %v1219_v60 = vmul.f32 %v5859_v28, %v5843_v25  ;;  %v8558_v21 = vld [vmem:[#allocation9_spill] sm:$0xff] }
 0x15f   : > { %v2263_v6 = vpack.c.bf16 %v490_v43, %v421_v33  ;;  %v1310_v26 = vsel %vm8506_vm14, %v8558_v21, %v8556_v47  ;;  %v1320_v32 = vmul.f32 %v1311_v10, %v5832_v14  ;;  %v1388_v61 = vmul.f32 %v1379_v1, %v5843_v25  ;;  %v8559_v52 = vld [vmem:[#allocation13_spill] sm:$0xff]  ;;  %v8561_v43 = vld [vmem:[#allocation19_spill] sm:$0xff] }
 0x160   : > { %v4883_v19 = vpack.i.bf16 %v1222_v55, %v1219_v60  ;;  %v1312_v8 = vsel %vm8506_vm14, %v8555_v9, %v8559_v52  ;;  %v1319_v28 = vmul.f32 %v1310_v26, %v5805_v39  ;;  %v8562_v55 = vld [vmem:[#allocation16_spill] sm:$0xff]  ;;  %v1512_v9 = vsel %vm1032_vm15, %v8561_v43, %v8563_v59  ;;  %v8565_v26 = vld [vmem:[#allocation17_spill] sm:$0xff] }
 0x161   : > { %1168 = vrot.lane.b32.xlu1 %v1154_v23, %s8430_s16  ;;  %1237 = vrot.lane.b32.xlu0 %v1223_v12, %s8432_s28  ;;  %v1385_v23 = vmul.f32 %v5871_v20, %v5802_v34  ;;  %v1321_v10 = vmul.f32 %v1312_v8, %v5843_v25  ;;  %v1511_v5 = vsel %vm1032_vm15, %v8562_v55, %v8561_v43  ;;  %s8588_s16 = smov 1  }
 0x162   : > { %2349 = vmatpush1.bf16.msra.mxu0 %v2263_v6  ;;  %v4888_v12 = vpack.i.bf16 %v1320_v32, %v1319_v28  ;;  %v1318_v20 = vmul.f32 %v8558_v21, %v5802_v34  ;;  %v1389_v6 = vmul.f32 %v8557_v13, %v5802_v34  ;;  %v1520_v1 = vmul.f32 %v1511_v5, %v5805_v39 }
 0x163   : > { %v4903_v33 = vpack.i.bf16 %v1388_v61, %v1385_v23  ;;  %v1521_v60 = vmul.f32 %v1512_v9, %v5832_v14  ;;  %v8568_v61 = vld [vmem:[#allocation15_spill] sm:$0xff]  ;;  %v1322_v8 = vmul.f32 %v8559_v52, %v5802_v34  ;;  %v1519_v5 = vmul.f32 %v8562_v55, %v5802_v34 }
 0x164   : > { %v4898_v47 = vpack.i.bf16 %v1321_v10, %v1318_v20  ;;  %v8571_v20 = vld [vmem:[#allocation25_spill] sm:$0xff]  ;;  %v1653_v55 = vmul.f32 %v5916_v4, %v5802_v34 }
 0x165   : > { %4884 = vrot.lane.b32.xlu1 %v4883_v19, %s8432_s28  ;;  %4894 = vrot.lane.b32.xlu0 %v4893_v44, %s8560_s24  ;;  %v8566_v19 = vld [vmem:[#allocation14_spill] sm:$0xff]  ;;  %v8567_v44 = vld [vmem:[#allocation20_spill] sm:$0xff]  ;;  %v4913_v23 = vpack.i.bf16 %v1521_v60, %v1520_v1  ;;  %s8612_s28 = smov 72  }
 0x166   : > { %v1445_v32 = vsel %vm8507_vm9, %v8566_v19, %v8565_v26  ;;  %v1513_v21 = vsel %vm1032_vm15, %v8563_v59, %v8567_v44  ;;  %v1444_v13 = vsel %vm8507_vm9, %v8568_v61, %v8566_v19  ;;  %v1523_v60 = vmul.f32 %v8567_v44, %v5802_v34  ;;  %v8573_v19 = vld [vmem:[#allocation24_spill] sm:$0xff] }
 0x167   : > { %v1454_v28 = vmul.f32 %v1445_v32, %v5832_v14  ;;  %v1453_v43 = vmul.f32 %v1444_v13, %v5805_v39  ;;  %v8574_v32 = vld [vmem:[#allocation22_spill] sm:$0xff] }
 0x169   : > { %4889 = vrot.lane.b32.xlu1 %v4888_v12, %s8564_s15  ;;  %4904 = vrot.lane.b32.xlu0 %v4903_v33, %s8560_s24  ;;  %v1522_v12 = vmul.f32 %v1513_v21, %v5843_v25  ;;  %v8569_v33 = vld [vmem:[#allocation21_spill] sm:$0xff]  ;;  %v4908_v59 = vpack.i.bf16 %v1454_v28, %v1453_v43  ;;  %v1647_v21 = vsel %vm460_vm1, %v8571_v20, %v5947_v40 }
 0x16a   : > { %v1446_v10 = vsel %vm8507_vm9, %v8565_v26, %v8569_v33  ;;  %v1456_v4 = vmul.f32 %v8569_v33, %v5802_v34  ;;  %v1656_v44 = vmul.f32 %v1647_v21, %v5843_v25  ;;  %v1580_v28 = vsel %vm391_vm0, %v8573_v19, %v5949_v42 }
 0x16b   : > { %v4923_v52 = vpack.i.bf16 %v1522_v12, %v1519_v5  ;;  %v1455_v9 = vmul.f32 %v1446_v10, %v5843_v25  ;;  %v8575_v12 = vld [vmem:[#allocation23_spill] sm:$0xff]  ;;  %v1589_v33 = vmul.f32 %v1580_v28, %v5843_v25  ;;  %v1787_v43 = vmul.f32 %v5977_v50, %v5802_v34 }
 0x16c   : > { %v1586_v10 = vmul.f32 %v8575_v12, %v5802_v34  ;;  %v4742_v28 = vunpack.i.h.bf16 %v6214_v37 }
 0x16d   : > { %4899 = vrot.lane.b32.xlu1 %v4898_v47, %s8564_s15  ;;  %1403 = vrot.lane.b32.xlu0 %v1389_v6, %s8560_s24  ;;  %v1646_v6 = vsel %vm460_vm1, %v5928_v22, %v8571_v20  ;;  %v1452_v47 = vmul.f32 %v8568_v61, %v5802_v34  ;;  %v1579_v22 = vsel %vm391_vm0, %v8574_v32, %v8573_v19 }
 0x16e   : > { %v1655_v1 = vmul.f32 %v1646_v6, %v5832_v14  ;;  %v1588_v61 = vmul.f32 %v1579_v22, %v5832_v14  ;;  %v1915_v32 = vsel %vm627_vm5, %v6050_v58, %v6071_v63 }
 0x16f   : > { %v4918_v26 = vpack.i.bf16 %v1455_v9, %v1452_v47  ;;  %v1781_v9 = vsel %vm598_vm3, %v5988_v36, %v6009_v45  ;;  %v1791_v47 = vmul.f32 %v6009_v45, %v5802_v34  ;;  %v1724_v45 = vmul.f32 %v6011_v54, %v5802_v34 }
 0x170   : > { %v4933_v13 = vpack.i.bf16 %v1653_v55, %v1655_v1  ;;  %v1790_v6 = vmul.f32 %v1781_v9, %v5843_v25  ;;  %v1720_v55 = vmul.f32 %v5959_v31, %v5802_v34  ;;  %v1847_v31 = vsel %vm667_vm4, %v6019_v49, %v6041_v53 }
 0x171   : > { %1336 = vrot.lane.b32.xlu1 %v1322_v8, %s8564_s15  ;;  %4914 = vrot.lane.b32.xlu0 %v4913_v23, %s8570_s27  ;;  %v1657_v8 = vmul.f32 %v5947_v40, %v5802_v34  ;;  %v1780_v23 = vsel %vm598_vm3, %v5990_v46, %v5988_v36  ;;  %v1590_v40 = vmul.f32 %v5949_v42, %v5802_v34  ;;  %v8577_v9 = vunpack.i.h.bf16 %v6190_v56 }
 0x172   : > { %v1789_v5 = vmul.f32 %v1780_v23, %v5832_v14  ;;  %v1713_v46 = vsel %vm529_vm2, %v5957_v27, %v5979_v35  ;;  %v1714_v27 = vsel %vm529_vm2, %v5979_v35, %v6011_v54  ;;  %v1914_v36 = vsel %vm627_vm5, %v6052_v0, %v6050_v58 }
 0x173   : > { %v4938_v42 = vpack.i.bf16 %v1590_v40, %v1589_v33  ;;  %v1722_v20 = vmul.f32 %v1713_v46, %v5832_v14  ;;  %v1723_v1 = vmul.f32 %v1714_v27, %v5843_v25  ;;  %v1923_v35 = vmul.f32 %v1914_v36, %v5832_v14 }
 0x174   : > { %v4953_v50 = vpack.i.bf16 %v1787_v43, %v1789_v5  ;;  %v4963_v19 = vpack.i.bf16 %v1791_v47, %v1790_v6  ;;  %v1848_v54 = vsel %vm667_vm4, %v6041_v53, %v6073_v11  ;;  %v1856_v22 = vmul.f32 %v1847_v31, %v5832_v14 }
 0x175   : > { %4909 = vrot.lane.b32.xlu1 %v4908_v59, %s8572_s23  ;;  %4924 = vrot.lane.b32.xlu0 %v4923_v52, %s8570_s27  ;;  %v4928_v59 = vpack.i.bf16 %v1586_v10, %v1588_v61  ;;  %v4943_v52 = vpack.i.bf16 %v1657_v8, %v1656_v44  ;;  %v1924_v49 = vmul.f32 %v1915_v32, %v5843_v25  ;;  %v4747_v8 = vunpack.i.h.bf16 %v6212_v62 }
 0x176   : > { %v1857_v61 = vmul.f32 %v1848_v54, %v5843_v25  ;;  %v1858_v58 = vmul.f32 %v6073_v11, %v5802_v34  ;;  %v1854_v53 = vmul.f32 %v6021_v41, %v5802_v34  ;;  %v2048_v44 = vsel %vm8429_vm7, %v6123_v29, %v6121_v24 }
 0x177   : > { %v1981_v23 = vsel %vm558_vm6, %v6090_v2, %v6105_v57  ;;  %v2057_v62 = vmul.f32 %v2048_v44, %v5832_v14  ;;  %v2055_v43 = vmul.f32 %v6103_v30, %v5802_v34  ;;  %v2049_v5 = vsel %vm8429_vm7, %v6121_v24, %v6140_v38 }
 0x178   : > { %v4968_v41 = vpack.i.bf16 %v1854_v53, %v1856_v22  ;;  %v4978_v10 = vpack.i.bf16 %v1858_v58, %v1857_v61  ;;  %v2058_v47 = vmul.f32 %v2049_v5, %v5843_v25  ;;  %v2115_v22 = vsel %vm420_vm8, %v6153_v17, %v6173_v48 }
 0x179   : > { %4919 = vrot.lane.b32.xlu1 %v4918_v26, %s8572_s23  ;;  %1537 = vrot.lane.b32.xlu0 %v1523_v60, %s8570_s27  ;;  %v1921_v60 = vmul.f32 %v6039_v7, %v5802_v34  ;;  %v4948_v26 = vpack.i.bf16 %v1720_v55, %v1722_v20  ;;  %v4958_v7 = vpack.i.bf16 %v1724_v45, %v1723_v1 }
 0x17a   : > { %v1988_v45 = vmul.f32 %v6092_v15, %v5802_v34  ;;  %v5003_v32 = vpack.i.bf16 %v2058_v47, %v2055_v43  ;;  %v2126_v47 = vmul.f32 %v6171_v3, %v5802_v34 }
 0x17b   : > { %v4973_v21 = vpack.i.bf16 %v1921_v60, %v1923_v35 }
 0x17d   : > { %1470 = vrot.lane.b32.xlu1 %v1456_v4, %s8572_s23  ;;  %4934 = vrot.lane.b32.xlu0 %v4933_v13, %s8438_s22  ;;  %v1925_v4 = vmul.f32 %v6071_v63, %v5802_v34  ;;  %v2047_v13 = vsel %vm8429_vm7, %v6103_v30, %v6123_v29  ;;  %v1980_v63 = vsel %vm558_vm6, %v6092_v15, %v6090_v2 }
 0x17e   : > { %v2056_v33 = vmul.f32 %v2047_v13, %v5805_v39  ;;  %v1989_v40 = vmul.f32 %v1980_v63, %v5805_v39  ;;  %v492_v30 = vsel %vm8429_vm7, %v8577_v9, %v4747_v8  ;;  %v2114_v13 = vsel %vm420_vm8, %v6155_v16, %v6153_v17 }
 0x17f   : > { %v4983_v12 = vpack.i.bf16 %v1925_v4, %v1924_v49  ;;  %v2059_v4 = vmul.f32 %v6140_v38, %v5802_v34  ;;  %v1992_v38 = vmul.f32 %v6142_v51, %v5802_v34  ;;  %v2123_v17 = vmul.f32 %v2114_v13, %v5805_v39  ;;  %v8581_v13 = vld [vmem:[#allocation7_spill] sm:$0xff] }
 0x180   : > { %v4993_v6 = vpack.i.bf16 %v2057_v62, %v2056_v33 }
 0x181   : > { %4929 = vrot.lane.b32.xlu1 %v4928_v59, %s8436_s29  ;;  %4944 = vrot.lane.b32.xlu0 %v4943_v52, %s8438_s22  ;;  %v1990_v59 = vmul.f32 %v1981_v23, %v5832_v14  ;;  %v8576_v52 = vunpack.i.h.bf16 %v6192_v18  ;;  %v1982_v18 = vsel %vm558_vm6, %v6105_v57, %v6142_v51 }
 0x182   : > { %v1991_v35 = vmul.f32 %v1982_v18, %v5843_v25 }
 0x183   : > { %v423_v46 = vsel %vm420_vm8, %v8576_v52, %v4742_v28  ;;  %v4988_v31 = vpack.i.bf16 %v1990_v59, %v1989_v40 }
 0x184   : > { %v2265_v60 = vpack.c.bf16 %v492_v30, %v423_v46  ;;  %v4998_v61 = vpack.i.bf16 %v1991_v35, %v1988_v45  ;;  %v2319_v46 = vld [vmem:[%s8379_s3] sm:$0xff] }
 0x185   : > { %4939 = vrot.lane.b32.xlu1 %v4938_v42, %s8436_s29  ;;  %4954 = vrot.lane.b32.xlu0 %v4953_v50, %s5335_s12 }
 0x187   : > { %v6370_v0 = vpop.permute.xlu0 %4749 }
 0x188   : > { %v4751_v29 = vunpack.i.l.bf16 %v6370_v0 }
 0x189   : > { %4949 = vrot.lane.b32.xlu1 %v4948_v26, %s8440_s21  ;;  %4964 = vrot.lane.b32.xlu0 %v4963_v19, %s5335_s12 }
 0x18a   : > { %v424_v20 = vsel %vm420_vm8, %v4742_v28, %v4751_v29 }
 0x18b   : > { %v6400_v11 = vpop.permute.xlu0 %4759 }
 0x18c   : > { %v4762_v42 = vunpack.i.h.bf16 %v6400_v11  ;;  %v4761_v24 = vunpack.i.l.bf16 %v6400_v11 }
 0x18d   : > { %4959 = vrot.lane.b32.xlu1 %v4958_v7, %s8440_s21  ;;  %4974 = vrot.lane.b32.xlu0 %v4973_v21, %s5333_s26  ;;  %v2116_v21 = vsel %vm420_vm8, %v6173_v48, %v6171_v3  ;;  %v2124_v48 = vmul.f32 %v2115_v22, %v5832_v14 }
 0x18e   : > { %v560_v57 = vsel %vm558_vm6, %v4761_v24, %v4762_v42  ;;  %v2125_v44 = vmul.f32 %v2116_v21, %v5843_v25  ;;  %v6480_v25 = vld [vmem:[%s8378_s2] sm:$0xff] }
 0x18f   : > { %v6410_v37 = vpop.permute.xlu1 %4754  ;;  %v6436_v27 = vpop.permute.xlu0 %4769  ;;  %v4661_v51 = vcombine.high %v6480_v25, %v6480_v25 }
 0x190   : > { %v4756_v2 = vunpack.i.l.bf16 %v6410_v37  ;;  %v4771_v26 = vunpack.i.l.bf16 %v6436_v27  ;;  %v5013_v23 = vpack.i.bf16 %v2125_v44, %v2124_v48  ;;  %v4772_v29 = vunpack.i.h.bf16 %v6436_v27 }
 0x191   : > { %4969 = vrot.lane.b32.xlu1 %v4968_v41, %s5334_s11  ;;  %4984 = vrot.lane.b32.xlu0 %v4983_v12, %s5333_s26  ;;  %v2122_v41 = vmul.f32 %v6155_v16, %v5802_v34  ;;  %v8579_v34 = vld [vmem:[#allocation4_spill] sm:$0xff] }
 0x192   : > { %v493_v50 = vsel %vm8429_vm7, %v4747_v8, %v4756_v2  ;;  %v559_v58 = vsel %vm558_vm6, %v4771_v26, %v4761_v24  ;;  %vm8434_vm7 = vcmask 719872   ;;  %v561_v52 = vsel %vm558_vm6, %v4762_v42, %v4772_v29 }
 0x193   : > { %v4765_v56 = vpop.permute.xlu1 %4764  ;;  %v2266_v36 = vpack.c.bf16 %v493_v50, %v424_v20  ;;  %4663 = vmatprep.mubr.msk.bf16.mxu0 %vm8434_vm7, %v4661_v51  ;;  %4665 = vmatprep.mubr.msk.bf16.mxu1 %vm8434_vm7, %v4661_v51  ;;  %v5008_v43 = vpack.i.bf16 %v2123_v17, %v2122_v41  ;;  %v5347_v20 = vmov 0   ;;  %vm8582_vm7 = vcmask 973824  }
 0x194   : > { %v4767_v55 = vunpack.i.h.bf16 %v4765_v56  ;;  %v4766_v1 = vunpack.i.l.bf16 %v4765_v56  ;;  %5018 = vset.pattern.permute.xlu0 %v5347_v20  ;;  %5019 = vset.pattern.permute.xlu1 %v5347_v20 }
 0x195   : > { %4979 = vrot.lane.b32.xlu1 %v4978_v10, %s5334_s11  ;;  %4994 = vrot.lane.b32.xlu0 %v4993_v6, %s5331_s20  ;;  %v2488_v6 = vld [vmem:[%s8377_s1] ss:$8 sm:$0xf] }
 0x196   : > { %2389 = vmatprep.subr.bf16.mxu1 %v2266_v36  ;;  %v629_v19 = vsel %vm627_vm5, %v4766_v1, %v4767_v55  ;;  %v2431_v36 = vld [vmem:[%s8381_s5] sm:$0xff]  ;;  %v2501_v3 = vrot.slane %v2488_v6, %v8579_v34  ;;  %v2505_v48 = vrot.slane %v2488_v6, %v8581_v13 }
 0x197   : > { %2390 = vmatpush1.bf16.msra.mxu1 %v2265_v60  ;;  %v4775_v15 = vpop.permute.xlu1 %4774  ;;  %v6448_v54 = vpop.permute.xlu0 %4779  ;;  %v2268_v7 = vpack.c.bf16 %v629_v19, %v560_v57 }
 0x198   : > { %v4776_v49 = vunpack.i.l.bf16 %v4775_v15  ;;  %v4777_v8 = vunpack.i.h.bf16 %v4775_v15  ;;  %v4781_v14 = vunpack.i.l.bf16 %v6448_v54  ;;  %v4666_v15 = vld [vmem:[%s8377_s1 + $0x1] ss:$8 sm:$0xf] }
 0x199   : > { %4989 = vrot.lane.b32.xlu1 %v4988_v31, %s5332_s25  ;;  %5004 = vrot.lane.b32.xlu0 %v5003_v32, %s5331_s20  ;;  %v8580_v31 = vld [vmem:[#allocation6_spill] sm:$0xff] }
 0x19a   : > { %2350 = vmatprep.subr.bf16.mxu0 %v2268_v7  ;;  %v628_v53 = vsel %vm627_vm5, %v4776_v49, %v4766_v1  ;;  %v630_v39 = vsel %vm627_vm5, %v4767_v55, %v4777_v8  ;;  %v562_v62 = vsel %vm558_vm6, %v4772_v29, %v4781_v14  ;;  %v8578_v1 = vld [vmem:[#allocation5_spill] sm:$0xff]  ;;  %v2497_v32 = vrot.slane %v2488_v6, %v8580_v31 }
 0x19b   : > { %v2267_v63 = vpack.c.bf16 %v628_v53, %v559_v58  ;;  %v6467_v28 = vpop.permute.xlu0 %4789  ;;  %v2269_v24 = vpack.c.bf16 %v630_v39, %v561_v52  ;;  %v2493_v45 = vrot.slane %v2488_v6, %v8578_v1  ;;  %v2563_v22 = vrot.slane %v4666_v15, %v8580_v31  ;;  %v6551_v29 = vld [vmem:[%s8377_s1 + $0x2] ss:$8 sm:$0xf] }
 0x19c   : > { %v4792_v10 = vunpack.i.h.bf16 %v6467_v28  ;;  %v4791_v33 = vunpack.i.l.bf16 %v6467_v28  ;;  %v2559_v53 = vrot.slane %v4666_v15, %v8578_v1  ;;  %v2633_v20 = vrot.slane %v6551_v29, %v8579_v34 }
 0x19d   : > { %4999 = vrot.lane.b32.xlu1 %v4998_v61, %s5332_s25  ;;  %2073 = vrot.lane.b32.xlu0 %v2059_v4, %s5331_s20 }
 0x19e   : > { %2351 = vmatpush1.bf16.msra.mxu0 %v2267_v63  ;;  %v697_v11 = vsel %vm667_vm4, %v4791_v33, %v4792_v10 }
 0x19f   : > { %v6483_v12 = vpop.permute.xlu1 %4784  ;;  %v4800_v5 = vpop.permute.xlu0 %4799 }
 0x1a0   : > { %v4786_v16 = vunpack.i.l.bf16 %v6483_v12  ;;  %v4801_v50 = vunpack.i.l.bf16 %v4800_v5  ;;  %v4802_v21 = vunpack.i.h.bf16 %v4800_v5 }
 0x1a1   : > { %2006 = vrot.lane.b32.xlu1 %v1992_v38, %s5332_s25  ;;  %5014 = vrot.lane.b32.xlu0 %v5013_v23, %s8442_s19 }
 0x1a2   : > { %v631_v40 = vsel %vm627_vm5, %v4777_v8, %v4786_v16  ;;  %v696_v60 = vsel %vm667_vm4, %v4801_v50, %v4791_v33  ;;  %v698_v23 = vsel %vm667_vm4, %v4792_v10, %v4802_v21  ;;  %v2567_v33 = vrot.slane %v4666_v15, %v8579_v34 }
 0x1a3   : > { %v4795_v2 = vpop.permute.xlu1 %4794  ;;  %v2270_v59 = vpack.c.bf16 %v631_v40, %v562_v62  ;;  %v2625_v10 = vrot.slane %v6551_v29, %v8578_v1 }
 0x1a4   : > { %v4797_v9 = vunpack.i.h.bf16 %v4795_v2  ;;  %v4796_v30 = vunpack.i.l.bf16 %v4795_v2 }
 0x1a5   : > { %5009 = vrot.lane.b32.xlu1 %v5008_v43, %s8442_s19  ;;  %2391 = vmatprep.subr.bf16.mxu1 %v2270_v59 }
 0x1a6   : > { %2392 = vmatpush1.bf16.msra.mxu1 %v2269_v24  ;;  %v764_v42 = vsel %vm598_vm3, %v4796_v30, %v4797_v9  ;;  %2322 = vperm.xlu0 %5018, %v2319_v46  }
 0x1a7   : > { %v4805_v18 = vpop.permute.xlu1 %4804  ;;  %v6513_v27 = vpop.permute.xlu0 %4809  ;;  %v2272_v56 = vpack.c.bf16 %v764_v42, %v697_v11 }
 0x1a8   : > { %v4806_v55 = vunpack.i.l.bf16 %v4805_v18  ;;  %v4807_v19 = vunpack.i.h.bf16 %v4805_v18  ;;  %v4811_v7 = vunpack.i.l.bf16 %v6513_v27 }
 0x1a9   : > { %2140 = vrot.lane.b32.xlu1 %v2126_v47, %s8442_s19  ;;  %2352 = vmatprep.subr.bf16.mxu0 %v2272_v56 }
 0x1aa   : > { %v763_v35 = vsel %vm598_vm3, %v4806_v55, %v4796_v30  ;;  %2469 = vperm.xlu0 %5018, %v2431_v36   ;;  %v765_v58 = vsel %vm598_vm3, %v4797_v9, %v4807_v19  ;;  %v699_v8 = vsel %vm667_vm4, %v4802_v21, %v4811_v7  ;;  %v2571_v9 = vrot.slane %v4666_v15, %v8581_v13 }
 0x1ab   : > { %v6523_v26 = vpop.permute.xlu0 %4819  ;;  %v2271_v57 = vpack.c.bf16 %v763_v35, %v696_v60  ;;  %v2273_v39 = vpack.c.bf16 %v765_v58, %v698_v23  ;;  %v2629_v55 = vrot.slane %v6551_v29, %v8580_v31 }
 0x1ac   : > { %v4822_v44 = vunpack.i.h.bf16 %v6523_v26  ;;  %v4821_v63 = vunpack.i.l.bf16 %v6523_v26 }
 0x1ad   : > { %2353 = vmatpush1.bf16.msra.mxu0 %v2271_v57  ;;  %2506 = vrot.lane.b32.xlu1 %v2493_v45, %s8442_s19  ;;  %v4668_v45 = vld [vmem:[%s8377_s1 + $0x3] ss:$8 sm:$0xf] }
 0x1ae   : > { %2510 = vrot.lane.b32.xlu0 %v2501_v3, %s8442_s19  ;;  %v831_v40 = vsel %vm529_vm2, %v4821_v63, %v4822_v44  ;;  %v2695_v26 = vrot.slane %v4668_v45, %v8580_v31  ;;  %v2691_v7 = vrot.slane %v4668_v45, %v8578_v1 }
 0x1af   : > { %v6533_v49 = vpop.permute.xlu1 %4814  ;;  %v4830_v4 = vpop.permute.xlu0 %4829 }
 0x1b0   : > { %v4816_v61 = vunpack.i.l.bf16 %v6533_v49  ;;  %v4831_v62 = vunpack.i.l.bf16 %v4830_v4  ;;  %v4832_v46 = vunpack.i.h.bf16 %v4830_v4 }
 0x1b1   : > { %2508 = vrot.lane.b32.xlu1 %v2497_v32, %s8442_s19 }
 0x1b2   : > { %v766_v38 = vsel %vm598_vm3, %v4807_v19, %v4816_v61  ;;  %2574 = vrot.lane.b32.xlu0 %v2563_v22, %s5331_s20  ;;  %v830_v30 = vsel %vm529_vm2, %v4831_v62, %v4821_v63  ;;  %v832_v36 = vsel %vm529_vm2, %v4822_v44, %v4832_v46  ;;  %v2637_v61 = vrot.slane %v6551_v29, %v8581_v13  ;;  %v6595_v44 = vld [vmem:[%s8377_s1 + $0x4] ss:$8 sm:$0xf] }
 0x1b3   : > { %v4825_v41 = vpop.permute.xlu1 %4824  ;;  %v829_v17 = vpop.permute.xlu0 %828  ;;  %v2274_v14 = vpack.c.bf16 %v766_v38, %v699_v8  ;;  %v2757_v23 = vrot.slane %v6595_v44, %v8578_v1 }
 0x1b4   : > { %v4827_v51 = vunpack.i.h.bf16 %v4825_v41  ;;  %v4826_v16 = vunpack.i.l.bf16 %v4825_v41  ;;  %v833_v47 = vsel %vm529_vm2, %v4832_v46, %v829_v17  ;;  %v2699_v41 = vrot.slane %v4668_v45, %v8579_v34 }
 0x1b5   : > { %2393 = vmatprep.subr.bf16.mxu1 %v2274_v14  ;;  %2572 = vrot.lane.b32.xlu1 %v2559_v53, %s5331_s20 }
 0x1b6   : > { %2394 = vmatpush1.bf16.msra.mxu1 %v2273_v39  ;;  %v898_v28 = vsel %vm460_vm1, %v4826_v16, %v4827_v51  ;;  %2512 = vrot.lane.b32.xlu0 %v2505_v48, %s8442_s19 }
 0x1b7   : > { %v4835_v43 = vpop.permute.xlu1 %4834  ;;  %v6560_v5 = vpop.permute.xlu0 %4839  ;;  %v2276_v2 = vpack.c.bf16 %v898_v28, %v831_v40  ;;  %v6612_v40 = vld [vmem:[%s8377_s1 + $0x25] ss:$8 sm:$0xf] }
 0x1b8   : > { %v4837_v59 = vunpack.i.h.bf16 %v4835_v43  ;;  %v4836_v52 = vunpack.i.l.bf16 %v4835_v43  ;;  %v4842_v60 = vunpack.i.h.bf16 %v6560_v5  ;;  %v4841_v35 = vunpack.i.l.bf16 %v6560_v5 }
 0x1b9   : > { %2354 = vmatprep.subr.bf16.mxu0 %v2276_v2  ;;  %2576 = vrot.lane.b32.xlu1 %v2567_v33, %s5331_s20  ;;  %v2703_v43 = vrot.slane %v4668_v45, %v8581_v13  ;;  %v5318_v45 = vld [vmem:[%s5795_s30 + $0x8] sm:$0xff] }
 0x1ba   : > { %v897_v24 = vsel %vm460_vm1, %v4836_v52, %v4826_v16  ;;  %2638 = vrot.lane.b32.xlu0 %v2625_v10, %s5332_s25  ;;  %v899_v6 = vsel %vm460_vm1, %v4827_v51, %v4837_v59  ;;  %v965_v21 = vsel %vm391_vm0, %v4841_v35, %v4842_v60  ;;  %v2765_v52 = vrot.slane %v6595_v44, %v8579_v34 }
 0x1bb   : > { %v896_v50 = vpop.permute.xlu1 %895  ;;  %v4850_v11 = vpop.permute.xlu0 %4849  ;;  %v2275_v42 = vpack.c.bf16 %v897_v24, %v830_v30  ;;  %v2277_v3 = vpack.c.bf16 %v899_v6, %v832_v36  ;;  %v1262_v30 = vrot.slane %v6612_v40, %v8580_v31 }
 0x1bc   : > { %v900_v18 = vsel %vm460_vm1, %v4837_v59, %v896_v50  ;;  %v4851_v22 = vunpack.i.l.bf16 %v4850_v11  ;;  %v4852_v38 = vunpack.i.h.bf16 %v4850_v11  ;;  %v2761_v50 = vrot.slane %v6595_v44, %v8580_v31  ;;  %v6630_v11 = vld [vmem:[%s8377_s1 + $0x5] ss:$8 sm:$0xf] }
 0x1bd   : > { %v2278_v56 = vpack.c.bf16 %v900_v18, %v833_v47  ;;  %2355 = vmatpush1.bf16.msra.mxu0 %v2275_v42  ;;  %2578 = vrot.lane.b32.xlu1 %v2571_v9, %s5331_s20  ;;  %v2827_v18 = vrot.slane %v6630_v11, %v8580_v31 }
 0x1be   : > { %2642 = vrot.lane.b32.xlu0 %v2633_v20, %s5332_s25  ;;  %v964_v17 = vsel %vm391_vm0, %v4851_v22, %v4841_v35  ;;  %v966_v10 = vsel %vm391_vm0, %v4842_v60, %v4852_v38  ;;  %v1276_v60 = vmul.f32 %v5318_v45, %v1262_v30 }
 0x1bf   : > { %v4845_v57 = vpop.permute.xlu1 %4844  ;;  %v963_v19 = vpop.permute.xlu0 %962  ;;  %2395 = vmatprep.subr.bf16.mxu1 %v2278_v56 }
 0x1c0   : > { %v4847_v32 = vunpack.i.h.bf16 %v4845_v57  ;;  %v4846_v15 = vunpack.i.l.bf16 %v4845_v57  ;;  %2396 = vmatpush1.bf16.msra.mxu1 %v2277_v3  ;;  %v967_v33 = vsel %vm391_vm0, %v4852_v38, %v963_v19  ;;  %v1266_v38 = vrot.slane %v6612_v40, %v8579_v34 }
 0x1c1   : > { %2640 = vrot.lane.b32.xlu1 %v2629_v55, %s5332_s25 }
 0x1c2   : > { %v1034_v4 = vsel %vm1032_vm15, %v4846_v15, %v4847_v32  ;;  %2706 = vrot.lane.b32.xlu0 %v2695_v26, %s5333_s26 }
 0x1c3   : > { %v4855_v58 = vpop.permute.xlu1 %4854  ;;  %v6590_v53 = vpop.permute.xlu0 %4859  ;;  %v2280_v48 = vpack.c.bf16 %v1034_v4, %v965_v21 }
 0x1c4   : > { %v4857_v63 = vunpack.i.h.bf16 %v4855_v58  ;;  %v4856_v8 = vunpack.i.l.bf16 %v4855_v58  ;;  %v4862_v5 = vunpack.i.h.bf16 %v6590_v53  ;;  %v4861_v2 = vunpack.i.l.bf16 %v6590_v53 }
 0x1c5   : > { %2356 = vmatprep.subr.bf16.mxu0 %v2280_v48  ;;  %2704 = vrot.lane.b32.xlu1 %v2691_v7, %s5333_s26  ;;  %v2823_v7 = vrot.slane %v6630_v11, %v8578_v1 }
 0x1c6   : > { %v1033_v14 = vsel %vm1032_vm15, %v4856_v8, %v4846_v15  ;;  %2644 = vrot.lane.b32.xlu0 %v2637_v61, %s5332_s25  ;;  %v1035_v39 = vsel %vm1032_vm15, %v4847_v32, %v4857_v63  ;;  %v1103_v6 = vsel %vm8507_vm9, %v4861_v2, %v4862_v5  ;;  %v1258_v32 = vrot.slane %v6612_v40, %v8578_v1 }
 0x1c7   : > { %v1031_v29 = vpop.permute.xlu1 %1030  ;;  %v6604_v51 = vpop.permute.xlu0 %4869  ;;  %v2279_v16 = vpack.c.bf16 %v1033_v14, %v964_v17  ;;  %v2281_v59 = vpack.c.bf16 %v1035_v39, %v966_v10  ;;  %v1270_v15 = vrot.slane %v6612_v40, %v8581_v13  ;;  %v2769_v61 = vrot.slane %v6595_v44, %v8581_v13 }
 0x1c8   : > { %v1036_v62 = vsel %vm1032_vm15, %v4857_v63, %v1031_v29  ;;  %v4871_v42 = vunpack.i.l.bf16 %v6604_v51  ;;  %v4872_v19 = vunpack.i.h.bf16 %v6604_v51  ;;  %v2831_v29 = vrot.slane %v6630_v11, %v8579_v34 }
 0x1c9   : > { %v2282_v28 = vpack.c.bf16 %v1036_v62, %v967_v33  ;;  %2357 = vmatpush1.bf16.msra.mxu0 %v2279_v16  ;;  %2708 = vrot.lane.b32.xlu1 %v2699_v41, %s5333_s26  ;;  %v6659_v41 = vld [vmem:[%s8377_s1 + $0x6] ss:$8 sm:$0xf] }
 0x1ca   : > { %2770 = vrot.lane.b32.xlu0 %v2757_v23, %s5334_s11  ;;  %v1102_v22 = vsel %vm8507_vm9, %v4871_v42, %v4861_v2  ;;  %v1104_v23 = vsel %vm8507_vm9, %v4862_v5, %v4872_v19  ;;  %v2889_v16 = vrot.slane %v6659_v41, %v8578_v1  ;;  %v5319_v62 = vld [vmem:[%s5795_s30] sm:$0xff] }
 0x1cb   : > { %v4865_v46 = vpop.permute.xlu1 %4864  ;;  %v1100_v9 = vpop.permute.xlu0 %1099  ;;  %2397 = vmatprep.subr.bf16.mxu1 %v2282_v28  ;;  %v1275_v40 = vmul.f32 %v5319_v62, %v1258_v32  ;;  %v5320_v28 = vld [vmem:[%s5795_s30 + $0x18] sm:$0xff] }
 0x1cc   : > { %v4867_v24 = vunpack.i.h.bf16 %v4865_v46  ;;  %v4866_v20 = vunpack.i.l.bf16 %v4865_v46  ;;  %2398 = vmatpush1.bf16.msra.mxu1 %v2281_v59  ;;  %v1105_v17 = vsel %vm8507_vm9, %v4872_v19, %v1100_v9  ;;  %v1278_v10 = vmul.f32 %v5320_v28, %v1270_v15 }
 0x1cd   : > { %2710 = vrot.lane.b32.xlu1 %v2703_v43, %s5333_s26  ;;  %v5321_v43 = vld [vmem:[%s5795_s30 + $0x10] sm:$0xff]  ;;  %v2835_v46 = vrot.slane %v6630_v11, %v8581_v13  ;;  %s8809_s30 = smov 55  }
 0x1ce   : > { %v1172_v47 = vsel %vm8508_vm13, %v4866_v20, %v4867_v24  ;;  %2774 = vrot.lane.b32.xlu0 %v2765_v52, %s5334_s11  ;;  %v1277_v5 = vmul.f32 %v5321_v43, %v1266_v38 }
 0x1cf   : > { %v4875_v56 = vpop.permute.xlu1 %4874  ;;  %v4880_v36 = vpop.permute.xlu0 %4879  ;;  %v2284_v55 = vpack.c.bf16 %v1172_v47, %v1103_v6 }
 0x1d0   : > { %v4877_v35 = vunpack.i.h.bf16 %v4875_v56  ;;  %v4876_v3 = vunpack.i.l.bf16 %v4875_v56  ;;  %v4882_v26 = vunpack.i.h.bf16 %v4880_v36  ;;  %v4881_v57 = vunpack.i.l.bf16 %v4880_v36 }
 0x1d1   : > { %2358 = vmatprep.subr.bf16.mxu0 %v2284_v55  ;;  %2772 = vrot.lane.b32.xlu1 %v2761_v50, %s5334_s11  ;;  %v2897_v56 = vrot.slane %v6659_v41, %v8579_v34 }
 0x1d2   : > { %v1171_v21 = vsel %vm8508_vm13, %v4876_v3, %v4866_v20  ;;  %v1241_v4 = vsel %vm8506_vm14, %v4881_v57, %v4882_v26  ;;  %2838 = vrot.lane.b32.xlu0 %v2827_v18, %s5335_s12  ;;  %v1173_v8 = vsel %vm8508_vm13, %v4867_v24, %v4877_v35  ;;  %v4672_v3 = vld [vmem:[%s8377_s1 + $0x7] ss:$8 sm:$0xf] }
 0x1d3   : > { %v1169_v58 = vpop.permute.xlu1 %1168  ;;  %v1238_v53 = vpop.permute.xlu0 %1237  ;;  %v2283_v48 = vpack.c.bf16 %v1171_v21, %v1102_v22  ;;  %v2288_v63 = vpack.c.bf16 %v1276_v60, %v1241_v4  ;;  %v2285_v51 = vpack.c.bf16 %v1173_v8, %v1104_v23  ;;  %v2959_v32 = vrot.slane %v4672_v3, %v8580_v31 }
 0x1d4   : > { %v1174_v44 = vsel %vm8508_vm13, %v4877_v35, %v1169_v58  ;;  %v2893_v35 = vrot.slane %v6659_v41, %v8580_v31  ;;  %v2901_v8 = vrot.slane %v6659_v41, %v8581_v13  ;;  %v2963_v41 = vrot.slane %v4672_v3, %v8579_v34 }
 0x1d5   : > { %v2286_v14 = vpack.c.bf16 %v1174_v44, %v1105_v17  ;;  %2359 = vmatpush1.bf16.msra.mxu0 %v2283_v48  ;;  %2836 = vrot.lane.b32.xlu1 %v2823_v7, %s5335_s12  ;;  %v6705_v44 = vld [vmem:[%s8377_s1 + $0x20] ss:$8 sm:$0xf] }
 0x1d6   : > { %2360 = vmatprep.subr.bf16.mxu0 %v2288_v63  ;;  %2776 = vrot.lane.b32.xlu0 %v2769_v61, %s5334_s11  ;;  %v2955_v61 = vrot.slane %v4672_v3, %v8578_v1  ;;  %v3021_v62 = vrot.slane %v6705_v44, %v8578_v1 }
 0x1d7   : > { %v4885_v39 = vpop.permute.xlu1 %4884  ;;  %v4895_v33 = vpop.permute.xlu0 %4894  ;;  %2399 = vmatprep.subr.bf16.mxu1 %v2286_v14 }
 0x1d8   : > { %v4887_v2 = vunpack.i.h.bf16 %v4885_v39  ;;  %v4886_v59 = vunpack.i.l.bf16 %v4885_v39  ;;  %2400 = vmatpush1.bf16.msra.mxu1 %v2285_v51  ;;  %v4897_v52 = vunpack.i.h.bf16 %v4895_v33  ;;  %v4896_v9 = vunpack.i.l.bf16 %v4895_v33 }
 0x1d9   : > { %2840 = vrot.lane.b32.xlu1 %v2831_v29, %s5335_s12 }
 0x1da   : > { %v1240_v30 = vsel %vm8506_vm14, %v4886_v59, %v4881_v57  ;;  %v1243_v24 = vsel %vm8506_vm14, %v4887_v2, %v1238_v53  ;;  %v1242_v20 = vsel %vm8506_vm14, %v4882_v26, %v4887_v2  ;;  %2902 = vrot.lane.b32.xlu0 %v2889_v16, %s8440_s21  ;;  %v1406_v60 = vsel %vm8435_vm11, %v4896_v9, %v4897_v52 }
 0x1db   : > { %v4890_v50 = vpop.permute.xlu1 %4889  ;;  %v4905_v42 = vpop.permute.xlu0 %4904  ;;  %v2287_v6 = vpack.c.bf16 %v1275_v40, %v1240_v30  ;;  %v2290_v47 = vpack.c.bf16 %v1278_v10, %v1243_v24  ;;  %v2289_v18 = vpack.c.bf16 %v1277_v5, %v1242_v20  ;;  %v2967_v2 = vrot.slane %v4672_v3, %v8581_v13 }
 0x1dc   : > { %v4892_v36 = vunpack.i.h.bf16 %v4890_v50  ;;  %v4891_v55 = vunpack.i.l.bf16 %v4890_v50  ;;  %v4906_v11 = vunpack.i.l.bf16 %v4905_v42  ;;  %v4907_v22 = vunpack.i.h.bf16 %v4905_v42 }
 0x1dd   : > { %2361 = vmatpush1.bf16.msra.mxu0 %v2287_v6  ;;  %2401 = vmatprep.subr.bf16.mxu1 %v2290_v47  ;;  %v3025_v6 = vrot.slane %v6705_v44, %v8580_v31  ;;  %v6728_v47 = vld [vmem:[%s8377_s1 + $0x21] ss:$8 sm:$0xf] }
 0x1de   : > { %2402 = vmatpush1.bf16.msra.mxu1 %v2289_v18  ;;  %v1339_v45 = vsel %vm8505_vm12, %v4891_v55, %v4892_v36  ;;  %2842 = vrot.lane.b32.xlu1 %v2835_v46, %s5335_s12  ;;  %v1405_v4 = vsel %vm8435_vm11, %v4906_v11, %v4896_v9  ;;  %v1407_v23 = vsel %vm8435_vm11, %v4897_v52, %v4907_v22 }
 0x1df   : > { %v4900_v26 = vpop.permute.xlu1 %4899  ;;  %v1404_v57 = vpop.permute.xlu0 %1403  ;;  %v2292_v19 = vpack.c.bf16 %v1406_v60, %v1339_v45  ;;  %2906 = vrot.lane.b32.xlu0 %v2897_v56, %s8440_s21  ;;  %v3029_v9 = vrot.slane %v6705_v44, %v8579_v34  ;;  %v3091_v11 = vrot.slane %v6728_v47, %v8580_v31 }
 0x1e0   : > { %v4902_v15 = vunpack.i.h.bf16 %v4900_v26  ;;  %v4901_v7 = vunpack.i.l.bf16 %v4900_v26  ;;  %v1408_v38 = vsel %vm8435_vm11, %v4907_v22, %v1404_v57  ;;  %vm8583_vm11 = vmmov %vm8582_vm7  ;;  %v3033_v22 = vrot.slane %v6705_v44, %v8581_v13 }
 0x1e1   : > { %2362 = vmatprep.subr.bf16.mxu0 %v2292_v19 }
 0x1e2   : > { %v1338_v21 = vsel %vm8505_vm12, %v4901_v7, %v4891_v55  ;;  %2904 = vrot.lane.b32.xlu1 %v2893_v35, %s8440_s21  ;;  %v1340_v63 = vsel %vm8505_vm12, %v4892_v36, %v4902_v15 }
 0x1e3   : > { %v1337_v58 = vpop.permute.xlu1 %1336  ;;  %v4915_v53 = vpop.permute.xlu0 %4914  ;;  %v2291_v48 = vpack.c.bf16 %v1405_v4, %v1338_v21  ;;  %2970 = vrot.lane.b32.xlu0 %v2959_v32, %s8438_s22  ;;  %v2293_v16 = vpack.c.bf16 %v1407_v23, %v1340_v63  ;;  %v3087_v32 = vrot.slane %v6728_v47, %v8578_v1  ;;  %v4752_v21 = vunpack.i.h.bf16 %v6370_v0 }
 0x1e4   : > { %v1341_v17 = vsel %vm8505_vm12, %v4902_v15, %v1337_v58  ;;  %v4917_v29 = vunpack.i.h.bf16 %v4915_v53  ;;  %v4916_v51 = vunpack.i.l.bf16 %v4915_v53  ;;  %v4757_v4 = vunpack.i.h.bf16 %v6410_v37  ;;  %v6748_v53 = vld [vmem:[%s8377_s1 + $0x22] ss:$8 sm:$0xf] }
 0x1e5   : > { %v2294_v14 = vpack.c.bf16 %v1408_v38, %v1341_v17  ;;  %2363 = vmatpush1.bf16.msra.mxu0 %v2291_v48 }
 0x1e6   : > { %2968 = vrot.lane.b32.xlu1 %v2955_v61, %s8438_s22  ;;  %v1540_v5 = vsel %vm8582_vm7, %v4916_v51, %v4917_v29 }
 0x1e7   : > { %v4910_v39 = vpop.permute.xlu1 %4909  ;;  %v4925_v33 = vpop.permute.xlu0 %4924  ;;  %2403 = vmatprep.subr.bf16.mxu1 %v2294_v14  ;;  %2908 = vrot.lane.b32.xlu0 %v2901_v8, %s8440_s21  ;;  %s8611_s21 = smov 71  }
 0x1e8   : > { %v4912_v40 = vunpack.i.h.bf16 %v4910_v39  ;;  %v4911_v28 = vunpack.i.l.bf16 %v4910_v39  ;;  %2404 = vmatpush1.bf16.msra.mxu1 %v2293_v16  ;;  %v4926_v10 = vunpack.i.l.bf16 %v4925_v33  ;;  %v4927_v20 = vunpack.i.h.bf16 %v4925_v33 }
 0x1ea   : > { %v1473_v43 = vsel %vm8504_vm10, %v4911_v28, %v4912_v40  ;;  %2972 = vrot.lane.b32.xlu1 %v2963_v41, %s8438_s22  ;;  %v1539_v42 = vsel %vm8583_vm11, %v4926_v10, %v4916_v51  ;;  %vm8584_vm11 = vmmov %vm8582_vm7  ;;  %v3153_v51 = vrot.slane %v6748_v53, %v8578_v1 }
 0x1eb   : > { %v4920_v59 = vpop.permute.xlu1 %4919  ;;  %v1538_v52 = vpop.permute.xlu0 %1537  ;;  %v2296_v46 = vpack.c.bf16 %v1540_v5, %v1473_v43  ;;  %3034 = vrot.lane.b32.xlu0 %v3021_v62, %s8436_s29  ;;  %v1541_v3 = vsel %vm8584_vm11, %v4917_v29, %v4927_v20  ;;  %v3095_v29 = vrot.slane %v6728_v47, %v8579_v34  ;;  %v3099_v62 = vrot.slane %v6728_v47, %v8581_v13 }
 0x1ec   : > { %v4922_v30 = vunpack.i.h.bf16 %v4920_v59  ;;  %v4921_v24 = vunpack.i.l.bf16 %v4920_v59  ;;  %v1542_v45 = vsel %vm8582_vm7, %v4927_v20, %v1538_v52  ;;  %vm8585_vm7 = vcmask 588800  }
 0x1ed   : > { %2364 = vmatprep.subr.bf16.mxu0 %v2296_v46  ;;  %vm8586_vm11 = vmmov %vm8585_vm7  ;;  %v3161_v46 = vrot.slane %v6748_v53, %v8579_v34 }
 0x1ee   : > { %v1472_v50 = vsel %vm8504_vm10, %v4921_v24, %v4911_v28  ;;  %2974 = vrot.lane.b32.xlu1 %v2967_v2, %s8438_s22  ;;  %v1474_v55 = vsel %vm8504_vm10, %v4912_v40, %v4922_v30  ;;  %s8592_s22 = smov 8  }
 0x1ef   : > { %v1471_v18 = vpop.permute.xlu1 %1470  ;;  %v4935_v56 = vpop.permute.xlu0 %4934  ;;  %v2295_v36 = vpack.c.bf16 %v1539_v42, %v1472_v50  ;;  %3038 = vrot.lane.b32.xlu0 %v3029_v9, %s8436_s29  ;;  %v2297_v19 = vpack.c.bf16 %v1541_v3, %v1474_v55  ;;  %v4782_v9 = vunpack.i.h.bf16 %v6448_v54  ;;  %v6781_v54 = vld [vmem:[%s8377_s1 + $0x23] ss:$8 sm:$0xf] }
 0x1f0   : > { %v1475_v60 = vsel %vm8504_vm10, %v4922_v30, %v1471_v18  ;;  %v4937_v26 = vunpack.i.h.bf16 %v4935_v56  ;;  %v4936_v57 = vunpack.i.l.bf16 %v4935_v56  ;;  %v4787_v30 = vunpack.i.h.bf16 %v6483_v12 }
 0x1f1   : > { %v2298_v35 = vpack.c.bf16 %v1542_v45, %v1475_v60  ;;  %2365 = vmatpush1.bf16.msra.mxu0 %v2295_v36  ;;  %v3223_v60 = vrot.slane %v6781_v54, %v8580_v31 }
 0x1f2   : > { %3036 = vrot.lane.b32.xlu1 %v3025_v6, %s8436_s29  ;;  %v1674_v38 = vsel %vm8585_vm7, %v4757_v4, %v4936_v57  ;;  %v1673_v0 = vsel %vm8586_vm11, %v4937_v26, %v4757_v4  ;;  %vm8587_vm11 = vmmov %vm8585_vm7  ;;  %v3157_v6 = vrot.slane %v6748_v53, %v8580_v31 }
 0x1f3   : > { %v4930_v15 = vpop.permute.xlu1 %4929  ;;  %v4945_v7 = vpop.permute.xlu0 %4944  ;;  %2405 = vmatprep.subr.bf16.mxu1 %v2298_v35  ;;  %3102 = vrot.lane.b32.xlu0 %v3091_v11, %s8570_s27 }
 0x1f4   : > { %v4932_v61 = vunpack.i.h.bf16 %v4930_v15  ;;  %v4931_v58 = vunpack.i.l.bf16 %v4930_v15  ;;  %2406 = vmatpush1.bf16.msra.mxu1 %v2297_v19  ;;  %v4947_v48 = vunpack.i.h.bf16 %v4945_v7  ;;  %v4946_v63 = vunpack.i.l.bf16 %v4945_v7 }
 0x1f5   : > { %v3219_v19 = vrot.slane %v6781_v54, %v8578_v1 }
 0x1f6   : > { %v1607_v8 = vsel %vm420_vm8, %v4752_v21, %v4931_v58  ;;  %v1606_v17 = vsel %vm420_vm8, %v4932_v61, %v4752_v21  ;;  %3100 = vrot.lane.b32.xlu1 %v3087_v32, %s8570_s27  ;;  %v1676_v39 = vsel %vm8585_vm7, %v4946_v63, %v4947_v48  ;;  %v1675_v33 = vsel %vm8587_vm11, %v4936_v57, %v4946_v63 }
 0x1f7   : > { %v4940_v37 = vpop.permute.xlu1 %4939  ;;  %v4955_v44 = vpop.permute.xlu0 %4954  ;;  %v2300_v14 = vpack.c.bf16 %v1674_v38, %v1607_v8  ;;  %v2299_v23 = vpack.c.bf16 %v1673_v0, %v1606_v17  ;;  %3040 = vrot.lane.b32.xlu0 %v3033_v22, %s8436_s29  ;;  %v3165_v48 = vrot.slane %v6748_v53, %v8581_v13  ;;  %v4812_v63 = vunpack.i.h.bf16 %v6513_v27  ;;  %v6802_v0 = vld [vmem:[%s8377_s1 + $0x24] ss:$8 sm:$0xf]  ;;  %s8593_s29 = smov 9  }
 0x1f8   : > { %v4942_v16 = vunpack.i.h.bf16 %v4940_v37  ;;  %v4941_v41 = vunpack.i.l.bf16 %v4940_v37  ;;  %v4957_v40 = vunpack.i.h.bf16 %v4955_v44  ;;  %v4956_v28 = vunpack.i.l.bf16 %v4955_v44 }
 0x1f9   : > { %2366 = vmatprep.subr.bf16.mxu0 %v2300_v14  ;;  %v4817_v8 = vunpack.i.h.bf16 %v6533_v49  ;;  %v3227_v14 = vrot.slane %v6781_v54, %v8579_v34  ;;  %vm8502_vm7 = vcmask 1043456  }
 0x1fa   : > { %2367 = vmatpush1.bf16.msra.mxu0 %v2299_v23  ;;  %v1609_v10 = vsel %vm420_vm8, %v4941_v41, %v4942_v16  ;;  %v1608_v43 = vsel %vm420_vm8, %v4931_v58, %v4941_v41  ;;  %3104 = vrot.lane.b32.xlu1 %v3095_v29, %s8570_s27  ;;  %v1808_v18 = vsel %vm627_vm5, %v4787_v30, %v4956_v28 }
 0x1fb   : > { %v4950_v5 = vpop.permute.xlu1 %4949  ;;  %v4965_v2 = vpop.permute.xlu0 %4964  ;;  %v2302_v59 = vpack.c.bf16 %v1676_v39, %v1609_v10  ;;  %v2301_v52 = vpack.c.bf16 %v1675_v33, %v1608_v43  ;;  %3166 = vrot.lane.b32.xlu0 %v3153_v51, %s8572_s23  ;;  %v1807_v36 = vsel %vm627_vm5, %v4957_v40, %v4787_v30  ;;  %v3285_v39 = vrot.slane %v6802_v0, %v8578_v1 }
 0x1fc   : > { %v4952_v24 = vunpack.i.h.bf16 %v4950_v5  ;;  %v4951_v20 = vunpack.i.l.bf16 %v4950_v5  ;;  %v4967_v50 = vunpack.i.h.bf16 %v4965_v2  ;;  %v4966_v42 = vunpack.i.l.bf16 %v4965_v2 }
 0x1fd   : > { %2407 = vmatprep.subr.bf16.mxu1 %v2302_v59  ;;  %v3231_v10 = vrot.slane %v6781_v54, %v8581_v13 }
 0x1fe   : > { %2408 = vmatpush1.bf16.msra.mxu1 %v2301_v52  ;;  %v1741_v47 = vsel %vm558_vm6, %v4782_v9, %v4951_v20  ;;  %v1740_v56 = vsel %vm558_vm6, %v4952_v24, %v4782_v9  ;;  %3106 = vrot.lane.b32.xlu1 %v3099_v62, %s8570_s27  ;;  %v1810_v26 = vsel %vm627_vm5, %v4966_v42, %v4967_v50 }
 0x1ff   : > { %v4960_v12 = vpop.permute.xlu1 %4959  ;;  %v4975_v55 = vpop.permute.xlu0 %4974  ;;  %v2304_v11 = vpack.c.bf16 %v1808_v18, %v1741_v47  ;;  %v2303_v45 = vpack.c.bf16 %v1807_v36, %v1740_v56  ;;  %3170 = vrot.lane.b32.xlu0 %v3161_v46, %s8572_s23  ;;  %v1809_v57 = vsel %vm627_vm5, %v4956_v28, %v4966_v42  ;;  %v3293_v24 = vrot.slane %v6802_v0, %v8579_v34  ;;  %v6827_v42 = vld [vmem:[%s8377_s1 + $0x26] ss:$8 sm:$0xf] }
 0x200   : > { %v4962_v35 = vunpack.i.h.bf16 %v4960_v12  ;;  %v4961_v3 = vunpack.i.l.bf16 %v4960_v12  ;;  %v4977_v32 = vunpack.i.h.bf16 %v4975_v55  ;;  %v4976_v15 = vunpack.i.l.bf16 %v4975_v55 }
 0x201   : > { %2368 = vmatprep.subr.bf16.mxu0 %v2304_v11  ;;  %v3289_v12 = vrot.slane %v6802_v0, %v8580_v31  ;;  %v3381_v55 = vrot.slane %v6827_v42, %v8578_v1 }
 0x202   : > { %2369 = vmatpush1.bf16.msra.mxu0 %v2303_v45  ;;  %v1743_v7 = vsel %vm558_vm6, %v4961_v3, %v4962_v35  ;;  %v1742_v22 = vsel %vm558_vm6, %v4951_v20, %v4961_v3  ;;  %3168 = vrot.lane.b32.xlu1 %v3157_v6, %s8572_s23  ;;  %v1942_v27 = vsel %vm598_vm3, %v4817_v8, %v4976_v15 }
 0x203   : > { %v4970_v21 = vpop.permute.xlu1 %4969  ;;  %v4985_v4 = vpop.permute.xlu0 %4984  ;;  %v2306_v61 = vpack.c.bf16 %v1810_v26, %v1743_v7  ;;  %v2305_v58 = vpack.c.bf16 %v1809_v57, %v1742_v22  ;;  %3234 = vrot.lane.b32.xlu0 %v3223_v60, %s8560_s24  ;;  %v1941_v23 = vsel %vm598_vm3, %v4977_v32, %v4817_v8  ;;  %v3297_v26 = vrot.slane %v6802_v0, %v8581_v13 }
 0x204   : > { %v4972_v38 = vunpack.i.h.bf16 %v4970_v21  ;;  %v4971_v17 = vunpack.i.l.bf16 %v4970_v21  ;;  %v4987_v37 = vunpack.i.h.bf16 %v4985_v4  ;;  %v4986_v44 = vunpack.i.l.bf16 %v4985_v4 }
 0x205   : > { %2409 = vmatprep.subr.bf16.mxu1 %v2306_v61  ;;  %v3389_v7 = vrot.slane %v6827_v42, %v8579_v34 }
 0x206   : > { %2410 = vmatpush1.bf16.msra.mxu1 %v2305_v58  ;;  %v1875_v53 = vsel %vm667_vm4, %v4812_v63, %v4971_v17  ;;  %v1874_v49 = vsel %vm667_vm4, %v4972_v38, %v4812_v63  ;;  %3232 = vrot.lane.b32.xlu1 %v3219_v19, %s8560_s24  ;;  %v1944_v40 = vsel %vm598_vm3, %v4986_v44, %v4987_v37  ;;  %v6852_v63 = vld [vmem:[%s8377_s1 + $0x27] ss:$8 sm:$0xf] }
 0x207   : > { %v4980_v29 = vpop.permute.xlu1 %4979  ;;  %v4995_v51 = vpop.permute.xlu0 %4994  ;;  %v2308_v16 = vpack.c.bf16 %v1942_v27, %v1875_v53  ;;  %v2307_v41 = vpack.c.bf16 %v1941_v23, %v1874_v49  ;;  %3172 = vrot.lane.b32.xlu0 %v3165_v48, %s8572_s23  ;;  %v1943_v28 = vsel %vm598_vm3, %v4976_v15, %v4986_v44 }
 0x208   : > { %v4982_v33 = vunpack.i.h.bf16 %v4980_v29  ;;  %v4981_v62 = vunpack.i.l.bf16 %v4980_v29  ;;  %v4997_v43 = vunpack.i.h.bf16 %v4995_v51  ;;  %v4996_v5 = vunpack.i.l.bf16 %v4995_v51 }
 0x209   : > { %2370 = vmatprep.subr.bf16.mxu0 %v2308_v16  ;;  %v3447_v16 = vrot.slane %v6852_v63, %v8578_v1 }
 0x20a   : > { %2371 = vmatpush1.bf16.msra.mxu0 %v2307_v41  ;;  %v1877_v2 = vsel %vm667_vm4, %v4981_v62, %v4982_v33  ;;  %v1876_v59 = vsel %vm667_vm4, %v4971_v17, %v4981_v62  ;;  %3236 = vrot.lane.b32.xlu1 %v3227_v14, %s8560_s24  ;;  %v2076_v18 = vsel %vm460_vm1, %v4996_v5, %v4997_v43 }
 0x20b   : > { %v4990_v52 = vpop.permute.xlu1 %4989  ;;  %v5005_v46 = vpop.permute.xlu0 %5004  ;;  %v2310_v9 = vpack.c.bf16 %v1944_v40, %v1877_v2  ;;  %v2309_v30 = vpack.c.bf16 %v1943_v28, %v1876_v59  ;;  %3298 = vrot.lane.b32.xlu0 %v3285_v39, %s8564_s15  ;;  %v3385_v17 = vrot.slane %v6827_v42, %v8580_v31  ;;  %v3451_v14 = vrot.slane %v6852_v63, %v8580_v31 }
 0x20c   : > { %v4992_v20 = vunpack.i.h.bf16 %v4990_v52  ;;  %v4991_v50 = vunpack.i.l.bf16 %v4990_v52  ;;  %v5006_v6 = vunpack.i.l.bf16 %v5005_v46  ;;  %v5007_v60 = vunpack.i.h.bf16 %v5005_v46 }
 0x20d   : > { %2411 = vmatprep.subr.bf16.mxu1 %v2310_v9  ;;  %v4660_v62 = vcombine.low %v6480_v25, %v6480_v25  ;;  %v3455_v28 = vrot.slane %v6852_v63, %v8579_v34 }
 0x20e   : > { %2412 = vmatpush1.bf16.msra.mxu1 %v2309_v30  ;;  %v2009_v47 = vsel %vm529_vm2, %v4991_v50, %v4992_v20  ;;  %3238 = vrot.lane.b32.xlu1 %v3231_v10, %s8560_s24  ;;  %v2075_v3 = vsel %vm460_vm1, %v5006_v6, %v4996_v5  ;;  %v2077_v48 = vsel %vm460_vm1, %v4997_v43, %v5007_v60 }
 0x20f   : > { %v5000_v56 = vpop.permute.xlu1 %4999  ;;  %v2074_v36 = vpop.permute.xlu0 %2073  ;;  %v2312_v54 = vpack.c.bf16 %v2076_v18, %v2009_v47  ;;  %3302 = vrot.lane.b32.xlu0 %v3293_v24, %s8564_s15 }
 0x210   : > { %v5002_v11 = vunpack.i.h.bf16 %v5000_v56  ;;  %v5001_v45 = vunpack.i.l.bf16 %v5000_v56  ;;  %v2078_v22 = vsel %vm460_vm1, %v5007_v60, %v2074_v36 }
 0x211   : > { %2372 = vmatprep.subr.bf16.mxu0 %v2312_v54 }
 0x212   : > { %v2008_v35 = vsel %vm529_vm2, %v5001_v45, %v4991_v50  ;;  %v2010_v15 = vsel %vm529_vm2, %v4992_v20, %v5002_v11  ;;  %3300 = vrot.lane.b32.xlu1 %v3289_v12, %s8564_s15 }
 0x213   : > { %v2007_v57 = vpop.permute.xlu1 %2006  ;;  %v5015_v19 = vpop.permute.xlu0 %5014  ;;  %v2311_v32 = vpack.c.bf16 %v2075_v3, %v2008_v35  ;;  %3394 = vrot.lane.b32.xlu0 %v3381_v55, %s8588_s16  ;;  %v2313_v8 = vpack.c.bf16 %v2077_v48, %v2010_v15 }
 0x214   : > { %v2011_v21 = vsel %vm529_vm2, %v5002_v11, %v2007_v57  ;;  %v5017_v4 = vunpack.i.h.bf16 %v5015_v19  ;;  %v5016_v61 = vunpack.i.l.bf16 %v5015_v19 }
 0x215   : > { %v2314_v58 = vpack.c.bf16 %v2078_v22, %v2011_v21  ;;  %2373 = vmatpush1.bf16.msra.mxu0 %v2311_v32 }
 0x216   : > { %3304 = vrot.lane.b32.xlu1 %v3297_v26, %s8564_s15  ;;  %v2144_v44 = vsel %vm391_vm0, %v5016_v61, %v5017_v4 }
 0x217   : > { %v5010_v38 = vpop.permute.xlu1 %5009  ;;  %2413 = vmatprep.subr.bf16.mxu1 %v2314_v58  ;;  %3398 = vrot.lane.b32.xlu0 %v3389_v7, %s8588_s16  ;;  %v2317_v51 = vpack.c.bf16 %v2144_v44, %v2144_v44  ;;  %v4682_v44 = vld [vmem:[%s8377_s1 + $0x41] ss:$8 sm:$0xf] }
 0x218   : > { %v5012_v0 = vunpack.i.h.bf16 %v5010_v38  ;;  %v5011_v37 = vunpack.i.l.bf16 %v5010_v38  ;;  %2414 = vmatpush1.bf16.msra.mxu1 %v2313_v8 }
 0x219   : > { %v2343_v40 = vsel %vm8502_vm7, %v2317_v51, 0  ;;  %v3587_v51 = vrot.slane %v4682_v44, %v8579_v34 }
 0x21a   : > { %v2143_v53 = vsel %vm391_vm0, %v5012_v0, %v5016_v61  ;;  %v2142_v27 = vsel %vm391_vm0, %v5011_v37, %v5012_v0  ;;  %3396 = vrot.lane.b32.xlu1 %v3385_v17, %s8588_s16  ;;  %v3459_v17 = vrot.slane %v6852_v63, %v8581_v13  ;;  %v4681_v0 = vld [vmem:[%s8377_s1 + $0x40] ss:$8 sm:$0xf]  ;;  %v3579_v63 = vrot.slane %v4682_v44, %v8578_v1 }
 0x21b   : > { %v2141_v49 = vpop.permute.xlu1 %2140  ;;  %v2316_v23 = vpack.c.bf16 %v2143_v53, %v2143_v53  ;;  %v2315_v29 = vpack.c.bf16 %v2142_v27, %v2142_v27  ;;  %3462 = vrot.lane.b32.xlu0 %v3451_v14, %s8589_s18  ;;  %v3517_v37 = vrot.slane %v4681_v0, %v8580_v31  ;;  %v3393_v27 = vrot.slane %v6827_v42, %v8581_v13 }
 0x21c   : > { %v2145_v41 = vsel %vm391_vm0, %v5017_v4, %v2141_v49  ;;  %v3513_v49 = vrot.slane %v4681_v0, %v8578_v1  ;;  %v3521_v42 = vrot.slane %v4681_v0, %v8579_v34 }
 0x21d   : > { %v2318_v39 = vpack.c.bf16 %v2145_v41, %v2145_v41  ;;  %4662 = vmatprep.subr.msk.bf16.mxu0 %vm8502_vm7, %v2316_v23  ;;  %v2337_v33 = vsel %vm8502_vm7, %v2315_v29, 0  ;;  %v4683_v41 = vld [vmem:[%s8377_s1 + $0x42] ss:$8 sm:$0xf] }
 0x21e   : > { %2375 = vmatpush1.bf16.msra.mxu0 %v2337_v33  ;;  %3460 = vrot.lane.b32.xlu1 %v3447_v16, %s8589_s18  ;;  %v3591_v16 = vrot.slane %v4682_v44, %v8581_v13 }
 0x21f   : > { %4664 = vmatprep.subr.msk.bf16.mxu1 %vm8502_vm7, %v2318_v39  ;;  %v6878_v10 = vpop.permute.xlu1 %2506 }
 0x220   : > { %2416 = vmatpush1.bf16.msra.mxu1 %v2343_v40  ;;  %8590 = vst [vmem:[#allocation11_spill] sm:$0xff] %v6878_v10  ;;  %v3649_v40 = vrot.slane %v4683_v41, %v8580_v31 }
 0x221   : > { %2381 = vmatmul.mubr.bf16.vlgmr.msra.gmra.mrb[0].mxu0 %v4660_v62 }
 0x222   : > { %3464 = vrot.lane.b32.xlu1 %v3455_v28, %s8589_s18  ;;  %v4684_v28 = vld [vmem:[%s8377_s1 + $0x43] ss:$8 sm:$0xf] }
 0x223   : > { %2422 = vmatmul.mubr.bf16.vlgmr.msra.gmra.mrb[0].mxu1 %v4660_v62  ;;  %v6880_v5 = vpop.permute.xlu1 %2508  ;;  %v3583_v62 = vrot.slane %v4682_v44, %v8580_v31 }
 0x225   : > { %v2323_v43 = vpop.permute.xlu0 %2322 }
 0x227   : > { %v6884_v2 = vpop.permute.xlu1 %2572 }
 0x229   : > { %v6882_v25 = vpop.permute.xlu0 %2469 }
 0x22a   : > { %8591 = vst [vmem:[#allocation10_spill] sm:$0xff] %v6882_v25 }
 0x22b   : > { %v6888_v52 = vpop.permute.xlu1 %2576 }
 0x22d   : > { %v6886_v59 = vpop.permute.xlu0 %2510 }
 0x22f   : > { %v6892_v9 = vpop.permute.xlu1 %2578 }
 0x231   : > { %v6890_v46 = vpop.permute.xlu0 %2574 }
 0x233   : > { %v6904_v55 = vpop.permute.xlu1 %2640 }
 0x235   : > { %v6894_v30 = vpop.permute.xlu0 %2512 }
 0x237   : > { %v6920_v4 = vpop.permute.xlu1 %2704 }
 0x239   : > { %v6912_v3 = vpop.permute.xlu0 %2638 }
 0x23b   : > { %v6924_v58 = vpop.permute.xlu1 %2708 }
 0x23d   : > { %v6922_v61 = vpop.permute.xlu0 %2642 }
 0x23f   : > { %v6928_v8 = vpop.permute.xlu1 %2710 }
 0x241   : > { %v6926_v48 = vpop.permute.xlu0 %2706 }
 0x243   : > { %v6942_v14 = vpop.permute.xlu1 %2772 }
 0x245   : > { %v6930_v38 = vpop.permute.xlu0 %2644 }
 0x247   : > { %v6952_v23 = vpop.permute.xlu1 %2836 }
 0x249   : > { %v6944_v53 = vpop.permute.xlu0 %2770 }
 0x24b   : > { %v6965_v39 = vpop.permute.xlu1 %2840 }
 0x24d   : > { %v6954_v29 = vpop.permute.xlu0 %2774 }
 0x251   : > { %v6967_v33 = vpop.permute.xlu0 %2838 }
 0x2f4   : > { %v2382_v24 = vpop.f32.mrb[0].mxu0 }
 0x2f5   : > { %v6896_v20 = vadd.f32 %v2382_v24, %v2323_v43  ;;  %v2384_v50 = vpop.f32.mrb[1].mxu0  ;;  %v6978_v24 = vpop.permute.xlu1 %2842 }
 0x2f6   : > { %v6898_v6 = vadd.f32 %v2384_v50, %v2323_v43  ;;  %v2386_v47 = vpop.f32.mrb[2].mxu0  ;;  %v2423_v18 = vpop.f32.mrb[0].mxu1  ;;  %8594 = vst [vmem:[#allocation8_spill] sm:$0xff] %v6978_v24 }
 0x2f7   : > { %v2438_v56 = vmul.f32 %v6896_v20, %v6896_v20  ;;  %v6902_v36 = vadd.f32 %v2423_v18, %v2323_v43  ;;  %v2387_v54 = vpop.f32.mrb[3].mxu0  ;;  %v2425_v12 = vpop.f32.mrb[1].mxu1  ;;  %v3711_v47 = vrot.slane %v4684_v28, %v8578_v1  ;;  %v3645_v18 = vrot.slane %v4683_v41, %v8578_v1 }
 0x2f8   : > { %v2432_v11 = vadd.f32 %v6898_v6, %v6896_v20  ;;  %v2439_v45 = vmul.f32 %v6898_v6, %v6898_v6  ;;  %v6910_v60 = vadd.f32 %v2425_v12, %v2323_v43  ;;  %v2427_v35 = vpop.f32.mrb[2].mxu1  ;;  %v3525_v43 = vrot.slane %v4681_v0, %v8581_v13  ;;  %v6980_v50 = vpop.permute.xlu0 %2776 }
 0x2f9   : > { %v2440_v26 = vmul.f32 %v6902_v36, %v6902_v36  ;;  %v2428_v57 = vpop.f32.mrb[3].mxu1  ;;  %v6988_v54 = vpop.permute.xlu1 %2904  ;;  %v4685_v35 = vld [vmem:[%s8377_s1 + $0x44] ss:$8 sm:$0xf] }
 0x2fa   : > { %v2442_v19 = vadd.f32 %v2439_v45, %v2438_v56  ;;  %v2433_v32 = vadd.f32 %v2432_v11, %v6902_v36  ;;  %v2441_v15 = vmul.f32 %v6910_v60, %v6910_v60  ;;  %v3719_v56 = vrot.slane %v4684_v28, %v8579_v34  ;;  %8595 = vst [vmem:[#allocation12_spill] sm:$0xff] %v6988_v54 }
 0x2fb   : > { %v3653_v11 = vrot.slane %v4683_v41, %v8579_v34  ;;  %v3723_v45 = vrot.slane %v4684_v28, %v8581_v13  ;;  %v3777_v0 = vrot.slane %v4685_v35, %v8578_v1  ;;  %v3785_v44 = vrot.slane %v4685_v35, %v8579_v34 }
 0x2fc   : > { %v2434_v7 = vadd.f32 %v2433_v32, %v6910_v60  ;;  %v2443_v22 = vadd.f32 %v2442_v19, %v2440_v26  ;;  %v6990_v12 = vpop.permute.xlu0 %2902  ;;  %v3715_v26 = vrot.slane %v4684_v28, %v8580_v31  ;;  %v3781_v32 = vrot.slane %v4685_v35, %v8580_v31 }
 0x2fd   : > { %8596 = vst [vmem:[#allocation9_spill] sm:$0xff] %v6990_v12  ;;  %v7001_v57 = vpop.permute.xlu1 %2968  ;;  %v3789_v28 = vrot.slane %v4685_v35, %v8581_v13 }
 0x2fe   : > { %2435 = vadd.xlane.f32.xlu1 %v2434_v7  ;;  %v2444_v21 = vadd.f32 %v2443_v22, %v2441_v15  ;;  %8597 = vst [vmem:[#allocation13_spill] sm:$0xff] %v7001_v57  ;;  %v4686_v15 = vld [vmem:[%s8377_s1 + $0x45] ss:$8 sm:$0xf]  ;;  %v3657_v7 = vrot.slane %v4683_v41, %v8581_v13 }
 0x2ff   : > { %v3843_v22 = vrot.slane %v4686_v15, %v8578_v1  ;;  %v4688_v41 = vld [vmem:[%s8377_s1 + $0x47] ss:$8 sm:$0xf] }
 0x300   : > { %2445 = vadd.xlane.f32.xlu0 %v2444_v21  ;;  %v7003_v19 = vpop.permute.xlu0 %2906  ;;  %v3987_v35 = vrot.slane %v4688_v41, %v8581_v13 }
 0x301   : > { %8598 = vst [vmem:[#allocation19_spill] sm:$0xff] %v7003_v19  ;;  %v7014_v21 = vpop.permute.xlu1 %2972 }
 0x302   : > { %8599 = vst [vmem:[#allocation16_spill] sm:$0xff] %v7014_v21 }
 0x30f   : > { %3466 = vrot.lane.b32.xlu1 %v3459_v17, %s8589_s18  ;;  %v7016_v17 = vpop.permute.xlu0 %2970 }
 0x310   : > { %8600 = vst [vmem:[#allocation18_spill] sm:$0xff] %v7016_v17 }
 0x313   : > { %3528 = vrot.lane.b32.xlu1 %v3517_v37, %s8592_s22  ;;  %v3851_v37 = vrot.slane %v4686_v15, %v8579_v34 }
 0x316   : > { %3400 = vrot.lane.b32.xlu0 %v3393_v27, %s8588_s16  ;;  %v7024_v27 = vpop.permute.xlu1 %2974 }
 0x317   : > { %3592 = vrot.lane.b32.xlu1 %v3579_v63, %s8593_s29  ;;  %8601 = vst [vmem:[#allocation17_spill] sm:$0xff] %v7024_v27  ;;  %v7026_v63 = vpop.permute.xlu0 %2908 }
 0x318   : > { %8602 = vst [vmem:[#allocation14_spill] sm:$0xff] %v7026_v63 }
 0x31a   : > { %3526 = vrot.lane.b32.xlu0 %v3513_v49, %s8592_s22  ;;  %v3855_v49 = vrot.slane %v4686_v15, %v8581_v13 }
 0x31b   : > { %3596 = vrot.lane.b32.xlu1 %v3587_v51, %s8593_s29  ;;  %v4687_v51 = vld [vmem:[%s8377_s1 + $0x46] ss:$8 sm:$0xf] }
 0x31e   : > { %3530 = vrot.lane.b32.xlu0 %v3521_v42, %s8592_s22  ;;  %v3847_v42 = vrot.slane %v4686_v15, %v8580_v31 }
 0x31f   : > { %3598 = vrot.lane.b32.xlu1 %v3591_v16, %s8593_s29  ;;  %v3913_v16 = vrot.slane %v4687_v51, %v8580_v31 }
 0x322   : > { %3594 = vrot.lane.b32.xlu0 %v3583_v62, %s8593_s29  ;;  %v7040_v62 = vpop.permute.xlu1 %3036 }
 0x323   : > { %3660 = vrot.lane.b32.xlu1 %v3649_v40, %s8442_s19  ;;  %8603 = vst [vmem:[#allocation20_spill] sm:$0xff] %v7040_v62  ;;  %v7042_v40 = vpop.permute.xlu0 %3034 }
 0x324   : > { %8604 = vst [vmem:[#allocation15_spill] sm:$0xff] %v7042_v40 }
 0x326   : > { %3532 = vrot.lane.b32.xlu0 %v3525_v43, %s8592_s22  ;;  %v3975_v43 = vrot.slane %v4688_v41, %v8578_v1 }
 0x327   : > { %3724 = vrot.lane.b32.xlu1 %v3711_v47, %s5331_s20  ;;  %v3909_v47 = vrot.slane %v4687_v51, %v8578_v1 }
 0x32a   : > { %3658 = vrot.lane.b32.xlu0 %v3645_v18, %s8442_s19  ;;  %v7050_v18 = vpop.permute.xlu1 %3100 }
 0x32b   : > { %3728 = vrot.lane.b32.xlu1 %v3719_v56, %s5331_s20  ;;  %8605 = vst [vmem:[#allocation21_spill] sm:$0xff] %v7050_v18  ;;  %v7052_v56 = vpop.permute.xlu0 %3038 }
 0x32c   : > { %8606 = vst [vmem:[#allocation25_spill] sm:$0xff] %v7052_v56 }
 0x32e   : > { %3662 = vrot.lane.b32.xlu0 %v3653_v11, %s8442_s19  ;;  %v3983_v11 = vrot.slane %v4688_v41, %v8579_v34 }
 0x32f   : > { %3730 = vrot.lane.b32.xlu1 %v3723_v45, %s5331_s20  ;;  %v3917_v45 = vrot.slane %v4687_v51, %v8579_v34  ;;  %v7065_v15 = vpop.permute.xlu0 %3102 }
 0x330   : > { %8608 = vst [vmem:[#allocation22_spill] sm:$0xff] %v7065_v15 }
 0x332   : > { %3726 = vrot.lane.b32.xlu0 %v3715_v26, %s5331_s20  ;;  %v4689_v26 = vld [vmem:[%s8377_s1 + $0x60] ss:$8 sm:$0xf] }
 0x333   : > { %3792 = vrot.lane.b32.xlu1 %v3781_v32, %s5332_s25  ;;  %v7063_v32 = vpop.permute.xlu1 %3104 }
 0x334   : > { %8607 = vst [vmem:[#allocation24_spill] sm:$0xff] %v7063_v32 }
 0x336   : > { %3664 = vrot.lane.b32.xlu0 %v3657_v7, %s8442_s19  ;;  %v3979_v7 = vrot.slane %v4688_v41, %v8580_v31  ;;  %s8615_s19 = smov 73  }
 0x337   : > { %3856 = vrot.lane.b32.xlu1 %v3843_v22, %s5333_s26  ;;  %v4045_v22 = vrot.slane %v4689_v26, %v8580_v31 }
 0x33a   : > { %3790 = vrot.lane.b32.xlu0 %v3777_v0, %s5332_s25  ;;  %v4690_v0 = vld [vmem:[%s8377_s1 + $0x61] ss:$8 sm:$0xf] }
 0x33b   : > { %3860 = vrot.lane.b32.xlu1 %v3851_v37, %s5333_s26  ;;  %v3921_v37 = vrot.slane %v4687_v51, %v8581_v13  ;;  %v4115_v41 = vrot.slane %v4690_v0, %v8579_v34  ;;  %v4049_v51 = vrot.slane %v4689_v26, %v8579_v34 }
 0x33e   : > { %3794 = vrot.lane.b32.xlu0 %v3785_v44, %s5332_s25  ;;  %v7076_v44 = vpop.permute.xlu1 %3106 }
 0x33f   : > { %3862 = vrot.lane.b32.xlu1 %v3855_v49, %s5333_s26  ;;  %8609 = vst [vmem:[#allocation23_spill] sm:$0xff] %v7076_v44  ;;  %v7078_v49 = vpop.permute.xlu0 %3040 }
 0x340   : > { %8610 = vst [vmem:[#allocation26_spill] sm:$0xff] %v7078_v49 }
 0x342   : > { %3858 = vrot.lane.b32.xlu0 %v3847_v42, %s5333_s26  ;;  %v4107_v42 = vrot.slane %v4690_v0, %v8578_v1 }
 0x343   : > { %3924 = vrot.lane.b32.xlu1 %v3913_v16, %s5334_s11  ;;  %v4041_v16 = vrot.slane %v4689_v26, %v8578_v1 }
 0x346   : > { %3796 = vrot.lane.b32.xlu0 %v3789_v28, %s5332_s25  ;;  %v7086_v28 = vpop.permute.xlu1 %3168 }
 0x347   : > { %3988 = vrot.lane.b32.xlu1 %v3975_v43, %s5335_s12  ;;  %v7088_v43 = vpop.permute.xlu0 %3166 }
 0x348   : > { %8613 = vst [vmem:[#allocation27_spill] sm:$0xff] %v7088_v43 }
 0x34a   : > { %3922 = vrot.lane.b32.xlu0 %v3909_v47, %s5334_s11  ;;  %v4119_v47 = vrot.slane %v4690_v0, %v8581_v13 }
 0x34b   : > { %3992 = vrot.lane.b32.xlu1 %v3983_v11, %s5335_s12  ;;  %v4111_v11 = vrot.slane %v4690_v0, %v8580_v31 }
 0x34e   : > { %3926 = vrot.lane.b32.xlu0 %v3917_v45, %s5334_s11  ;;  %v4691_v45 = vld [vmem:[%s8377_s1 + $0x62] ss:$8 sm:$0xf] }
 0x34f   : > { %3994 = vrot.lane.b32.xlu1 %v3987_v35, %s5335_s12  ;;  %v7099_v35 = vpop.permute.xlu1 %3232  ;;  %v4185_v0 = vrot.slane %v4691_v45, %v8581_v13 }
 0x350   : > { %8614 = vst [vmem:[#allocation28_spill] sm:$0xff] %v7099_v35 }
 0x352   : > { %3990 = vrot.lane.b32.xlu0 %v3979_v7, %s5335_s12  ;;  %v7101_v7 = vpop.permute.xlu0 %3170 }
 0x353   : > { %4056 = vrot.lane.b32.xlu1 %v4045_v22, %s8611_s21  ;;  %v4177_v22 = vrot.slane %v4691_v45, %v8580_v31 }
 0x356   : > { %3928 = vrot.lane.b32.xlu0 %v3921_v37, %s5334_s11  ;;  %v4053_v37 = vrot.slane %v4689_v26, %v8581_v13 }
 0x357   : > { %4120 = vrot.lane.b32.xlu1 %v4107_v42, %s8612_s28  ;;  %v7109_v42 = vpop.permute.xlu1 %3236 }
 0x358   : > { %8616 = vst [vmem:[#allocation29_spill] sm:$0xff] %v7109_v42 }
 0x35a   : > { %4054 = vrot.lane.b32.xlu0 %v4041_v16, %s8611_s21  ;;  %v7111_v16 = vpop.permute.xlu0 %3234 }
 0x35b   : > { %4124 = vrot.lane.b32.xlu1 %v4115_v41, %s8612_s28  ;;  %8617 = vst [vmem:[#allocation30_spill] sm:$0xff] %v7111_v16  ;;  %v4173_v41 = vrot.slane %v4691_v45, %v8578_v1 }
 0x35e   : > { %4058 = vrot.lane.b32.xlu0 %v4049_v51, %s8611_s21  ;;  %v4181_v51 = vrot.slane %v4691_v45, %v8579_v34  ;;  %v7120_v26 = vpop.permute.xlu0 %3172 }
 0x35f   : > { %4126 = vrot.lane.b32.xlu1 %v4119_v47, %s8612_s28  ;;  %v7118_v47 = vpop.permute.xlu1 %3238  ;;  %8619 = vst [vmem:[#allocation32_spill] sm:$0xff] %v7120_v26 }
 0x360   : > { %8618 = vst [vmem:[#allocation31_spill] sm:$0xff] %v7118_v47 }
 0x362   : > { %4122 = vrot.lane.b32.xlu0 %v4111_v11, %s8612_s28 }
 0x363   : > { %4188 = vrot.lane.b32.xlu1 %v4177_v22, %s8615_s19  ;;  %v7123_v11 = vpop.permute.xlu1 %3300  ;;  %v7125_v22 = vpop.permute.xlu0 %3298 }
 0x364   : > { %8620 = vst [vmem:[#allocation33_spill] sm:$0xff] %v7125_v22 }
 0x366   : > { %4060 = vrot.lane.b32.xlu0 %v4053_v37, %s8611_s21 }
 0x367   : > { %4192 = vrot.lane.b32.xlu1 %v4185_v0, %s8615_s19  ;;  %v7127_v13 = vpop.permute.xlu1 %3304  ;;  %v7129_v37 = vpop.permute.xlu0 %3302 }
 0x368   : > { %8621 = vst [vmem:[#allocation34_spill] sm:$0xff] %v7127_v13 }
 0x36a   : > { %4186 = vrot.lane.b32.xlu0 %v4173_v41, %s8615_s19 }
 0x36b   : > { %v7131_v31 = vpop.permute.xlu1 %3396  ;;  %v7133_v0 = vpop.permute.xlu0 %3394 }
 0x36e   : > { %4190 = vrot.lane.b32.xlu0 %v4181_v51, %s8615_s19 }
 0x36f   : > { %v7135_v41 = vpop.permute.xlu1 %3460  ;;  %v7137_v45 = vpop.permute.xlu0 %3398 }
 0x373   : > { %v7139_v34 = vpop.permute.xlu1 %3464  ;;  %v7141_v1 = vpop.permute.xlu0 %3462 }
 0x38b   : > { %v2436_v51 = vpop.xlane.xlu1 %2435 }
 0x38c   : > { %v7143_v47 = vmul.f32 0.001953125, %v2436_v51 }
 0x38d   : > { %v2446_v42 = vpop.xlane.xlu0 %2445 }
 0x38e   : > { %v2447_v35 = vmul.f32 0.001953125, %v2446_v42  ;;  %v2448_v16 = vmul.f32 %v7143_v47, %v7143_v47 }
 0x38f   : > { %v7147_v49 = vpop.permute.xlu1 %3466 }
 0x390   : > { %8622 = vst [vmem:[#allocation35_spill] sm:$0xff] %v7147_v49  ;;  %v2449_v44 = vsub.f32 %v2447_v35, %v2448_v16  ;;  %v2430_v35 = vld [vmem:[%s8380_s4] sm:$0xff] }
 0x391   : > { %v7149_v56 = vpop.permute.xlu0 %3400 }
 0x392   : > { %8623 = vst [vmem:[#allocation36_spill] sm:$0xff] %v7149_v56  ;;  %v2450_v40 = vmax.f32 %v2449_v44, 0.0 }
 0x393   : > { %v7151_v62 = vpop.permute.xlu1 %3528 }
 0x394   : > { %v2451_v32 = vadd.f32 1e-05, %v2450_v40 }
 0x395   : > { %v7153_v18 = vpop.permute.xlu0 %3526 }
 0x396   : > { %5314 = vrsqrt.f32 %v2451_v32 }
 0x397   : > { %v7155_v15 = vpop.permute.xlu1 %3592 }
 0x399   : > { %v7157_v51 = vpop.permute.xlu0 %3530 }
 0x39b   : > { %v7159_v42 = vpop.permute.xlu1 %3596 }
 0x39d   : > { %v7161_v63 = vpop.permute.xlu0 %3594 }
 0x39f   : > { %v7166_v16 = vpop.permute.xlu1 %3598 }
 0x3a0   : > { %8624 = vst [vmem:[#allocation37_spill] sm:$0xff] %v7166_v16  ;;  %v5315_v44 = vpop.eup %5314 }
 0x3a1   : > { %v2457_v27 = vmul.f32 %v5315_v44, %v2430_v35  ;;  %v7168_v40 = vpop.permute.xlu0 %3532 }
 0x3a2   : > { %8625 = vst [vmem:[#allocation38_spill] sm:$0xff] %v7168_v40 }
 0x3a3   : > { %2460 = vperm.xlu1 %5019, %v2457_v27   ;;  %v7170_v32 = vpop.permute.xlu1 %3660 }
 0x3a4   : > { %8626 = vst [vmem:[#allocation39_spill] sm:$0xff] %v7170_v32 }
 0x3a5   : > { %v7172_v19 = vpop.permute.xlu0 %3658 }
 0x3a6   : > { %8627 = vst [vmem:[#allocation40_spill] sm:$0xff] %v7172_v19 }
 0x3a7   : > { %v7174_v12 = vpop.permute.xlu1 %3724 }
 0x3a8   : > { %8628 = vst [vmem:[#allocation41_spill] sm:$0xff] %v7174_v12 }
 0x3a9   : > { %v7176_v54 = vpop.permute.xlu0 %3662 }
 0x3aa   : > { %8629 = vst [vmem:[#allocation42_spill] sm:$0xff] %v7176_v54 }
 0x3ab   : > { %v7178_v21 = vpop.permute.xlu1 %3728 }
 0x3ac   : > { %8630 = vst [vmem:[#allocation43_spill] sm:$0xff] %v7178_v21 }
 0x3ad   : > { %v7180_v57 = vpop.permute.xlu0 %3726 }
 0x3ae   : > { %8631 = vst [vmem:[#allocation44_spill] sm:$0xff] %v7180_v57 }
 0x3af   : > { %v7182_v17 = vpop.permute.xlu1 %3730 }
 0x3b0   : > { %8632 = vst [vmem:[#allocation45_spill] sm:$0xff] %v7182_v17 }
 0x3b1   : > { %v7184_v25 = vpop.permute.xlu0 %3664 }
 0x3b2   : > { %8633 = vst [vmem:[#allocation46_spill] sm:$0xff] %v7184_v25 }
 0x3b3   : > { %v7186_v35 = vpop.permute.xlu1 %3792 }
 0x3b4   : > { %8634 = vst [vmem:[#allocation47_spill] sm:$0xff] %v7186_v35 }
 0x3b5   : > { %v7188_v44 = vpop.permute.xlu0 %3790 }
 0x3b6   : > { %8635 = vst [vmem:[#allocation48_spill] sm:$0xff] %v7188_v44 }
 0x3b7   : > { %v7190_v27 = vpop.permute.xlu1 %3856 }
 0x3b8   : > { %8636 = vst [vmem:[#allocation49_spill] sm:$0xff] %v7190_v27 }
 0x3b9   : > { %v7192_v32 = vpop.permute.xlu0 %3794 }
 0x3ba   : > { %8637 = vst [vmem:[#allocation50_spill] sm:$0xff] %v7192_v32 }
 0x3bb   : > { %v7194_v19 = vpop.permute.xlu1 %3860 }
 0x3bc   : > { %8638 = vst [vmem:[#allocation51_spill] sm:$0xff] %v7194_v19 }
 0x3bd   : > { %v7196_v12 = vpop.permute.xlu0 %3858 }
 0x3be   : > { %8639 = vst [vmem:[#allocation52_spill] sm:$0xff] %v7196_v12 }
 0x3bf   : > { %v7198_v54 = vpop.permute.xlu1 %3862 }
 0x3c0   : > { %8640 = vst [vmem:[#allocation53_spill] sm:$0xff] %v7198_v54 }
 0x3c1   : > { %v7200_v21 = vpop.permute.xlu0 %3796 }
 0x3c2   : > { %8641 = vst [vmem:[#allocation54_spill] sm:$0xff] %v7200_v21 }
 0x3c3   : > { %v7202_v57 = vpop.permute.xlu1 %3924 }
 0x3c4   : > { %8642 = vst [vmem:[#allocation55_spill] sm:$0xff] %v7202_v57 }
 0x3c5   : > { %v7204_v17 = vpop.permute.xlu0 %3922 }
 0x3c6   : > { %8643 = vst [vmem:[#allocation56_spill] sm:$0xff] %v7204_v17 }
 0x3c7   : > { %v7206_v25 = vpop.permute.xlu1 %3988 }
 0x3c8   : > { %8644 = vst [vmem:[#allocation57_spill] sm:$0xff] %v7206_v25 }
 0x3c9   : > { %v7208_v35 = vpop.permute.xlu0 %3926 }
 0x3ca   : > { %8645 = vst [vmem:[#allocation58_spill] sm:$0xff] %v7208_v35  ;;  %v7213_v27 = vsel %vm667_vm4, %v7202_v57, %v7208_v35 }
 0x3cb   : > { %8646 = vst [vmem:[#allocation59_spill] sm:$0xff] %v7213_v27  ;;  %v7217_v12 = vpop.permute.xlu1 %3992 }
 0x3cd   : > { %v7215_v19 = vpop.permute.xlu0 %3990 }
 0x3ce   : > { %v7222_v21 = vsel %vm627_vm5, %v7215_v19, %v7217_v12 }
 0x3cf   : > { %8647 = vst [vmem:[#allocation60_spill] sm:$0xff] %v7222_v21  ;;  %v7224_v54 = vpop.permute.xlu1 %3994  ;;  %v7245_v21 = vsel %vm391_vm0, %v6878_v10, %v6880_v5  ;;  %v7269_v10 = vsel %vm460_vm1, %v6888_v52, %v6892_v9 }
 0x3d1   : > { %v7230_v32 = vpop.permute.xlu0 %3928 }
 0x3d3   : > { %v7226_v17 = vpop.permute.xlu1 %4056 }
 0x3d4   : > { %8648 = vst [vmem:[#allocation61_spill] sm:$0xff] %v7226_v17 }
 0x3d5   : > { %v7234_v27 = vpop.permute.xlu0 %4054 }
 0x3d7   : > { %v7228_v25 = vpop.permute.xlu1 %4120 }
 0x3d8   : > { %8649 = vst [vmem:[#allocation62_spill] sm:$0xff] %v7228_v25 }
 0x3d9   : > { %v7238_v57 = vpop.permute.xlu0 %4058 }
 0x3db   : > { %v7232_v44 = vpop.permute.xlu1 %4124 }
 0x3dc   : > { %8650 = vst [vmem:[#allocation63_spill] sm:$0xff] %v7232_v44  ;;  %v7254_v44 = vsel %vm391_vm0, %v6880_v5, %v6886_v59  ;;  %v7274_v5 = vsel %vm391_vm0, %v6886_v59, %v6894_v30  ;;  %v7294_v59 = vsel %vm598_vm3, %v6920_v4, %v6926_v48 }
 0x3dd   : > { %v7247_v17 = vpop.permute.xlu0 %4122  ;;  %8654 = vst [vmem:[#allocation67_spill] sm:$0xff] %v7254_v44  ;;  %8655 = vst [vmem:[#allocation68_spill] sm:$0xff] %v7274_v5  ;;  %v7279_v44 = vsel %vm529_vm2, %v6912_v3, %v6904_v55  ;;  %v7299_v5 = vsel %vm598_vm3, %v6926_v48, %v6924_v58  ;;  %v7329_v48 = vsel %vm627_vm5, %v6965_v39, %v6978_v24 }
 0x3de   : > { %8658 = vst [vmem:[#allocation71_spill] sm:$0xff] %v7299_v5  ;;  %8662 = vst [vmem:[#allocation75_spill] sm:$0xff] %v7329_v48  ;;  %v2455_v24 = vsub.f32 %v6902_v36, %v7143_v47  ;;  %v7394_v36 = vsel %vm8508_vm13, %v7141_v1, %v7139_v34  ;;  %v8695_v48 = vld [vmem:[#allocation50_spill] sm:$0xff] }
 0x3df   : > { %v7236_v35 = vpop.permute.xlu1 %4126  ;;  %8674 = vst [vmem:[#allocation87_spill] sm:$0xff] %v7394_v36 }
 0x3e0   : > { %8651 = vst [vmem:[#allocation64_spill] sm:$0xff] %v7236_v35  ;;  %v7259_v35 = vsel %vm460_vm1, %v6884_v2, %v6890_v46 }
 0x3e3   : > { %v7240_v40 = vpop.permute.xlu1 %4188 }
 0x3e4   : > { %8652 = vst [vmem:[#allocation65_spill] sm:$0xff] %v7240_v40  ;;  %v7264_v40 = vsel %vm460_vm1, %v6890_v46, %v6888_v52  ;;  %v7284_v46 = vsel %vm529_vm2, %v6904_v55, %v6922_v61  ;;  %v7289_v52 = vsel %vm598_vm3, %v6924_v58, %v6928_v8  ;;  %v7304_v55 = vsel %vm529_vm2, %v6922_v61, %v6930_v38 }
 0x3e5   : > { %8656 = vst [vmem:[#allocation69_spill] sm:$0xff] %v7284_v46  ;;  %8657 = vst [vmem:[#allocation70_spill] sm:$0xff] %v7289_v52  ;;  %v7309_v46 = vsel %vm667_vm4, %v6944_v53, %v6942_v14  ;;  %v7314_v52 = vsel %vm667_vm4, %v6942_v14, %v6954_v29  ;;  %v7319_v58 = vsel %vm627_vm5, %v6952_v23, %v6967_v33 }
 0x3e6   : > { %8659 = vst [vmem:[#allocation72_spill] sm:$0xff] %v7304_v55  ;;  %8660 = vst [vmem:[#allocation73_spill] sm:$0xff] %v7314_v52  ;;  %v7324_v61 = vsel %vm627_vm5, %v6967_v33, %v6965_v39  ;;  %v7334_v14 = vsel %vm667_vm4, %v6954_v29, %v6980_v50  ;;  %v7339_v52 = vsel %vm8504_vm10, %v7088_v43, %v7086_v28 }
 0x3e7   : > { %v7249_v25 = vpop.permute.xlu1 %4192  ;;  %8661 = vst [vmem:[#allocation74_spill] sm:$0xff] %v7324_v61  ;;  %8663 = vst [vmem:[#allocation76_spill] sm:$0xff] %v7334_v14  ;;  %v2453_v33 = vsub.f32 %v6896_v20, %v7143_v47  ;;  %v2456_v61 = vsub.f32 %v6910_v60, %v7143_v47  ;;  %v7348_v39 = vsel %vm8504_vm10, %v7086_v28, %v7101_v7  ;;  %v7365_v60 = vpop.permute.xlu0 %4060 }
 0x3e8   : > { %8653 = vst [vmem:[#allocation66_spill] sm:$0xff] %v7249_v25  ;;  %8664 = vst [vmem:[#allocation77_spill] sm:$0xff] %v7339_v52  ;;  %v7353_v29 = vsel %vm8504_vm10, %v7101_v7, %v7120_v26  ;;  %v7358_v14 = vsel %vm8505_vm12, %v7125_v22, %v7123_v11  ;;  %v7363_v20 = vsel %vm8505_vm12, %v7123_v11, %v7129_v37 }
 0x3e9   : > { %8665 = vst [vmem:[#allocation78_spill] sm:$0xff] %v7348_v39  ;;  %8666 = vst [vmem:[#allocation79_spill] sm:$0xff] %v7353_v29  ;;  %v2454_v28 = vsub.f32 %v6898_v6, %v7143_v47  ;;  %v7374_v29 = vsel %vm8505_vm12, %v7129_v37, %v7127_v13  ;;  %v7379_v11 = vsel %vm8506_vm14, %v7133_v0, %v7131_v31  ;;  %v8681_v13 = vld [vmem:[#allocation39_spill] sm:$0xff] }
 0x3ea   : > { %8667 = vst [vmem:[#allocation80_spill] sm:$0xff] %v7358_v14  ;;  %8668 = vst [vmem:[#allocation81_spill] sm:$0xff] %v7363_v20  ;;  %v7384_v20 = vsel %vm8506_vm14, %v7131_v31, %v7137_v45  ;;  %v7389_v6 = vsel %vm8508_vm13, %v7135_v41, %v7141_v1  ;;  %v3470_v47 = vsel %vm8508_vm13, %v7139_v34, %v7147_v49  ;;  %v8705_v14 = vld [vmem:[#allocation56_spill] sm:$0xff] }
 0x3eb   : > { %8669 = vst [vmem:[#allocation82_spill] sm:$0xff] %v7365_v60  ;;  %8670 = vst [vmem:[#allocation83_spill] sm:$0xff] %v7374_v29  ;;  %v7402_v31 = vsel %vm8506_vm14, %v7137_v45, %v7149_v56  ;;  %v7412_v1 = vsel %vm8507_vm9, %v7151_v62, %v7157_v51  ;;  %v7417_v34 = vsel %vm1032_vm15, %v7155_v15, %v7161_v63  ;;  %v8693_v29 = vld [vmem:[#allocation48_spill] sm:$0xff]  ;;  %vm8714_vm14 = vcmask 588800   ;;  %v8719_v43 = vld [vmem:[#allocation65_spill] sm:$0xff] }
 0x3ec   : > { %8671 = vst [vmem:[#allocation84_spill] sm:$0xff] %v7379_v11  ;;  %8672 = vst [vmem:[#allocation85_spill] sm:$0xff] %v7384_v20  ;;  %v3602_v45 = vsel %vm1032_vm15, %v7159_v42, %v7166_v16  ;;  %v8688_v16 = vld [vmem:[#allocation43_spill] sm:$0xff]  ;;  %v4064_v52 = vsel %vm558_vm6, %v7238_v57, %v7365_v60 }
 0x3ed   : > { %8673 = vst [vmem:[#allocation86_spill] sm:$0xff] %v7389_v6  ;;  %8676 = vst [vmem:[#allocation89_spill] sm:$0xff] %v7412_v1  ;;  %v8682_v1 = vld [vmem:[#allocation40_spill] sm:$0xff]  ;;  %v8692_v11 = vld [vmem:[#allocation47_spill] sm:$0xff] }
 0x3ee   : > { %8677 = vst [vmem:[#allocation90_spill] sm:$0xff] %v7417_v34  ;;  %v7435_v34 = vsel %vm391_vm0, %v8682_v1, %v8681_v13  ;;  %v7465_v39 = vsel %vm529_vm2, %v8693_v29, %v8692_v11  ;;  %v8703_v1 = vld [vmem:[#allocation54_spill] sm:$0xff] }
 0x422   : > { %v2461_v55 = vpop.permute.xlu1 %2460 }
 0x423   : > { %v2463_v7 = vmul.f32 %v2461_v55, %v2453_v33  ;;  %v2466_v26 = vmul.f32 %v2461_v55, %v2456_v61  ;;  %v2464_v37 = vmul.f32 %v2461_v55, %v2454_v28  ;;  %v2465_v61 = vmul.f32 %v2461_v55, %v2455_v24  ;;  %v8679_v55 = vld [vmem:[#allocation10_spill] sm:$0xff] }
 0x424   : > { %v7407_v33 = vsel %vm8507_vm9, %v7153_v18, %v7151_v62  ;;  %v7422_v24 = vsel %vm1032_vm15, %v7161_v63, %v7159_v42  ;;  %v8680_v62 = vld [vmem:[#allocation38_spill] sm:$0xff]  ;;  %8683 = vst [vmem:[#allocation10_spill] sm:$0xff] %v7435_v34  ;;  %v8687_v42 = vld [vmem:[#allocation41_spill] sm:$0xff] }
 0x425   : > { %8675 = vst [vmem:[#allocation88_spill] sm:$0xff] %v7407_v33  ;;  %8678 = vst [vmem:[#allocation91_spill] sm:$0xff] %v7422_v24  ;;  %v2472_v28 = vadd.f32 %v8679_v55, %v2463_v7  ;;  %v2475_v49 = vadd.f32 %v8679_v55, %v2466_v26  ;;  %v3536_v56 = vsel %vm8507_vm9, %v7157_v51, %v8680_v62  ;;  %v8684_v33 = vld [vmem:[#allocation42_spill] sm:$0xff]  ;;  %v8686_v24 = vld [vmem:[#allocation44_spill] sm:$0xff]  ;;  %v7447_v26 = vpop.permute.xlu0 %4186 }
 0x426   : > { %v7440_v63 = vsel %vm391_vm0, %v8681_v13, %v8684_v33  ;;  %v7445_v7 = vsel %vm460_vm1, %v8687_v42, %v8686_v24  ;;  %v7452_v51 = vsel %vm460_vm1, %v8686_v24, %v8688_v16  ;;  %v8690_v62 = vld [vmem:[#allocation45_spill] sm:$0xff]  ;;  %v2473_v6 = vadd.f32 %v8679_v55, %v2464_v37  ;;  %8694 = vst [vmem:[#allocation44_spill] sm:$0xff] %v7465_v39  ;;  %vm8716_vm9 = vmmov %vm8714_vm14 }
 0x427   : > { %8685 = vst [vmem:[#allocation39_spill] sm:$0xff] %v7440_v63  ;;  %8689 = vst [vmem:[#allocation42_spill] sm:$0xff] %v7452_v51  ;;  %v3734_v36 = vsel %vm460_vm1, %v8688_v16, %v8690_v62  ;;  %v2474_v13 = vadd.f32 %v8679_v55, %v2465_v61  ;;  %v8691_v63 = vld [vmem:[#allocation46_spill] sm:$0xff]  ;;  %v7470_v24 = vsel %vm529_vm2, %v8692_v11, %v8695_v48  ;;  %v8697_v51 = vld [vmem:[#allocation52_spill] sm:$0xff]  ;;  %v2480_v39 = vmul.f32 0.01, %v2472_v28 }
 0x428   : > { %v3668_v20 = vsel %vm391_vm0, %v8684_v33, %v8691_v63  ;;  %8696 = vst [vmem:[#allocation43_spill] sm:$0xff] %v7470_v24  ;;  %v8698_v16 = vld [vmem:[#allocation49_spill] sm:$0xff]  ;;  %v8700_v61 = vld [vmem:[#allocation51_spill] sm:$0xff]  ;;  %v2483_v42 = vmul.f32 0.01, %v2475_v49  ;;  %v3800_v11 = vsel %vm529_vm2, %v8695_v48, %v8703_v1  ;;  %vm2476_vm11 = vcmp.ge.f32.partialorder %v2472_v28, 0.0  ;;  %vm8718_vm13 = vmmov %vm8716_vm9 }
 0x429   : > { %v7475_v37 = vsel %vm598_vm3, %v8698_v16, %v8697_v51  ;;  %v7480_v55 = vsel %vm598_vm3, %v8697_v51, %v8700_v61  ;;  %v8702_v33 = vld [vmem:[#allocation53_spill] sm:$0xff]  ;;  %v8704_v24 = vld [vmem:[#allocation55_spill] sm:$0xff]  ;;  %vm2479_vm7 = vcmp.ge.f32.partialorder %v2475_v49, 0.0  ;;  %v2482_v22 = vmul.f32 0.01, %v2474_v13  ;;  %v8709_v48 = vld [vmem:[#allocation58_spill] sm:$0xff] }
 0x42a   : > { %8699 = vst [vmem:[#allocation45_spill] sm:$0xff] %v7475_v37  ;;  %8701 = vst [vmem:[#allocation46_spill] sm:$0xff] %v7480_v55  ;;  %v3866_v29 = vsel %vm598_vm3, %v8700_v61, %v8702_v33  ;;  %v7491_v16 = vsel %vm667_vm4, %v8705_v14, %v8704_v24  ;;  %v8707_v51 = vld [vmem:[#allocation57_spill] sm:$0xff]  ;;  %v3998_v61 = vsel %vm627_vm5, %v7217_v12, %v7224_v54  ;;  %v2481_v37 = vmul.f32 0.01, %v2473_v6  ;;  %v4191_v14 = vpop.permute.xlu0 %4190  ;;  %v8713_v12 = vld [vmem:[#allocation62_spill] sm:$0xff] }
 0x42b   : > { %8706 = vst [vmem:[#allocation47_spill] sm:$0xff] %v7491_v16  ;;  %v7496_v55 = vsel %vm627_vm5, %v8707_v51, %v7215_v19  ;;  %v3932_v5 = vsel %vm667_vm4, %v8709_v48, %v7230_v32  ;;  %v8710_v34 = vld [vmem:[#allocation61_spill] sm:$0xff]  ;;  %vm2477_vm10 = vcmp.ge.f32.partialorder %v2473_v6, 0.0  ;;  %vm2478_vm12 = vcmp.ge.f32.partialorder %v2474_v13, 0.0  ;;  %v8715_v16 = vld [vmem:[#allocation63_spill] sm:$0xff] }
 0x42c   : > { %8708 = vst [vmem:[#allocation50_spill] sm:$0xff] %v7496_v55  ;;  %v7507_v24 = vsel %vm558_vm6, %v7234_v27, %v8710_v34  ;;  %v7512_v19 = vsel %vm558_vm6, %v8710_v34, %v7238_v57  ;;  %v7517_v55 = vsel %vm8714_vm14, %v8713_v12, %v7247_v17  ;;  %v7519_v51 = vsel %vm2476_vm11, %v2472_v28, %v2480_v39  ;;  %v8717_v34 = vld [vmem:[#allocation64_spill] sm:$0xff] }
 0x42d   : > { %8711 = vst [vmem:[#allocation52_spill] sm:$0xff] %v7507_v24  ;;  %8712 = vst [vmem:[#allocation51_spill] sm:$0xff] %v7512_v19  ;;  %v7521_v48 = vsel %vm2479_vm7, %v2475_v49, %v2483_v42  ;;  %v7526_v24 = vsel %vm8716_vm9, %v7247_v17, %v8715_v16  ;;  %v4130_v19 = vsel %vm8718_vm13, %v8715_v16, %v8717_v34  ;;  %vm8800_vm13 = vcmask 973824  }
 0x42e   : > { %v7537_v39 = vsel %vm420_vm8, %v7447_v26, %v8719_v43  ;;  %v7541_v49 = vsel %vm420_vm8, %v8719_v43, %v4191_v14  ;;  %v7545_v17 = vsel %vm420_vm8, %v4191_v14, %v7249_v25  ;;  %v7547_v28 = vsel %vm2477_vm10, %v2473_v6, %v2481_v37  ;;  %v8742_v25 = vld [vmem:[#allocation80_spill] sm:$0xff]  ;;  %vm8790_vm10 = vmmov %vm8716_vm9 }
 0x42f   : > { %v7549_v57 = vsel %vm2478_vm12, %v2474_v13, %v2482_v22  ;;  %v2523_v42 = vmul.f32 %v7245_v21, %v7519_v51  ;;  %v2589_v16 = vmul.f32 %v7259_v35, %v7519_v51  ;;  %v7557_v34 = vmul.f32 %v7135_v41, %v7519_v51  ;;  %vm8795_vm12 = vmmov %vm8716_vm9 }
 0x430   : > { %v7560_v43 = vmul.f32 %v3470_v47, %v7521_v48  ;;  %v7564_v14 = vmul.f32 %v7153_v18, %v7519_v51  ;;  %v7567_v22 = vmul.f32 %v3536_v56, %v7521_v48  ;;  %v7571_v21 = vmul.f32 %v7155_v15, %v7519_v51  ;;  %vm8802_vm14 = vmmov %vm8800_vm13 }
 0x431   : > { %v7574_v35 = vmul.f32 %v3602_v45, %v7521_v48  ;;  %v7577_v41 = vmul.f32 %v3734_v36, %v7521_v48  ;;  %v7581_v6 = vmul.f32 %v8690_v62, %v7519_v51  ;;  %v7584_v18 = vmul.f32 %v3800_v11, %v7521_v48  ;;  %vm8807_vm7 = vmmov %vm8800_vm13 }
 0x432   : > { %v7588_v56 = vmul.f32 %v8703_v1, %v7519_v51  ;;  %v7591_v15 = vmul.f32 %v3866_v29, %v7521_v48  ;;  %v7595_v47 = vmul.f32 %v8702_v33, %v7519_v51  ;;  %v7598_v36 = vmul.f32 %v3932_v5, %v7521_v48 }
 0x433   : > { %8720 = vst [vmem:[#allocation53_spill] sm:$0xff] %v7577_v41  ;;  %8721 = vst [vmem:[#allocation54_spill] sm:$0xff] %v7581_v6  ;;  %v7602_v45 = vmul.f32 %v7230_v32, %v7519_v51  ;;  %v7605_v62 = vmul.f32 %v3998_v61, %v7521_v48  ;;  %v7609_v1 = vmul.f32 %v7224_v54, %v7519_v51  ;;  %vm8812_vm11 = vcmask 990208  }
 0x434   : > { %8722 = vst [vmem:[#allocation55_spill] sm:$0xff] %v7584_v18  ;;  %8723 = vst [vmem:[#allocation58_spill] sm:$0xff] %v7588_v56  ;;  %v7613_v29 = vmul.f32 %v7234_v27, %v7519_v51  ;;  %v7616_v13 = vmul.f32 %v4064_v52, %v7521_v48  ;;  %v7619_v5 = vmul.f32 %v3668_v20, %v7521_v48 }
 0x435   : > { %8724 = vst [vmem:[#allocation61_spill] sm:$0xff] %v7591_v15  ;;  %8725 = vst [vmem:[#allocation62_spill] sm:$0xff] %v7595_v47  ;;  %v7623_v32 = vmul.f32 %v8691_v63, %v7519_v51  ;;  %v7627_v37 = vmul.f32 %v8713_v12, %v7519_v51  ;;  %v7630_v54 = vmul.f32 %v4130_v19, %v7521_v48  ;;  %v8778_v47 = vld [vmem:[#allocation52_spill] sm:$0xff] }
 0x436   : > { %8726 = vst [vmem:[#allocation63_spill] sm:$0xff] %v7598_v36  ;;  %8727 = vst [vmem:[#allocation65_spill] sm:$0xff] %v7602_v45  ;;  %v2588_v27 = vmul.f32 %v6884_v2, %v7521_v48  ;;  %v7636_v52 = vmul.f32 %v7133_v0, %v7519_v51  ;;  %v7640_v20 = vmul.f32 %v7402_v31, %v7521_v48  ;;  %v8734_v0 = vld [vmem:[#allocation67_spill] sm:$0xff] }
 0x437   : > { %8728 = vst [vmem:[#allocation92_spill] sm:$0xff] %v7605_v62  ;;  %8729 = vst [vmem:[#allocation93_spill] sm:$0xff] %v7609_v1  ;;  %v2590_v63 = vmul.f32 %v7264_v40, %v7547_v28  ;;  %v2524_v31 = vmul.f32 %v8734_v0, %v7547_v28  ;;  %v2591_v19 = vmul.f32 %v7269_v10, %v7549_v57  ;;  %v8735_v40 = vld [vmem:[#allocation11_spill] sm:$0xff]  ;;  %v8736_v0 = vld [vmem:[#allocation68_spill] sm:$0xff] }
 0x438   : > { %8730 = vst [vmem:[#allocation94_spill] sm:$0xff] %v7613_v29  ;;  %8731 = vst [vmem:[#allocation95_spill] sm:$0xff] %v7616_v13  ;;  %v2522_v12 = vmul.f32 %v8735_v40, %v7521_v48  ;;  %v2526_v33 = vmul.f32 %v6894_v30, %v7521_v48  ;;  %v2525_v2 = vmul.f32 %v8736_v0, %v7549_v57  ;;  %v8741_v0 = vld [vmem:[#allocation33_spill] sm:$0xff] }
 0x439   : > { %8732 = vst [vmem:[#allocation96_spill] sm:$0xff] %v7627_v37  ;;  %8733 = vst [vmem:[#allocation97_spill] sm:$0xff] %v7630_v54  ;;  %v5025_v61 = vpack.i.bf16 %v2590_v63, %v2589_v16  ;;  %v7668_v63 = vmul.f32 %v7279_v44, %v7519_v51  ;;  %v2592_v44 = vmul.f32 %v6892_v9, %v7521_v48  ;;  %v8743_v37 = vld [vmem:[#allocation40_spill] sm:$0xff]  ;;  %v8753_v1 = vld [vmem:[#allocation57_spill] sm:$0xff] }
 0x43a   : > { %v5020_v11 = vpack.i.bf16 %v2524_v31, %v2523_v42  ;;  %v5035_v16 = vpack.i.bf16 %v2591_v19, %v2588_v27  ;;  %v3741_v10 = vmul.f32 %v7445_v7, %v7547_v28  ;;  %v7693_v40 = vmul.f32 %v6930_v38, %v7521_v48  ;;  %v8739_v31 = vld [vmem:[#allocation10_spill] sm:$0xff] }
 0x43b   : > { %5026 = vrot.lane.b32.xlu1 %v5025_v61, %s8612_s28  ;;  %v7685_v61 = vmul.f32 %v6912_v3, %v7521_v48  ;;  %v2720_v30 = vmul.f32 %v6920_v4, %v7521_v48  ;;  %v2721_v9 = vmul.f32 %v7294_v59, %v7519_v51  ;;  %v7701_v3 = vmul.f32 %v6928_v8, %v7521_v48  ;;  %v8738_v59 = vld [vmem:[#allocation77_spill] sm:$0xff] }
 0x43c   : > { %v7705_v42 = vmul.f32 %v6944_v53, %v7521_v48  ;;  %v7709_v7 = vmul.f32 %v7309_v46, %v7519_v51  ;;  %v7713_v38 = vmul.f32 %v6980_v50, %v7521_v48  ;;  %5021 = vrot.lane.b32.xlu0 %v5020_v11, %s8615_s19  ;;  %v7719_v4 = vmul.f32 %v6952_v23, %v7521_v48  ;;  %v8737_v53 = vld [vmem:[#allocation27_spill] sm:$0xff] }
 0x43d   : > { %v7723_v8 = vmul.f32 %v7319_v58, %v7519_v51  ;;  %v7727_v46 = vmul.f32 %v8737_v53, %v7521_v48  ;;  %v7731_v50 = vmul.f32 %v8738_v59, %v7519_v51  ;;  %v5030_v27 = vpack.i.bf16 %v2525_v2, %v2522_v12  ;;  %v8740_v23 = vld [vmem:[#allocation71_spill] sm:$0xff]  ;;  %v8744_v2 = vld [vmem:[#allocation41_spill] sm:$0xff] }
 0x43e   : > { %v5045_v11 = vpack.i.bf16 %v3741_v10, %v2592_v44  ;;  %v3675_v19 = vmul.f32 %v8739_v31, %v7547_v28  ;;  %v7739_v58 = vmul.f32 %v8741_v0, %v7521_v48  ;;  %v7743_v53 = vmul.f32 %v8742_v25, %v7519_v51  ;;  %v8745_v44 = vld [vmem:[#allocation69_spill] sm:$0xff]  ;;  %v8746_v31 = vld [vmem:[#allocation70_spill] sm:$0xff]  ;;  %v8747_v25 = vld [vmem:[#allocation47_spill] sm:$0xff] }
 0x43f   : > { %5036 = vrot.lane.b32.xlu1 %v5035_v16, %s8612_s28  ;;  %v2722_v16 = vmul.f32 %v8740_v23, %v7547_v28  ;;  %v7747_v59 = vmul.f32 %v8743_v37, %v7519_v51  ;;  %v7751_v12 = vmul.f32 %v8744_v2, %v7519_v51  ;;  %v2656_v10 = vmul.f32 %v8745_v44, %v7547_v28  ;;  %v8748_v37 = vld [vmem:[#allocation48_spill] sm:$0xff]  ;;  %v8749_v2 = vld [vmem:[#allocation49_spill] sm:$0xff] }
 0x440   : > { %5031 = vrot.lane.b32.xlu0 %v5030_v27, %s8615_s19  ;;  %v2723_v23 = vmul.f32 %v8746_v31, %v7549_v57  ;;  %v7761_v0 = vmul.f32 %v8747_v25, %v7547_v28  ;;  %v7765_v54 = vmul.f32 %v8748_v37, %v7519_v51  ;;  %v7769_v60 = vmul.f32 %v8749_v2, %v7519_v51  ;;  %v8750_v27 = vld [vmem:[#allocation56_spill] sm:$0xff]  ;;  %v8752_v25 = vld [vmem:[#allocation45_spill] sm:$0xff] }
 0x441   : > { %v8751_v44 = vld [vmem:[#allocation72_spill] sm:$0xff]  ;;  %v5040_v31 = vpack.i.bf16 %v3675_v19, %v2526_v33  ;;  %v5055_v13 = vpack.i.bf16 %v2722_v16, %v2721_v9  ;;  %v3873_v62 = vmul.f32 %v8752_v25, %v7547_v28  ;;  %v7783_v36 = vmul.f32 %v8753_v1, %v7519_v51  ;;  %v8755_v33 = vld [vmem:[#allocation74_spill] sm:$0xff] }
 0x442   : > { %v2657_v29 = vmul.f32 %v8751_v44, %v7549_v57  ;;  %v7787_v2 = vmul.f32 %v7447_v26, %v7519_v51  ;;  %v2854_v9 = vmul.f32 %v8755_v33, %v7547_v28  ;;  %v7795_v19 = vmul.f32 %v7545_v17, %v7521_v48  ;;  %v8756_v44 = vld [vmem:[#allocation73_spill] sm:$0xff]  ;;  %v8758_v33 = vld [vmem:[#allocation78_spill] sm:$0xff] }
 0x443   : > { %5046 = vrot.lane.b32.xlu1 %v5045_v11, %s8612_s28  ;;  %v7773_v11 = vmul.f32 %v8750_v27, %v7519_v51  ;;  %v8754_v27 = vld [vmem:[#allocation44_spill] sm:$0xff]  ;;  %v5050_v1 = vpack.i.bf16 %v2656_v10, %v7668_v63  ;;  %v5065_v16 = vpack.i.bf16 %v2723_v23, %v2720_v30  ;;  %v2788_v25 = vmul.f32 %v8756_v44, %v7547_v28  ;;  %v8760_v63 = vld [vmem:[#allocation83_spill] sm:$0xff] }
 0x444   : > { %v3807_v45 = vmul.f32 %v8754_v27, %v7547_v28  ;;  %5041 = vrot.lane.b32.xlu0 %v5040_v31, %s8615_s19  ;;  %v5060_v26 = vpack.i.bf16 %v2657_v29, %v7685_v61  ;;  %v8757_v27 = vld [vmem:[#allocation75_spill] sm:$0xff]  ;;  %v7807_v15 = vmul.f32 %v8758_v33, %v7547_v28  ;;  %v5075_v17 = vpack.i.bf16 %v3873_v62, %v7701_v3  ;;  %v8761_v29 = vld [vmem:[#allocation81_spill] sm:$0xff]  ;;  %v8762_v62 = vld [vmem:[#allocation84_spill] sm:$0xff] }
 0x445   : > { %v2855_v37 = vmul.f32 %v8757_v27, %v7549_v57  ;;  %v8759_v31 = vld [vmem:[#allocation79_spill] sm:$0xff]  ;;  %v7816_v30 = vmul.f32 %v8760_v63, %v7549_v57  ;;  %v7820_v61 = vmul.f32 %v8761_v29, %v7547_v28  ;;  %v5085_v23 = vpack.i.bf16 %v2854_v9, %v7723_v8  ;;  %v8764_v9 = vld [vmem:[#allocation86_spill] sm:$0xff]  ;;  %v8766_v63 = vld [vmem:[#allocation88_spill] sm:$0xff] }
 0x446   : > { %v5070_v10 = vpack.i.bf16 %v3807_v45, %v7693_v40  ;;  %v7828_v3 = vmul.f32 %v8762_v62, %v7547_v28  ;;  %v8763_v40 = vld [vmem:[#allocation85_spill] sm:$0xff]  ;;  %v7852_v29 = vmul.f32 %v8766_v63, %v7547_v28  ;;  %v8768_v45 = vld [vmem:[#allocation90_spill] sm:$0xff]  ;;  %v8769_v27 = vld [vmem:[#allocation91_spill] sm:$0xff]  ;;  %v7908_v6 = vmul.f32 %v8778_v47, %v7547_v28 }
 0x447   : > { %5056 = vrot.lane.b32.xlu1 %v5055_v13, %s5335_s12  ;;  %v7812_v13 = vmul.f32 %v8759_v31, %v7549_v57  ;;  %v7840_v8 = vmul.f32 %v8763_v40, %v7549_v57  ;;  %v7844_v31 = vmul.f32 %v8764_v9, %v7547_v28  ;;  %v8767_v62 = vld [vmem:[#allocation89_spill] sm:$0xff]  ;;  %v7860_v40 = vmul.f32 %v8768_v45, %v7547_v28  ;;  %v8770_v44 = vld [vmem:[#allocation39_spill] sm:$0xff]  ;;  %v8774_v63 = vld [vmem:[#allocation46_spill] sm:$0xff] }
 0x448   : > { %5051 = vrot.lane.b32.xlu0 %v5050_v1, %s8611_s21  ;;  %v8765_v1 = vld [vmem:[#allocation87_spill] sm:$0xff]  ;;  %v7856_v33 = vmul.f32 %v8767_v62, %v7549_v57  ;;  %v7864_v9 = vmul.f32 %v8769_v27, %v7549_v57  ;;  %v8771_v62 = vld [vmem:[#allocation42_spill] sm:$0xff]  ;;  %8779 = vst [vmem:[#allocation68_spill] sm:$0xff] %v7908_v6  ;;  %v7928_v47 = vmul.f32 %v7537_v39, %v7547_v28  ;;  %v8785_v39 = vld [vmem:[#allocation76_spill] sm:$0xff] }
 0x449   : > { %v7876_v18 = vmul.f32 %v8771_v62, %v7549_v57  ;;  %v8773_v45 = vld [vmem:[#allocation43_spill] sm:$0xff]  ;;  %v8786_v6 = vld [vmem:[#allocation50_spill] sm:$0xff] }
 0x44a   : > { %v7880_v56 = vmul.f32 %v8773_v45, %v7549_v57  ;;  %v8780_v62 = vld [vmem:[#allocation51_spill] sm:$0xff]  ;;  %v7938_v45 = vmul.f32 %v7541_v49, %v7549_v57  ;;  %v4005_v49 = vmul.f32 %v8786_v6, %v7547_v28 }
 0x44b   : > { %5066 = vrot.lane.b32.xlu1 %v5065_v16, %s5335_s12  ;;  %v7848_v16 = vmul.f32 %v8765_v1, %v7549_v57  ;;  %v7868_v1 = vmul.f32 %v8770_v44, %v7549_v57  ;;  %8772 = vst [vmem:[#allocation67_spill] sm:$0xff] %v7876_v18  ;;  %v8777_v44 = vld [vmem:[#allocation60_spill] sm:$0xff]  ;;  %v7912_v18 = vmul.f32 %v8780_v62, %v7549_v57 }
 0x44c   : > { %5061 = vrot.lane.b32.xlu0 %v5060_v26, %s8611_s21  ;;  %v7896_v26 = vmul.f32 %v8774_v63, %v7549_v57  ;;  %v7904_v27 = vmul.f32 %v8777_v44, %v7549_v57  ;;  %v7916_v63 = vmul.f32 %v7517_v55, %v7547_v28  ;;  %v7924_v44 = vmul.f32 %v7526_v24, %v7549_v57  ;;  %v8784_v24 = vld [vmem:[#allocation8_spill] sm:$0xff] }
 0x44d   : > { %8781 = vst [vmem:[#allocation27_spill] sm:$0xff] %v7912_v18  ;;  %8783 = vst [vmem:[#allocation10_spill] sm:$0xff] %v7938_v45  ;;  %v5080_v55 = vpack.i.bf16 %v2788_v25, %v7709_v7  ;;  %v5095_v62 = vpack.i.bf16 %v2855_v37, %v7719_v4  ;;  %v8791_v18 = vld [vmem:[#allocation12_spill] sm:$0xff] }
 0x44e   : > { %8782 = vst [vmem:[#allocation77_spill] sm:$0xff] %v7916_v63  ;;  %v8789_v63 = vld [vmem:[#allocation16_spill] sm:$0xff] }
 0x44f   : > { %5076 = vrot.lane.b32.xlu1 %v5075_v17, %s5335_s12  ;;  %v8775_v17 = vld [vmem:[#allocation59_spill] sm:$0xff] }
 0x450   : > { %v7900_v41 = vmul.f32 %v8775_v17, %v7549_v57  ;;  %5071 = vrot.lane.b32.xlu0 %v5070_v10, %s8611_s21  ;;  %v2856_v17 = vmul.f32 %v8784_v24, %v7521_v48  ;;  %v8787_v24 = vld [vmem:[#allocation18_spill] sm:$0xff] }
 0x451   : > { %v2977_v7 = vsel %vm8790_vm10, %v8787_v24, %v8789_v63 }
 0x452   : > { %8776 = vst [vmem:[#allocation11_spill] sm:$0xff] %v7900_v41  ;;  %v2789_v41 = vmul.f32 %v8785_v39, %v7549_v57  ;;  %v8788_v39 = vld [vmem:[#allocation13_spill] sm:$0xff]  ;;  %v5105_v6 = vpack.i.bf16 %v4005_v49, %v2856_v17  ;;  %v2986_v25 = vmul.f32 %v2977_v7, %v7547_v28 }
 0x453   : > { %5086 = vrot.lane.b32.xlu1 %v5085_v23, %s5333_s26  ;;  %v2976_v10 = vsel %vm8716_vm9, %v8788_v39, %v8787_v24  ;;  %v8792_v23 = vld [vmem:[#allocation9_spill] sm:$0xff]  ;;  %vm8814_vm9 = vmmov %vm8812_vm11 }
 0x454   : > { %5081 = vrot.lane.b32.xlu0 %v5080_v55, %s5334_s11  ;;  %v2985_v4 = vmul.f32 %v2976_v10, %v7519_v51  ;;  %v5090_v37 = vpack.i.bf16 %v2789_v41, %v7705_v42  ;;  %v2910_v55 = vsel %vm558_vm6, %v8792_v23, %v8791_v18  ;;  %v8794_v24 = vld [vmem:[#allocation17_spill] sm:$0xff]  ;;  %v2984_v42 = vmul.f32 %v8788_v39, %v7521_v48  ;;  %vm8816_vm10 = vmmov %vm8814_vm9 }
 0x455   : > { %v2978_v10 = vsel %vm8795_vm12, %v8789_v63, %v8794_v24  ;;  %v2919_v41 = vmul.f32 %v2910_v55, %v7519_v51  ;;  %v8801_v55 = vld [vmem:[#allocation24_spill] sm:$0xff] }
 0x456   : > { %v5115_v17 = vpack.i.bf16 %v2986_v25, %v2985_v4  ;;  %v2987_v7 = vmul.f32 %v2978_v10, %v7549_v57  ;;  %v8798_v25 = vld [vmem:[#allocation22_spill] sm:$0xff] }
 0x457   : > { %5096 = vrot.lane.b32.xlu1 %v5095_v62, %s5333_s26  ;;  %v8793_v62 = vld [vmem:[#allocation19_spill] sm:$0xff]  ;;  %v3109_v10 = vsel %vm8802_vm14, %v8798_v25, %v8801_v55  ;;  %vm8860_vm14 = vmmov %vm8795_vm12 }
 0x458   : > { %5091 = vrot.lane.b32.xlu0 %v5090_v37, %s5334_s11  ;;  %v2911_v45 = vsel %vm558_vm6, %v8791_v18, %v8793_v62  ;;  %v8796_v37 = vpack.i.bf16 %v7761_v0, %v7713_v38  ;;  %v8797_v18 = vld [vmem:[#allocation14_spill] sm:$0xff]  ;;  %v5125_v4 = vpack.i.bf16 %v2987_v7, %v2984_v42  ;;  %v8799_v38 = vld [vmem:[#allocation21_spill] sm:$0xff]  ;;  %v3118_v42 = vmul.f32 %v3109_v10, %v7547_v28 }
 0x459   : > { %v2920_v49 = vmul.f32 %v2911_v45, %v7547_v28  ;;  %v2912_v63 = vsel %vm558_vm6, %v8793_v62, %v8797_v18  ;;  %v3108_v0 = vsel %vm8800_vm13, %v8799_v38, %v8798_v25  ;;  %v2988_v62 = vmul.f32 %v8794_v24, %v7521_v48  ;;  %vm8855_vm13 = vmmov %vm8795_vm12 }
 0x45a   : > { %v2921_v45 = vmul.f32 %v2912_v63, %v7549_v57 }
 0x45b   : > { %5106 = vrot.lane.b32.xlu1 %v5105_v6, %s5333_s26  ;;  %v2918_v6 = vmul.f32 %v8792_v23, %v7521_v48  ;;  %v5110_v39 = vpack.i.bf16 %v2920_v49, %v2919_v41  ;;  %v3117_v23 = vmul.f32 %v3108_v0, %v7519_v51  ;;  %v8804_v49 = vld [vmem:[#allocation15_spill] sm:$0xff] }
 0x45c   : > { %5101 = vrot.lane.b32.xlu0 %v8796_v37, %s5334_s11  ;;  %v8805_v37 = vld [vmem:[#allocation25_spill] sm:$0xff] }
 0x45d   : > { %v5120_v41 = vpack.i.bf16 %v2921_v45, %v2918_v6  ;;  %v2922_v6 = vmul.f32 %v8797_v18, %v7521_v48  ;;  %v3116_v45 = vmul.f32 %v8799_v38, %v7521_v48  ;;  %v5135_v25 = vpack.i.bf16 %v3118_v42, %v3117_v23  ;;  %v8810_v23 = vld [vmem:[#allocation30_spill] sm:$0xff]  ;;  %v8811_v42 = vld [vmem:[#allocation28_spill] sm:$0xff] }
 0x45e   : > { %v3050_v18 = vmul.f32 %v8804_v49, %v7521_v48 }
 0x45f   : > { %5116 = vrot.lane.b32.xlu1 %v5115_v17, %s5331_s20  ;;  %v8803_v17 = vld [vmem:[#allocation20_spill] sm:$0xff] }
 0x460   : > { %5111 = vrot.lane.b32.xlu0 %v5110_v39, %s5332_s25  ;;  %v3042_v7 = vsel %vm420_vm8, %v8804_v49, %v8803_v17  ;;  %v3043_v63 = vsel %vm420_vm8, %v8803_v17, %v8805_v37  ;;  %v8806_v39 = vld [vmem:[#allocation23_spill] sm:$0xff] }
 0x461   : > { %v3110_v24 = vsel %vm8807_vm7, %v8801_v55, %v8806_v39  ;;  %v3052_v0 = vmul.f32 %v3043_v63, %v7547_v28  ;;  %v8813_v63 = vld [vmem:[#allocation29_spill] sm:$0xff]  ;;  %vm8861_vm7 = vmmov %vm8795_vm12 }
 0x462   : > { %v3119_v10 = vmul.f32 %v3110_v24, %v7549_v57  ;;  %v3241_v24 = vsel %vm8814_vm9, %v8810_v23, %v8813_v63 }
 0x463   : > { %5126 = vrot.lane.b32.xlu1 %v5125_v4, %s5331_s20  ;;  %v3051_v4 = vmul.f32 %v3042_v7, %v7519_v51  ;;  %v3240_v7 = vsel %vm8812_vm11, %v8811_v42, %v8810_v23  ;;  %vm8877_vm11 = vcmask 719872  }
 0x464   : > { %5121 = vrot.lane.b32.xlu0 %v5120_v41, %s5332_s25  ;;  %v5145_v17 = vpack.i.bf16 %v3119_v10, %v3116_v45  ;;  %v3249_v49 = vmul.f32 %v3240_v7, %v7519_v51  ;;  %v8815_v45 = vld [vmem:[#allocation31_spill] sm:$0xff]  ;;  %v3248_v10 = vmul.f32 %v8811_v42, %v7521_v48  ;;  %vm8878_vm9 = vmmov %vm8877_vm11 }
 0x465   : > { %v5130_v41 = vpack.i.bf16 %v3052_v0, %v3051_v4  ;;  %v3250_v4 = vmul.f32 %v3241_v24, %v7547_v28  ;;  %v8844_v24 = vld [vmem:[#allocation55_spill] sm:$0xff] }
 0x467   : > { %3002 = vrot.lane.b32.xlu1 %v2988_v62, %s5331_s20  ;;  %v8808_v62 = vld [vmem:[#allocation26_spill] sm:$0xff] }
 0x468   : > { %2936 = vrot.lane.b32.xlu0 %v2922_v6, %s5332_s25  ;;  %v3044_v55 = vsel %vm420_vm8, %v8805_v37, %v8808_v62  ;;  %v3120_v37 = vmul.f32 %v8806_v39, %v7521_v48  ;;  %v3054_v0 = vmul.f32 %v8808_v62, %v7521_v48  ;;  %v5155_v39 = vpack.i.bf16 %v3250_v4, %v3249_v49 }
 0x469   : > { %v3053_v38 = vmul.f32 %v3044_v55, %v7549_v57  ;;  %v3252_v62 = vmul.f32 %v8815_v45, %v7521_v48 }
 0x46b   : > { %5136 = vrot.lane.b32.xlu1 %v5135_v25, %s8593_s29  ;;  %v5140_v6 = vpack.i.bf16 %v3053_v38, %v3050_v18  ;;  %v3242_v25 = vsel %vm8816_vm10, %v8813_v63, %v8815_v45  ;;  %v8819_v38 = vld [vmem:[#allocation32_spill] sm:$0xff]  ;;  %v8843_v63 = vld [vmem:[#allocation58_spill] sm:$0xff]  ;;  %vm8882_vm10 = vcmask 64512  }
 0x46c   : > { %5131 = vrot.lane.b32.xlu0 %v5130_v41, %s8809_s30  ;;  %v3251_v55 = vmul.f32 %v3242_v25, %v7549_v57  ;;  %v8817_v41 = vpack.i.bf16 %v7807_v15, %v7731_v50  ;;  %v3186_v23 = vmul.f32 %v8819_v38, %v7521_v48  ;;  %v8820_v15 = vpack.i.bf16 %v7816_v30, %v7739_v58  ;;  %v8825_v30 = vld [vmem:[#allocation36_spill] sm:$0xff] }
 0x46d   : > { %v8821_v50 = vpack.i.bf16 %v7820_v61, %v7743_v53  ;;  %v8824_v58 = vpack.i.bf16 %v7640_v20, %v7636_v52  ;;  %v3414_v7 = vmul.f32 %v8825_v30, %v7519_v51  ;;  %v8826_v53 = vpack.i.bf16 %v7848_v16, %v7844_v31  ;;  %v8829_v20 = vld [vmem:[#allocation35_spill] sm:$0xff]  ;;  %v8831_v31 = vld [vmem:[#allocation38_spill] sm:$0xff] }
 0x46e   : > { %v5165_v18 = vpack.i.bf16 %v3251_v55, %v3248_v10  ;;  %v8827_v61 = vpack.i.bf16 %v7560_v43, %v7557_v34  ;;  %v8828_v52 = vpack.i.bf16 %v7856_v33, %v7852_v29  ;;  %v3546_v16 = vmul.f32 %v8831_v31, %v7519_v51  ;;  %v8850_v55 = vld [vmem:[#allocation61_spill] sm:$0xff]  ;;  %v8857_v30 = vld [vmem:[#allocation27_spill] sm:$0xff] }
 0x46f   : > { %5146 = vrot.lane.b32.xlu1 %v5145_v17, %s8593_s29  ;;  %v8818_v17 = vpack.i.bf16 %v7812_v13, %v7727_v46  ;;  %v8822_v46 = vpack.i.bf16 %v7840_v8, %v7828_v3  ;;  %v8823_v13 = vld [vmem:[#allocation34_spill] sm:$0xff]  ;;  %v3480_v3 = vmul.f32 %v8829_v20, %v7519_v51  ;;  %v8830_v8 = vpack.i.bf16 %v7567_v22, %v7564_v14  ;;  %v8835_v22 = vld [vmem:[#allocation37_spill] sm:$0xff] }
 0x470   : > { %5141 = vrot.lane.b32.xlu0 %v5140_v6, %s8809_s30  ;;  %v3318_v42 = vmul.f32 %v8823_v13, %v7521_v48  ;;  %v8832_v34 = vpack.i.bf16 %v7864_v9, %v7860_v40  ;;  %v8833_v43 = vpack.i.bf16 %v7574_v35, %v7571_v21  ;;  %v8834_v14 = vpack.i.bf16 %v7747_v59, %v7868_v1  ;;  %v8837_v40 = vld [vmem:[#allocation67_spill] sm:$0xff]  ;;  %v8840_v59 = vld [vmem:[#allocation54_spill] sm:$0xff]  ;;  %v8841_v9 = vld [vmem:[#allocation53_spill] sm:$0xff] }
 0x471   : > { %v3612_v33 = vmul.f32 %v8835_v22, %v7519_v51  ;;  %v8836_v29 = vpack.i.bf16 %v7623_v32, %v7619_v5  ;;  %v8838_v21 = vpack.i.bf16 %v7751_v12, %v8837_v40  ;;  %v8839_v35 = vpack.i.bf16 %v7765_v54, %v7880_v56  ;;  %v8847_v56 = vld [vmem:[#allocation11_spill] sm:$0xff] }
 0x472   : > { %v8842_v1 = vpack.i.bf16 %v8840_v59, %v8841_v9  ;;  %v8845_v5 = vpack.i.bf16 %v8843_v63, %v8844_v24  ;;  %v8846_v12 = vpack.i.bf16 %v7769_v60, %v7896_v26  ;;  %v8848_v54 = vpack.i.bf16 %v7773_v11, %v8847_v56  ;;  %v8852_v60 = vld [vmem:[#allocation65_spill] sm:$0xff]  ;;  %v8853_v26 = vld [vmem:[#allocation63_spill] sm:$0xff] }
 0x473   : > { %3134 = vrot.lane.b32.xlu1 %v3120_v37, %s8593_s29  ;;  %v8865_v22 = vld [vmem:[#allocation95_spill] sm:$0xff] }
 0x474   : > { %3068 = vrot.lane.b32.xlu0 %v3054_v0, %s8809_s30 }
 0x477   : > { %5156 = vrot.lane.b32.xlu1 %v5155_v39, %s8589_s18  ;;  %v8849_v39 = vld [vmem:[#allocation62_spill] sm:$0xff] }
 0x478   : > { %5151 = vrot.lane.b32.xlu0 %v8817_v41, %s8592_s22  ;;  %v8854_v41 = vpack.i.bf16 %v8852_v60, %v8853_v26  ;;  %v8874_v60 = vld [vmem:[#allocation64_spill] sm:$0xff] }
 0x479   : > { %v4140_v26 = vmul.f32 %v8874_v60, %v7519_v51 }
 0x47b   : > { %5166 = vrot.lane.b32.xlu1 %v5165_v18, %s8589_s18  ;;  %v8851_v18 = vpack.i.bf16 %v8849_v39, %v8850_v55  ;;  %v8872_v55 = vld [vmem:[#allocation96_spill] sm:$0xff] }
 0x47c   : > { %5161 = vrot.lane.b32.xlu0 %v8818_v17, %s8592_s22 }
 0x47f   : > { %3266 = vrot.lane.b32.xlu1 %v3252_v62, %s8589_s18 }
 0x480   : > { %3200 = vrot.lane.b32.xlu0 %v3186_v23, %s8592_s22 }
 0x483   : > { %5176 = vrot.lane.b32.xlu1 %v8820_v15, %s8588_s16 }
 0x484   : > { %5171 = vrot.lane.b32.xlu0 %v8821_v50, %s8588_s16 }
 0x487   : > { %5181 = vrot.lane.b32.xlu1 %v8822_v46, %s8564_s15 }
 0x488   : > { %3332 = vrot.lane.b32.xlu0 %v3318_v42, %s8588_s16  ;;  %v8856_v42 = vpack.i.bf16 %v7783_v36, %v7904_v27 }
 0x48b   : > { %5191 = vrot.lane.b32.xlu1 %v8824_v58, %s8564_s15 }
 0x48c   : > { %5186 = vrot.lane.b32.xlu0 %v8826_v53, %s8560_s24 }
 0x48f   : > { %3428 = vrot.lane.b32.xlu1 %v3414_v7, %s8564_s15  ;;  %v8858_v7 = vld [vmem:[#allocation68_spill] sm:$0xff] }
 0x490   : > { %5196 = vrot.lane.b32.xlu0 %v8827_v61, %s8560_s24  ;;  %v8859_v53 = vpack.i.bf16 %v8857_v30, %v8858_v7 }
 0x493   : > { %5201 = vrot.lane.b32.xlu1 %v8828_v52, %s8572_s23 }
 0x494   : > { %3494 = vrot.lane.b32.xlu0 %v3480_v3, %s8560_s24 }
 0x497   : > { %5211 = vrot.lane.b32.xlu1 %v8830_v8, %s8572_s23 }
 0x498   : > { %5206 = vrot.lane.b32.xlu0 %v8832_v34, %s8570_s27  ;;  %v8862_v34 = vld [vmem:[#allocation93_spill] sm:$0xff] }
 0x49b   : > { %3560 = vrot.lane.b32.xlu1 %v3546_v16, %s8572_s23 }
 0x49c   : > { %5216 = vrot.lane.b32.xlu0 %v8833_v43, %s8570_s27  ;;  %v8863_v43 = vld [vmem:[#allocation92_spill] sm:$0xff] }
 0x49f   : > { %5221 = vrot.lane.b32.xlu1 %v8834_v14, %s8615_s19  ;;  %v8864_v14 = vpack.i.bf16 %v8862_v34, %v8863_v43  ;;  %v8879_v34 = vld [vmem:[#allocation10_spill] sm:$0xff] }
 0x4a0   : > { %3626 = vrot.lane.b32.xlu0 %v3612_v33, %s8570_s27  ;;  %v8866_v33 = vld [vmem:[#allocation94_spill] sm:$0xff]  ;;  %v8880_v43 = vpack.i.bf16 %v7795_v19, %v8879_v34  ;;  %s8921_s27 = sshll.u32 %s8923_s14, 5 }
 0x4a1   : > { %s359_s29 = scalar_lea.vmem %s8386_s10, %s8921_s27 }
 0x4a3   : > { %5231 = vrot.lane.b32.xlu1 %v8836_v29, %s8615_s19  ;;  %v8867_v29 = vpack.i.bf16 %v8865_v22, %v8866_v33 }
 0x4a4   : > { %5226 = vrot.lane.b32.xlu0 %v8838_v21, %s8612_s28  ;;  %v8868_v21 = vld [vmem:[#allocation82_spill] sm:$0xff] }
 0x4a7   : > { %5241 = vrot.lane.b32.xlu1 %v8839_v35, %s8611_s21  ;;  %v4074_v35 = vmul.f32 %v8868_v21, %v7519_v51 }
 0x4a8   : > { %5236 = vrot.lane.b32.xlu0 %v8842_v1, %s8612_s28 }
 0x4ab   : > { %5251 = vrot.lane.b32.xlu1 %v8845_v5, %s8611_s21 }
 0x4ac   : > { %5246 = vrot.lane.b32.xlu0 %v8846_v12, %s5335_s12 }
 0x4ad   : > { %v5027_v32 = vpop.permute.xlu1 %5026 }
 0x4ae   : > { %v5029_v37 = vunpack.i.h.bf16 %v5027_v32  ;;  %v5028_v49 = vunpack.i.l.bf16 %v5027_v32  ;;  %v5022_v6 = vpop.permute.xlu0 %5021 }
 0x4af   : > { %5261 = vrot.lane.b32.xlu1 %v8848_v54, %s5334_s11  ;;  %v5024_v45 = vunpack.i.h.bf16 %v5022_v6  ;;  %v5023_v25 = vunpack.i.l.bf16 %v5022_v6 }
 0x4b0   : > { %v2609_v10 = vsel %vm8795_vm12, %v5028_v49, %v5029_v37  ;;  %5256 = vrot.lane.b32.xlu0 %v8851_v18, %s5335_s12 }
 0x4b1   : > { %v5037_v4 = vpop.permute.xlu1 %5036  ;;  %v2543_v11 = vsel %vm420_vm8, %v5023_v25, %v5024_v45 }
 0x4b2   : > { %v5038_v0 = vunpack.i.l.bf16 %v5037_v4  ;;  %v5039_v62 = vunpack.i.h.bf16 %v5037_v4  ;;  %v5032_v17 = vpop.permute.xlu0 %5031  ;;  %v4344_v38 = vpack.c.bf16 %v2609_v10, %v2543_v11 }
 0x4b3   : > { %5271 = vrot.lane.b32.xlu1 %v8854_v41, %s5334_s11  ;;  %v5034_v50 = vunpack.i.h.bf16 %v5032_v17  ;;  %v5033_v46 = vunpack.i.l.bf16 %v5032_v17  ;;  %v8875_v41 = vld [vmem:[#allocation66_spill] sm:$0xff]  ;;  %v8876_v17 = vpack.i.bf16 %v7928_v47, %v7787_v2 }
 0x4b4   : > { %v2608_v15 = vsel %vm8855_vm13, %v5038_v0, %v5028_v49  ;;  %5266 = vrot.lane.b32.xlu0 %v8856_v42, %s5333_s26  ;;  %4426 = vmatprep.subr.bf16.mxu0 %v4344_v38  ;;  %v2610_v61 = vsel %vm8860_vm14, %v5029_v37, %v5039_v62  ;;  %v8869_v49 = vld [vmem:[#allocation77_spill] sm:$0xff]  ;;  %v4206_v11 = vmul.f32 %v8875_v41, %v7519_v51  ;;  %v8223_v38 = vld [vmem:[%s8382_s6] sm:$0xff]  ;;  %vm8884_vm13 = vmmov %vm8882_vm10 }
 0x4b5   : > { %v8166_v23 = vpop.permute.xlu1 %5046  ;;  %v2542_v58 = vsel %vm420_vm8, %v5033_v46, %v5023_v25  ;;  %v2544_v52 = vsel %vm420_vm8, %v5024_v45, %v5034_v50  ;;  %v8870_v12 = vpack.i.bf16 %v7924_v44, %v8869_v49  ;;  %v8871_v44 = vld [vmem:[#allocation97_spill] sm:$0xff] }
 0x4b6   : > { %v5048_v13 = vunpack.i.l.bf16 %v8166_v23  ;;  %v4343_v20 = vpack.c.bf16 %v2608_v15, %v2542_v58  ;;  %v8181_v3 = vpop.permute.xlu0 %5041  ;;  %v4345_v59 = vpack.c.bf16 %v2610_v61, %v2544_v52  ;;  %v8873_v18 = vpack.i.bf16 %v8871_v44, %v8872_v55 }
 0x4b7   : > { %5281 = vrot.lane.b32.xlu1 %v8859_v53, %s5332_s25  ;;  %v5043_v31 = vunpack.i.l.bf16 %v8181_v3  ;;  %v4693_v58 = vcombine.high %v8223_v38, %v8223_v38 }
 0x4b8   : > { %v2611_v16 = vsel %vm8861_vm7, %v5039_v62, %v5048_v13  ;;  %5276 = vrot.lane.b32.xlu0 %v8864_v14, %s5333_s26  ;;  %4427 = vmatpush1.bf16.msra.mxu0 %v4343_v20  ;;  %v4399_v14 = vld [vmem:[%s8383_s7] sm:$0xff] }
 0x4b9   : > { %v5057_v8 = vpop.permute.xlu1 %5056  ;;  %v2545_v40 = vsel %vm420_vm8, %v5034_v50, %v5043_v31  ;;  %4695 = vmatprep.mubr.msk.bf16.mxu0 %vm8877_vm11, %v4693_v58  ;;  %4697 = vmatprep.mubr.msk.bf16.mxu1 %vm8878_vm9, %v4693_v58  ;;  %vm8887_vm11 = vmmov %vm8882_vm10 }
 0x4ba   : > { %v5059_v36 = vunpack.i.h.bf16 %v5057_v8  ;;  %v5058_v27 = vunpack.i.l.bf16 %v5057_v8  ;;  %v5052_v9 = vpop.permute.xlu0 %5051  ;;  %v4346_v1 = vpack.c.bf16 %v2611_v16, %v2545_v40  ;;  %vm8888_vm9 = vmmov %vm8882_vm10 }
 0x4bb   : > { %5291 = vrot.lane.b32.xlu1 %v8867_v29, %s5332_s25  ;;  %v5054_v24 = vunpack.i.h.bf16 %v5052_v9  ;;  %v5053_v5 = vunpack.i.l.bf16 %v5052_v9 }
 0x4bc   : > { %v2741_v37 = vsel %vm627_vm5, %v5058_v27, %v5059_v36  ;;  %5286 = vrot.lane.b32.xlu0 %v8870_v12, %s5331_s20  ;;  %4467 = vmatprep.subr.bf16.mxu1 %v4346_v1 }
 0x4bd   : > { %v5067_v63 = vpop.permute.xlu1 %5066  ;;  %4468 = vmatpush1.bf16.msra.mxu1 %v4345_v59  ;;  %v2675_v56 = vsel %vm558_vm6, %v5053_v5, %v5054_v24 }
 0x4be   : > { %v5068_v32 = vunpack.i.l.bf16 %v5067_v63  ;;  %v5069_v54 = vunpack.i.h.bf16 %v5067_v63  ;;  %v5062_v6 = vpop.permute.xlu0 %5061  ;;  %v4348_v4 = vpack.c.bf16 %v2741_v37, %v2675_v56 }
 0x4bf   : > { %4088 = vrot.lane.b32.xlu1 %v4074_v35, %s5332_s25  ;;  %v5064_v0 = vunpack.i.h.bf16 %v5062_v6  ;;  %v5063_v10 = vunpack.i.l.bf16 %v5062_v6 }
 0x4c0   : > { %v2740_v25 = vsel %vm627_vm5, %v5068_v32, %v5058_v27  ;;  %5296 = vrot.lane.b32.xlu0 %v8873_v18, %s5331_s20  ;;  %4428 = vmatprep.subr.bf16.mxu0 %v4348_v4  ;;  %v2742_v15 = vsel %vm627_vm5, %v5059_v36, %v5069_v54 }
 0x4c1   : > { %v8203_v45 = vpop.permute.xlu1 %5076  ;;  %v2674_v62 = vsel %vm558_vm6, %v5063_v10, %v5053_v5  ;;  %v2676_v50 = vsel %vm558_vm6, %v5054_v24, %v5064_v0 }
 0x4c2   : > { %v5078_v39 = vunpack.i.l.bf16 %v8203_v45  ;;  %v4347_v46 = vpack.c.bf16 %v2740_v25, %v2674_v62  ;;  %v8227_v13 = vpop.permute.xlu0 %5071  ;;  %v4349_v61 = vpack.c.bf16 %v2742_v15, %v2676_v50 }
 0x4c3   : > { %5301 = vrot.lane.b32.xlu1 %v8876_v17, %s8809_s30  ;;  %v5073_v30 = vunpack.i.l.bf16 %v8227_v13 }
 0x4c4   : > { %v2743_v7 = vsel %vm627_vm5, %v5069_v54, %v5078_v39  ;;  %4154 = vrot.lane.b32.xlu0 %v4140_v26, %s5331_s20  ;;  %4429 = vmatpush1.bf16.msra.mxu0 %v4347_v46 }
 0x4c5   : > { %v5087_v42 = vpop.permute.xlu1 %5086  ;;  %v2677_v53 = vsel %vm558_vm6, %v5064_v0, %v5073_v30 }
 0x4c6   : > { %v5089_v2 = vunpack.i.h.bf16 %v5087_v42  ;;  %v5088_v47 = vunpack.i.l.bf16 %v5087_v42  ;;  %v5082_v52 = vpop.permute.xlu0 %5081  ;;  %v4350_v20 = vpack.c.bf16 %v2743_v7, %v2677_v53 }
 0x4c7   : > { %4220 = vrot.lane.b32.xlu1 %v4206_v11, %s8809_s30  ;;  %v5084_v31 = vunpack.i.h.bf16 %v5082_v52  ;;  %v5083_v36 = vunpack.i.l.bf16 %v5082_v52 }
 0x4c8   : > { %v2873_v16 = vsel %vm598_vm3, %v5088_v47, %v5089_v2  ;;  %5306 = vrot.lane.b32.xlu0 %v8880_v43, %s8809_s30  ;;  %4469 = vmatprep.subr.bf16.mxu1 %v4350_v20 }
 0x4c9   : > { %v5097_v8 = vpop.permute.xlu1 %5096  ;;  %4470 = vmatpush1.bf16.msra.mxu1 %v4349_v61  ;;  %v2807_v22 = vsel %vm667_vm4, %v5083_v36, %v5084_v31 }
 0x4ca   : > { %v5098_v27 = vunpack.i.l.bf16 %v5097_v8  ;;  %v5099_v33 = vunpack.i.h.bf16 %v5097_v8  ;;  %v5092_v29 = vpop.permute.xlu0 %5091  ;;  %v4352_v40 = vpack.c.bf16 %v2873_v16, %v2807_v22 }
 0x4cb   : > { %v5094_v59 = vunpack.i.h.bf16 %v5092_v29  ;;  %v5093_v9 = vunpack.i.l.bf16 %v5092_v29 }
 0x4cc   : > { %v2872_v35 = vsel %vm598_vm3, %v5098_v27, %v5088_v47  ;;  %4402 = vperm.xlu0 %5018, %v4399_v14   ;;  %4430 = vmatprep.subr.bf16.mxu0 %v4352_v40  ;;  %v2874_v63 = vsel %vm598_vm3, %v5089_v2, %v5099_v33 }
 0x4cd   : > { %v8247_v21 = vpop.permute.xlu1 %5106  ;;  %v2806_v1 = vsel %vm667_vm4, %v5093_v9, %v5083_v36  ;;  %v2808_v24 = vsel %vm667_vm4, %v5084_v31, %v5094_v59 }
 0x4ce   : > { %v5108_v19 = vunpack.i.l.bf16 %v8247_v21  ;;  %v4351_v5 = vpack.c.bf16 %v2872_v35, %v2806_v1  ;;  %v8254_v32 = vpop.permute.xlu0 %5101  ;;  %v4353_v4 = vpack.c.bf16 %v2874_v63, %v2808_v24 }
 0x4cf   : > { %v5103_v49 = vunpack.i.l.bf16 %v8254_v32 }
 0x4d0   : > { %v2875_v54 = vsel %vm598_vm3, %v5099_v33, %v5108_v19  ;;  %4431 = vmatpush1.bf16.msra.mxu0 %v4351_v5 }
 0x4d1   : > { %v5117_v37 = vpop.permute.xlu1 %5116  ;;  %v2809_v6 = vsel %vm667_vm4, %v5094_v59, %v5103_v49 }
 0x4d2   : > { %v5119_v12 = vunpack.i.h.bf16 %v5117_v37  ;;  %v5118_v56 = vunpack.i.l.bf16 %v5117_v37  ;;  %v5112_v25 = vpop.permute.xlu0 %5111  ;;  %v4354_v0 = vpack.c.bf16 %v2875_v54, %v2809_v6 }
 0x4d3   : > { %v5114_v39 = vunpack.i.h.bf16 %v5112_v25  ;;  %v5113_v44 = vunpack.i.l.bf16 %v5112_v25 }
 0x4d4   : > { %v3005_v18 = vsel %vm460_vm1, %v5118_v56, %v5119_v12  ;;  %4471 = vmatprep.subr.bf16.mxu1 %v4354_v0 }
 0x4d5   : > { %v5127_v10 = vpop.permute.xlu1 %5126  ;;  %4472 = vmatpush1.bf16.msra.mxu1 %v4353_v4  ;;  %v2939_v60 = vsel %vm529_vm2, %v5113_v44, %v5114_v39 }
 0x4d6   : > { %v5128_v55 = vunpack.i.l.bf16 %v5127_v10  ;;  %v5129_v26 = vunpack.i.h.bf16 %v5127_v10  ;;  %v5122_v41 = vpop.permute.xlu0 %5121  ;;  %v4356_v11 = vpack.c.bf16 %v3005_v18, %v2939_v60 }
 0x4d7   : > { %v5124_v15 = vunpack.i.h.bf16 %v5122_v41  ;;  %v5123_v50 = vunpack.i.l.bf16 %v5122_v41 }
 0x4d8   : > { %v3004_v17 = vsel %vm460_vm1, %v5128_v55, %v5118_v56  ;;  %4432 = vmatprep.subr.bf16.mxu0 %v4356_v11  ;;  %v3006_v58 = vsel %vm460_vm1, %v5119_v12, %v5129_v26 }
 0x4d9   : > { %v3003_v62 = vpop.permute.xlu1 %3002  ;;  %v2938_v46 = vsel %vm529_vm2, %v5123_v50, %v5113_v44  ;;  %v2940_v30 = vsel %vm529_vm2, %v5114_v39, %v5124_v15 }
 0x4da   : > { %v3007_v42 = vsel %vm460_vm1, %v5129_v26, %v3003_v62  ;;  %v4355_v2 = vpack.c.bf16 %v3004_v17, %v2938_v46  ;;  %v2937_v47 = vpop.permute.xlu0 %2936  ;;  %v4357_v8 = vpack.c.bf16 %v3006_v58, %v2940_v30 }
 0x4db   : > { %v2941_v53 = vsel %vm529_vm2, %v5124_v15, %v2937_v47 }
 0x4dc   : > { %v4358_v20 = vpack.c.bf16 %v3007_v42, %v2941_v53  ;;  %4433 = vmatpush1.bf16.msra.mxu0 %v4355_v2  ;;  %v4678_v42 = vld [vmem:[%s8377_s1 + $0x25] ss:$8 sm:$0xf] }
 0x4dd   : > { %v5137_v7 = vpop.permute.xlu1 %5136 }
 0x4de   : > { %v5139_v61 = vunpack.i.h.bf16 %v5137_v7  ;;  %v5138_v52 = vunpack.i.l.bf16 %v5137_v7  ;;  %v5132_v31 = vpop.permute.xlu0 %5131  ;;  %4473 = vmatprep.subr.bf16.mxu1 %v4358_v20 }
 0x4df   : > { %v5134_v27 = vunpack.i.h.bf16 %v5132_v31  ;;  %v5133_v16 = vunpack.i.l.bf16 %v5132_v31  ;;  %4474 = vmatpush1.bf16.msra.mxu1 %v4357_v8  ;;  %v8890_v8 = vld [vmem:[#allocation6_spill] sm:$0xff] }
 0x4e0   : > { %v3137_v43 = vsel %vm1032_vm15, %v5138_v52, %v5139_v61  ;;  %v3355_v31 = vrot.slane %v4678_v42, %v8890_v8 }
 0x4e1   : > { %v5147_v36 = vpop.permute.xlu1 %5146  ;;  %v3071_v14 = vsel %vm391_vm0, %v5133_v16, %v5134_v27 }
 0x4e2   : > { %v5148_v34 = vunpack.i.l.bf16 %v5147_v36  ;;  %v5149_v22 = vunpack.i.h.bf16 %v5147_v36  ;;  %v5142_v33 = vpop.permute.xlu0 %5141  ;;  %v4360_v29 = vpack.c.bf16 %v3137_v43, %v3071_v14  ;;  %v8891_v14 = vld [vmem:[#allocation7_spill] sm:$0xff] }
 0x4e3   : > { %v5144_v59 = vunpack.i.h.bf16 %v5142_v33  ;;  %v5143_v9 = vunpack.i.l.bf16 %v5142_v33  ;;  %v8892_v33 = vld [vmem:[#allocation4_spill] sm:$0xff] }
 0x4e4   : > { %v3136_v35 = vsel %vm1032_vm15, %v5148_v34, %v5138_v52  ;;  %4434 = vmatprep.subr.bf16.mxu0 %v4360_v29  ;;  %v3138_v63 = vsel %vm1032_vm15, %v5139_v61, %v5149_v22  ;;  %v8889_v52 = vld [vmem:[#allocation5_spill] sm:$0xff]  ;;  %v3359_v29 = vrot.slane %v4678_v42, %v8892_v33 }
 0x4e5   : > { %v3135_v40 = vpop.permute.xlu1 %3134  ;;  %v3070_v19 = vsel %vm391_vm0, %v5143_v9, %v5133_v16  ;;  %v3072_v24 = vsel %vm391_vm0, %v5134_v27, %v5144_v59  ;;  %v3351_v20 = vrot.slane %v4678_v42, %v8889_v52  ;;  %v3369_v9 = vmul.f32 %v3355_v31, %v7547_v28 }
 0x4e6   : > { %v3139_v1 = vsel %vm1032_vm15, %v5149_v22, %v3135_v40  ;;  %v4359_v5 = vpack.c.bf16 %v3136_v35, %v3070_v19  ;;  %v3069_v37 = vpop.permute.xlu0 %3068  ;;  %v4361_v4 = vpack.c.bf16 %v3138_v63, %v3072_v24  ;;  %vm8881_vm15 = vcmask 56320  }
 0x4e7   : > { %v3073_v12 = vsel %vm391_vm0, %v5144_v59, %v3069_v37  ;;  %vm8883_vm12 = vmmov %vm8881_vm15  ;;  %v3363_v22 = vrot.slane %v4678_v42, %v8891_v14  ;;  %v3368_v59 = vmul.f32 %v3351_v20, %v7519_v51 }
 0x4e8   : > { %v4362_v6 = vpack.c.bf16 %v3139_v1, %v3073_v12  ;;  %4435 = vmatpush1.bf16.msra.mxu0 %v4359_v5  ;;  %vm8885_vm14 = vmmov %vm8883_vm12 }
 0x4e9   : > { %v5157_v49 = vpop.permute.xlu1 %5156  ;;  %vm8886_vm7 = vmmov %vm8883_vm12  ;;  %v3371_v5 = vmul.f32 %v3363_v22, %v7521_v48 }
 0x4ea   : > { %v5159_v56 = vunpack.i.h.bf16 %v5157_v49  ;;  %v5158_v54 = vunpack.i.l.bf16 %v5157_v49  ;;  %v5152_v25 = vpop.permute.xlu0 %5151  ;;  %4475 = vmatprep.subr.bf16.mxu1 %v4362_v6 }
 0x4eb   : > { %v5154_v10 = vunpack.i.h.bf16 %v5152_v25  ;;  %v5153_v39 = vunpack.i.l.bf16 %v5152_v25  ;;  %4476 = vmatpush1.bf16.msra.mxu1 %v4361_v4 }
 0x4ec   : > { %v3269_v55 = vsel %vm8881_vm15, %v5158_v54, %v5159_v56  ;;  %vm8893_vm15 = vcmask 7168  }
 0x4ed   : > { %v5167_v0 = vpop.permute.xlu1 %5166  ;;  %v3203_v18 = vsel %vm8882_vm10, %v5153_v39, %v5154_v10  ;;  %vm8894_vm10 = vmmov %vm8893_vm15 }
 0x4ee   : > { %v5168_v44 = vunpack.i.l.bf16 %v5167_v0  ;;  %v5169_v60 = vunpack.i.h.bf16 %v5167_v0  ;;  %v5162_v26 = vpop.permute.xlu0 %5161  ;;  %v4364_v41 = vpack.c.bf16 %v3269_v55, %v3203_v18 }
 0x4ef   : > { %v5164_v17 = vunpack.i.h.bf16 %v5162_v26  ;;  %v5163_v15 = vunpack.i.l.bf16 %v5162_v26 }
 0x4f0   : > { %v3268_v62 = vsel %vm8883_vm12, %v5168_v44, %v5158_v54  ;;  %4436 = vmatprep.subr.bf16.mxu0 %v4364_v41  ;;  %v3270_v58 = vsel %vm8886_vm7, %v5159_v56, %v5169_v60  ;;  %vm8895_vm12 = vmmov %vm8894_vm10  ;;  %v3370_v56 = vmul.f32 %v3359_v29, %v7549_v57  ;;  %vm8898_vm7 = vcmask 990208  }
 0x4f1   : > { %v3267_v11 = vpop.permute.xlu1 %3266  ;;  %v3202_v50 = vsel %vm8884_vm13, %v5163_v15, %v5153_v39  ;;  %v3204_v30 = vsel %vm8887_vm11, %v5154_v10, %v5164_v17  ;;  %vm8896_vm13 = vmmov %vm8894_vm10 }
 0x4f2   : > { %v3271_v46 = vsel %vm8885_vm14, %v5169_v60, %v3267_v11  ;;  %v4363_v2 = vpack.c.bf16 %v3268_v62, %v3202_v50  ;;  %v3201_v47 = vpop.permute.xlu0 %3200  ;;  %v4365_v36 = vpack.c.bf16 %v3270_v58, %v3204_v30  ;;  %vm8897_vm14 = vcmask 1039360  }
 0x4f3   : > { %v3205_v53 = vsel %vm8888_vm9, %v5164_v17, %v3201_v47  ;;  %vm8899_vm11 = vmmov %vm8897_vm14 }
 0x4f4   : > { %v4366_v61 = vpack.c.bf16 %v3271_v46, %v3205_v53  ;;  %4437 = vmatpush1.bf16.msra.mxu0 %v4363_v2  ;;  %vm8900_vm9 = vmmov %vm8898_vm7 }
 0x4f5   : > { %v5177_v7 = vpop.permute.xlu1 %5176 }
 0x4f6   : > { %v5178_v27 = vunpack.i.l.bf16 %v5177_v7  ;;  %v5179_v16 = vunpack.i.h.bf16 %v5177_v7  ;;  %v5172_v34 = vpop.permute.xlu0 %5171  ;;  %4477 = vmatprep.subr.bf16.mxu1 %v4366_v61 }
 0x4f7   : > { %v5174_v40 = vunpack.i.h.bf16 %v5172_v34  ;;  %v5173_v35 = vunpack.i.l.bf16 %v5172_v34  ;;  %4478 = vmatpush1.bf16.msra.mxu1 %v4365_v36 }
 0x4f9   : > { %v5182_v43 = vpop.permute.xlu1 %5181  ;;  %v3334_v19 = vsel %vm8893_vm15, %v5178_v27, %v5173_v35  ;;  %v3335_v1 = vsel %vm8894_vm10, %v5173_v35, %v5174_v40  ;;  %v3336_v63 = vsel %vm8895_vm12, %v5174_v40, %v5179_v16  ;;  %vm8901_vm15 = vmmov %vm8898_vm7 }
 0x4fa   : > { %v4367_v24 = vpack.c.bf16 %v3368_v59, %v3334_v19  ;;  %v3333_v37 = vpop.permute.xlu0 %3332  ;;  %v4368_v49 = vpack.c.bf16 %v3369_v9, %v3335_v1  ;;  %v4369_v51 = vpack.c.bf16 %v3370_v56, %v3336_v63  ;;  %v5184_v28 = vunpack.i.h.bf16 %v5182_v43  ;;  %vm8902_vm10 = vmmov %vm8899_vm11 }
 0x4fb   : > { %v3337_v54 = vsel %vm8896_vm13, %v5179_v16, %v3333_v37  ;;  %v5183_v4 = vunpack.i.l.bf16 %v5182_v43  ;;  %vm8903_vm12 = vmmov %vm8898_vm7 }
 0x4fc   : > { %v4370_v6 = vpack.c.bf16 %v3371_v5, %v3337_v54  ;;  %4438 = vmatprep.subr.bf16.mxu0 %v4368_v49  ;;  %vm8904_vm13 = vmmov %vm8902_vm10 }
 0x4fd   : > { %v5192_v12 = vpop.permute.xlu1 %5191  ;;  %4439 = vmatpush1.bf16.msra.mxu0 %v4367_v24  ;;  %v3431_v44 = vsel %vm8897_vm14, %v5183_v4, %v5184_v28  ;;  %vm8905_vm14 = vcmask 982016  }
 0x4fe   : > { %v5187_v25 = vpop.permute.xlu0 %5186  ;;  %4479 = vmatprep.subr.bf16.mxu1 %v4370_v6  ;;  %v5193_v48 = vunpack.i.l.bf16 %v5192_v12  ;;  %v5194_v11 = vunpack.i.h.bf16 %v5192_v12 }
 0x4ff   : > { %v5189_v10 = vunpack.i.h.bf16 %v5187_v25  ;;  %v5188_v39 = vunpack.i.l.bf16 %v5187_v25  ;;  %4480 = vmatpush1.bf16.msra.mxu1 %v4369_v51  ;;  %v5049_v51 = vunpack.i.h.bf16 %v8166_v23 }
 0x500   : > { %v3430_v62 = vsel %vm8899_vm11, %v5193_v48, %v5183_v4  ;;  %v3432_v2 = vsel %vm8904_vm13, %v5184_v28, %v5194_v11  ;;  %vm8907_vm11 = vmmov %vm8905_vm14  ;;  %v5044_v28 = vunpack.i.h.bf16 %v8181_v3 }
 0x501   : > { %v3429_v0 = vpop.permute.xlu1 %3428  ;;  %v3497_v55 = vsel %vm8898_vm7, %v5188_v39, %v5189_v10  ;;  %vm8906_vm7 = vcmask 973824  }
 0x502   : > { %v5197_v57 = vpop.permute.xlu0 %5196  ;;  %v4372_v18 = vpack.c.bf16 %v3497_v55, %v3431_v44  ;;  %v3433_v58 = vsel %vm8902_vm10, %v5194_v11, %v3429_v0  ;;  %vm8910_vm10 = vmmov %vm8907_vm11 }
 0x503   : > { %v5199_v26 = vunpack.i.h.bf16 %v5197_v57  ;;  %v5198_v41 = vunpack.i.l.bf16 %v5197_v57  ;;  %vm8912_vm13 = vmmov %vm8910_vm10 }
 0x504   : > { %4440 = vmatprep.subr.bf16.mxu0 %v4372_v18 }
 0x505   : > { %v5202_v60 = vpop.permute.xlu1 %5201  ;;  %v3496_v17 = vsel %vm8900_vm9, %v5198_v41, %v5188_v39  ;;  %v3498_v15 = vsel %vm8901_vm15, %v5189_v10, %v5199_v26  ;;  %vm8908_vm9 = vmmov %vm8906_vm7 }
 0x506   : > { %v4371_v50 = vpack.c.bf16 %v3496_v17, %v3430_v62  ;;  %v3495_v46 = vpop.permute.xlu0 %3494  ;;  %v4373_v7 = vpack.c.bf16 %v3498_v15, %v3432_v2  ;;  %v5204_v53 = vunpack.i.h.bf16 %v5202_v60  ;;  %v5203_v61 = vunpack.i.l.bf16 %v5202_v60  ;;  %vm8909_vm15 = vmmov %vm8906_vm7 }
 0x507   : > { %v3499_v30 = vsel %vm8903_vm12, %v5199_v26, %v3495_v46  ;;  %vm8911_vm12 = vmmov %vm8906_vm7  ;;  %v5079_v2 = vunpack.i.h.bf16 %v8203_v45 }
 0x508   : > { %v4374_v47 = vpack.c.bf16 %v3499_v30, %v3433_v58  ;;  %4441 = vmatpush1.bf16.msra.mxu0 %v4371_v50  ;;  %v3563_v27 = vsel %vm8905_vm14, %v5203_v61, %v5204_v53  ;;  %vm8913_vm14 = vcmask 588800  }
 0x509   : > { %v5212_v42 = vpop.permute.xlu1 %5211 }
 0x50a   : > { %v5207_v52 = vpop.permute.xlu0 %5206  ;;  %4481 = vmatprep.subr.bf16.mxu1 %v4374_v47  ;;  %v5213_v36 = vunpack.i.l.bf16 %v5212_v42  ;;  %v5214_v29 = vunpack.i.h.bf16 %v5212_v42  ;;  %v5074_v47 = vunpack.i.h.bf16 %v8227_v13 }
 0x50b   : > { %v5209_v8 = vunpack.i.h.bf16 %v5207_v52  ;;  %v5208_v31 = vunpack.i.l.bf16 %v5207_v52  ;;  %4482 = vmatpush1.bf16.msra.mxu1 %v4373_v7 }
 0x50c   : > { %v3562_v40 = vsel %vm8907_vm11, %v5213_v36, %v5203_v61  ;;  %v3564_v5 = vsel %vm8912_vm13, %v5204_v53, %v5214_v29 }
 0x50d   : > { %v3561_v20 = vpop.permute.xlu1 %3560  ;;  %v3629_v16 = vsel %vm8906_vm7, %v5208_v31, %v5209_v8  ;;  %vm8914_vm7 = vmmov %vm8913_vm14 }
 0x50e   : > { %v5217_v34 = vpop.permute.xlu0 %5216  ;;  %v4376_v43 = vpack.c.bf16 %v3629_v16, %v3563_v27  ;;  %v3565_v63 = vsel %vm8910_vm10, %v5214_v29, %v3561_v20  ;;  %vm8915_vm11 = vmmov %vm8914_vm7 }
 0x50f   : > { %v5219_v22 = vunpack.i.h.bf16 %v5217_v34  ;;  %v5218_v33 = vunpack.i.l.bf16 %v5217_v34 }
 0x510   : > { %4442 = vmatprep.subr.bf16.mxu0 %v4376_v43 }
 0x511   : > { %v5222_v14 = vpop.permute.xlu1 %5221  ;;  %v3628_v35 = vsel %vm8908_vm9, %v5218_v33, %v5208_v31  ;;  %v3630_v59 = vsel %vm8909_vm15, %v5209_v8, %v5219_v22  ;;  %vm8916_vm9 = vmmov %vm8914_vm7 }
 0x512   : > { %v4375_v9 = vpack.c.bf16 %v3628_v35, %v3562_v40  ;;  %v3627_v19 = vpop.permute.xlu0 %3626  ;;  %v4377_v49 = vpack.c.bf16 %v3630_v59, %v3564_v5  ;;  %v5224_v12 = vunpack.i.h.bf16 %v5222_v14  ;;  %v5223_v56 = vunpack.i.l.bf16 %v5222_v14 }
 0x513   : > { %v3631_v24 = vsel %vm8911_vm12, %v5219_v22, %v3627_v19 }
 0x514   : > { %v4378_v37 = vpack.c.bf16 %v3631_v24, %v3565_v63  ;;  %4443 = vmatpush1.bf16.msra.mxu0 %v4375_v9  ;;  %v3694_v39 = vsel %vm420_vm8, %v5224_v12, %v5044_v28  ;;  %v3695_v44 = vsel %vm420_vm8, %v5044_v28, %v5223_v56  ;;  %v5104_v63 = vunpack.i.h.bf16 %v8254_v32 }
 0x515   : > { %v5232_v1 = vpop.permute.xlu1 %5231 }
 0x516   : > { %v5227_v54 = vpop.permute.xlu0 %5226  ;;  %4483 = vmatprep.subr.bf16.mxu1 %v4378_v37  ;;  %v5234_v0 = vunpack.i.h.bf16 %v5232_v1  ;;  %v5233_v10 = vunpack.i.l.bf16 %v5232_v1  ;;  %v5109_v1 = vunpack.i.h.bf16 %v8247_v21 }
 0x517   : > { %v5229_v4 = vunpack.i.h.bf16 %v5227_v54  ;;  %v5228_v25 = vunpack.i.l.bf16 %v5227_v54  ;;  %4484 = vmatpush1.bf16.msra.mxu1 %v4377_v49 }
 0x518   : > { %v3696_v3 = vsel %vm420_vm8, %v5223_v56, %v5233_v10  ;;  %v3697_v11 = vsel %vm420_vm8, %v5233_v10, %v5234_v0 }
 0x519   : > { %v5242_v6 = vpop.permute.xlu1 %5241  ;;  %v3760_v48 = vsel %vm8913_vm14, %v5229_v4, %v5049_v51  ;;  %v3761_v55 = vsel %vm8914_vm7, %v5049_v51, %v5228_v25 }
 0x51a   : > { %v4379_v57 = vpack.c.bf16 %v3760_v48, %v3694_v39  ;;  %v5237_v18 = vpop.permute.xlu0 %5236  ;;  %v4380_v60 = vpack.c.bf16 %v3761_v55, %v3695_v44  ;;  %v5244_v62 = vunpack.i.h.bf16 %v5242_v6  ;;  %v5243_v17 = vunpack.i.l.bf16 %v5242_v6 }
 0x51b   : > { %v5239_v23 = vunpack.i.h.bf16 %v5237_v18  ;;  %v5238_v41 = vunpack.i.l.bf16 %v5237_v18 }
 0x51c   : > { %4444 = vmatprep.subr.bf16.mxu0 %v4380_v60  ;;  %v3826_v20 = vsel %vm558_vm6, %v5244_v62, %v5074_v47  ;;  %v3827_v31 = vsel %vm558_vm6, %v5074_v47, %v5243_v17 }
 0x51d   : > { %v5252_v26 = vpop.permute.xlu1 %5251  ;;  %v3762_v15 = vsel %vm8915_vm11, %v5228_v25, %v5238_v41  ;;  %4445 = vmatpush1.bf16.msra.mxu0 %v4379_v57  ;;  %v3763_v50 = vsel %vm8916_vm9, %v5238_v41, %v5239_v23 }
 0x51e   : > { %v4381_v46 = vpack.c.bf16 %v3762_v15, %v3696_v3  ;;  %v5247_v42 = vpop.permute.xlu0 %5246  ;;  %v4382_v58 = vpack.c.bf16 %v3763_v50, %v3697_v11  ;;  %v5254_v61 = vunpack.i.h.bf16 %v5252_v26  ;;  %v5253_v52 = vunpack.i.l.bf16 %v5252_v26 }
 0x51f   : > { %v5249_v7 = vunpack.i.h.bf16 %v5247_v42  ;;  %v5248_v53 = vunpack.i.l.bf16 %v5247_v42 }
 0x520   : > { %4485 = vmatprep.subr.bf16.mxu1 %v4382_v58  ;;  %v3828_v14 = vsel %vm558_vm6, %v5243_v17, %v5253_v52  ;;  %v3829_v22 = vsel %vm558_vm6, %v5253_v52, %v5254_v61 }
 0x521   : > { %v5262_v30 = vpop.permute.xlu1 %5261  ;;  %v3892_v8 = vsel %vm627_vm5, %v5249_v7, %v5079_v2  ;;  %4486 = vmatpush1.bf16.msra.mxu1 %v4381_v46  ;;  %v3893_v36 = vsel %vm627_vm5, %v5079_v2, %v5248_v53 }
 0x522   : > { %v4383_v27 = vpack.c.bf16 %v3892_v8, %v3826_v20  ;;  %v5257_v16 = vpop.permute.xlu0 %5256  ;;  %v4384_v34 = vpack.c.bf16 %v3893_v36, %v3827_v31  ;;  %v5264_v33 = vunpack.i.h.bf16 %v5262_v30  ;;  %v5263_v29 = vunpack.i.l.bf16 %v5262_v30 }
 0x523   : > { %v5259_v43 = vunpack.i.h.bf16 %v5257_v16  ;;  %v5258_v13 = vunpack.i.l.bf16 %v5257_v16 }
 0x524   : > { %4446 = vmatprep.subr.bf16.mxu0 %v4384_v34  ;;  %v3958_v56 = vsel %vm667_vm4, %v5264_v33, %v5104_v63  ;;  %v3959_v6 = vsel %vm667_vm4, %v5104_v63, %v5263_v29  ;;  %v4692_v63 = vcombine.low %v8223_v38, %v8223_v38 }
 0x525   : > { %v5272_v45 = vpop.permute.xlu1 %5271  ;;  %v3894_v40 = vsel %vm627_vm5, %v5248_v53, %v5258_v13  ;;  %4447 = vmatpush1.bf16.msra.mxu0 %v4383_v27  ;;  %v3895_v35 = vsel %vm627_vm5, %v5258_v13, %v5259_v43 }
 0x526   : > { %v4385_v59 = vpack.c.bf16 %v3894_v40, %v3828_v14  ;;  %v5267_v9 = vpop.permute.xlu0 %5266  ;;  %v4386_v19 = vpack.c.bf16 %v3895_v35, %v3829_v22  ;;  %v5274_v49 = vunpack.i.h.bf16 %v5272_v45  ;;  %v5273_v12 = vunpack.i.l.bf16 %v5272_v45 }
 0x527   : > { %v5269_v24 = vunpack.i.h.bf16 %v5267_v9  ;;  %v5268_v5 = vunpack.i.l.bf16 %v5267_v9 }
 0x528   : > { %4487 = vmatprep.subr.bf16.mxu1 %v4386_v19  ;;  %v3960_v10 = vsel %vm667_vm4, %v5263_v29, %v5273_v12  ;;  %v3961_v39 = vsel %vm667_vm4, %v5273_v12, %v5274_v49 }
 0x529   : > { %v5282_v37 = vpop.permute.xlu1 %5281  ;;  %v4024_v54 = vsel %vm598_vm3, %v5269_v24, %v5109_v1  ;;  %4488 = vmatpush1.bf16.msra.mxu1 %v4385_v59  ;;  %v4025_v51 = vsel %vm598_vm3, %v5109_v1, %v5268_v5 }
 0x52a   : > { %v4387_v28 = vpack.c.bf16 %v4024_v54, %v3958_v56  ;;  %v5277_v4 = vpop.permute.xlu0 %5276  ;;  %v4388_v21 = vpack.c.bf16 %v4025_v51, %v3959_v6  ;;  %v5284_v48 = vunpack.i.h.bf16 %v5282_v37  ;;  %v5283_v44 = vunpack.i.l.bf16 %v5282_v37 }
 0x52b   : > { %v5279_v25 = vunpack.i.h.bf16 %v5277_v4  ;;  %v5278_v32 = vunpack.i.l.bf16 %v5277_v4 }
 0x52c   : > { %4448 = vmatprep.subr.bf16.mxu0 %v4388_v21  ;;  %v4091_v62 = vsel %vm529_vm2, %v5283_v44, %v5284_v48 }
 0x52d   : > { %v5292_v0 = vpop.permute.xlu1 %5291  ;;  %v4026_v55 = vsel %vm598_vm3, %v5268_v5, %v5278_v32  ;;  %4449 = vmatpush1.bf16.msra.mxu0 %v4387_v28  ;;  %v4027_v57 = vsel %vm598_vm3, %v5278_v32, %v5279_v25 }
 0x52e   : > { %v4389_v18 = vpack.c.bf16 %v4026_v55, %v3960_v10  ;;  %v5287_v60 = vpop.permute.xlu0 %5286  ;;  %v4390_v26 = vpack.c.bf16 %v4027_v57, %v3961_v39  ;;  %v5293_v11 = vunpack.i.l.bf16 %v5292_v0  ;;  %v5294_v30 = vunpack.i.h.bf16 %v5292_v0 }
 0x52f   : > { %v5289_v23 = vunpack.i.h.bf16 %v5287_v60  ;;  %v5288_v41 = vunpack.i.l.bf16 %v5287_v60  ;;  %v4509_v60 = vld [vmem:[%s8385_s9] sm:$0xff] }
 0x530   : > { %4489 = vmatprep.subr.bf16.mxu1 %v4390_v26  ;;  %v4090_v2 = vsel %vm529_vm2, %v5293_v11, %v5283_v44  ;;  %v4092_v36 = vsel %vm529_vm2, %v5284_v48, %v5294_v30 }
 0x531   : > { %v4089_v3 = vpop.permute.xlu1 %4088  ;;  %4490 = vmatpush1.bf16.msra.mxu1 %v4389_v18  ;;  %v4157_v17 = vsel %vm460_vm1, %v5288_v41, %v5289_v23 }
 0x532   : > { %v5297_v15 = vpop.permute.xlu0 %5296  ;;  %v4392_v50 = vpack.c.bf16 %v4157_v17, %v4091_v62  ;;  %v4093_v8 = vsel %vm529_vm2, %v5294_v30, %v4089_v3 }
 0x533   : > { %v5299_v46 = vunpack.i.h.bf16 %v5297_v15  ;;  %v5298_v42 = vunpack.i.l.bf16 %v5297_v15 }
 0x534   : > { %4450 = vmatprep.subr.bf16.mxu0 %v4392_v50  ;;  %v4508_v50 = vld [vmem:[%s8384_s8] sm:$0xff] }
 0x535   : > { %v5302_v58 = vpop.permute.xlu1 %5301  ;;  %v4156_v47 = vsel %vm460_vm1, %v5298_v42, %v5288_v41  ;;  %v4158_v61 = vsel %vm460_vm1, %v5289_v23, %v5299_v46 }
 0x536   : > { %v5304_v7 = vunpack.i.h.bf16 %v5302_v58  ;;  %v5303_v53 = vunpack.i.l.bf16 %v5302_v58  ;;  %v4391_v52 = vpack.c.bf16 %v4156_v47, %v4090_v2  ;;  %v4155_v20 = vpop.permute.xlu0 %4154  ;;  %v4393_v16 = vpack.c.bf16 %v4158_v61, %v4092_v36 }
 0x537   : > { %v4159_v31 = vsel %vm460_vm1, %v5299_v46, %v4155_v20  ;;  %vm8917_vm1 = vcmask 1043456  }
 0x538   : > { %v4394_v27 = vpack.c.bf16 %v4159_v31, %v4093_v8  ;;  %4451 = vmatpush1.bf16.msra.mxu0 %v4391_v52  ;;  %v4222_v34 = vsel %vm391_vm0, %v5303_v53, %v5304_v7  ;;  %vm8918_vm2 = vmmov %vm8917_vm1 }
 0x539   : > { %v4221_v14 = vpop.permute.xlu1 %4220  ;;  %v4395_v22 = vpack.c.bf16 %v4222_v34, %v4222_v34  ;;  %vm8919_vm3 = vmmov %vm8917_vm1 }
 0x53a   : > { %v5307_v45 = vpop.permute.xlu0 %5306  ;;  %4491 = vmatprep.subr.bf16.mxu1 %v4394_v27  ;;  %vm8920_vm4 = vmmov %vm8917_vm1 }
 0x53b   : > { %v5309_v43 = vunpack.i.h.bf16 %v5307_v45  ;;  %v5308_v13 = vunpack.i.l.bf16 %v5307_v45  ;;  %4492 = vmatpush1.bf16.msra.mxu1 %v4393_v16  ;;  %v4415_v19 = vsel %vm8919_vm3, %v4395_v22, 0 }
 0x53d   : > { %v4225_v33 = vsel %vm391_vm0, %v5309_v43, %v4221_v14  ;;  %v4223_v29 = vsel %vm391_vm0, %v5304_v7, %v5308_v13  ;;  %v4224_v40 = vsel %vm391_vm0, %v5308_v13, %v5309_v43 }
 0x53e   : > { %v4398_v35 = vpack.c.bf16 %v4225_v33, %v4225_v33  ;;  %v4396_v59 = vpack.c.bf16 %v4223_v29, %v4223_v29  ;;  %v4397_v9 = vpack.c.bf16 %v4224_v40, %v4224_v40 }
 0x540   : > { %4694 = vmatprep.subr.msk.bf16.mxu0 %vm8917_vm1, %v4396_v59  ;;  %4696 = vmatprep.subr.msk.bf16.mxu1 %vm8918_vm2, %v4398_v35  ;;  %v4421_v1 = vsel %vm8920_vm4, %v4397_v9, 0 }
 0x541   : > { %4453 = vmatpush1.bf16.msra.mxu0 %v4415_v19  ;;  %4494 = vmatpush1.bf16.msra.mxu1 %v4421_v1 }
 0x544   : > { %4459 = vmatmul.mubr.bf16.vlgmr.msra.gmra.mrb[4].mxu0 %v4692_v63  ;;  %4500 = vmatmul.mubr.bf16.vlgmr.msra.gmra.mrb[4].mxu1 %v4692_v63 }
 0x54b   : > { %v4403_v24 = vpop.permute.xlu0 %4402 }
 0x617   : > { %v4460_v5 = vpop.f32.mrb[4].mxu0  ;;  %v4501_v37 = vpop.f32.mrb[4].mxu1 }
 0x618   : > { %v4461_v49 = vadd.f32 %v4460_v5, %v4403_v24  ;;  %v4462_v12 = vpop.f32.mrb[5].mxu0  ;;  %v4503_v56 = vpop.f32.mrb[5].mxu1  ;;  %v4502_v54 = vadd.f32 %v4501_v37, %v4403_v24 }
 0x619   : > { %v4463_v6 = vadd.f32 %v4462_v12, %v4403_v24  ;;  %v4464_v51 = vpop.f32.mrb[6].mxu0  ;;  %v4505_v28 = vpop.f32.mrb[6].mxu1  ;;  %v4504_v38 = vadd.f32 %v4503_v56, %v4403_v24 }
 0x61a   : > { %v4516_v4 = vmul.f32 %v4461_v49, %v4461_v49  ;;  %v4465_v21 = vpop.f32.mrb[7].mxu0  ;;  %v4506_v25 = vpop.f32.mrb[7].mxu1  ;;  %v4518_v10 = vmul.f32 %v4502_v54, %v4502_v54 }
 0x61b   : > { %v4510_v32 = vadd.f32 %v4463_v6, %v4461_v49  ;;  %v4517_v0 = vmul.f32 %v4463_v6, %v4463_v6  ;;  %v4519_v44 = vmul.f32 %v4504_v38, %v4504_v38 }
 0x61d   : > { %v4520_v39 = vadd.f32 %v4517_v0, %v4516_v4  ;;  %v4511_v48 = vadd.f32 %v4510_v32, %v4502_v54 }
 0x61f   : > { %v4512_v55 = vadd.f32 %v4511_v48, %v4504_v38  ;;  %v4521_v57 = vadd.f32 %v4520_v39, %v4518_v10 }
 0x621   : > { %4513 = vadd.xlane.f32.xlu1 %v4512_v55  ;;  %v4522_v18 = vadd.f32 %v4521_v57, %v4519_v44 }
 0x623   : > { %4523 = vadd.xlane.f32.xlu0 %v4522_v18 }
 0x632   : > { %4547 = vperm.xlu1 %5019, %v4509_v60  }
 0x6ae   : > { %v4514_v26 = vpop.xlane.xlu1 %4513 }
 0x6af   : > { %v4515_v23 = vmul.f32 0.001953125, %v4514_v26 }
 0x6b0   : > { %v4524_v41 = vpop.xlane.xlu0 %4523 }
 0x6b1   : > { %v4525_v3 = vmul.f32 0.001953125, %v4524_v41  ;;  %v4526_v11 = vmul.f32 %v4515_v23, %v4515_v23  ;;  %v4531_v58 = vsub.f32 %v4461_v49, %v4515_v23  ;;  %v4532_v30 = vsub.f32 %v4463_v6, %v4515_v23 }
 0x6b2   : > { %v4533_v2 = vsub.f32 %v4502_v54, %v4515_v23  ;;  %v4534_v47 = vsub.f32 %v4504_v38, %v4515_v23  ;;  %v4548_v8 = vpop.permute.xlu1 %4547 }
 0x6b3   : > { %v4527_v62 = vsub.f32 %v4525_v3, %v4526_v11 }
 0x6b5   : > { %v4528_v17 = vmax.f32 %v4527_v62, 0.0 }
 0x6b7   : > { %v4529_v15 = vadd.f32 1e-05, %v4528_v17 }
 0x6b9   : > { %5316 = vrsqrt.f32 %v4529_v15 }
 0x6c3   : > { %v5317_v46 = vpop.eup %5316 }
 0x6c4   : > { %v4535_v42 = vmul.f32 %v5317_v46, %v4508_v50 }
 0x6c6   : > { %4538 = vperm.xlu0 %5018, %v4535_v42  }
 0x745   : > { %v4539_v7 = vpop.permute.xlu0 %4538 }
 0x746   : > { %v4541_v53 = vmul.f32 %v4539_v7, %v4531_v58  ;;  %v4542_v61 = vmul.f32 %v4539_v7, %v4532_v30  ;;  %v4543_v52 = vmul.f32 %v4539_v7, %v4533_v2  ;;  %v4544_v20 = vmul.f32 %v4539_v7, %v4534_v47 }
 0x748   : > { %v4550_v31 = vadd.f32 %v4548_v8, %v4541_v53  ;;  %v4551_v36 = vadd.f32 %v4548_v8, %v4542_v61  ;;  %v4552_v27 = vadd.f32 %v4548_v8, %v4543_v52  ;;  %v4553_v16 = vadd.f32 %v4548_v8, %v4544_v20 }
 0x74a   : > { %vm4554_vm0 = vcmp.ge.f32.partialorder %v4550_v31, 0.0  ;;  %vm4555_vm5 = vcmp.ge.f32.partialorder %v4551_v36, 0.0  ;;  %vm4556_vm6 = vcmp.ge.f32.partialorder %v4552_v27, 0.0  ;;  %vm4557_vm8 = vcmp.ge.f32.partialorder %v4553_v16, 0.0 }
 0x74b   : > { %v4558_v34 = vmul.f32 0.01, %v4550_v31  ;;  %v4559_v45 = vmul.f32 0.01, %v4551_v36  ;;  %v4560_v43 = vmul.f32 0.01, %v4552_v27 }
 0x74c   : > { %v4561_v13 = vmul.f32 0.01, %v4553_v16 }
 0x74d   : > { %v4562_v14 = vsel %vm4554_vm0, %v4550_v31, %v4558_v34  ;;  %v4563_v22 = vsel %vm4555_vm5, %v4551_v36, %v4559_v45  ;;  %v4564_v33 = vsel %vm4556_vm6, %v4552_v27, %v4560_v43 }
 0x74e   : > { %v4565_v29 = vsel %vm4557_vm8, %v4553_v16, %v4561_v13  ;;  %4566 = vst [vmem:[%s359_s29] sm:$0xff] %v4562_v14  ;;  %4567 = vst [vmem:[%s359_s29 + $0x8] sm:$0xff] %v4563_v22 }
 0x74f   : > { %4568 = vst [vmem:[%s359_s29 + $0x10] sm:$0xff] %v4564_v33  ;;  %4569 = vst [vmem:[%s359_s29 + $0x18] sm:$0xff] %v4565_v29 }
 0x750 PF: > { %s20_s13 = sadd.s32 1, %s5328_s13  }
 0x751   : > { %p17_p4 = scmp.ge.s32.totalorder %s20_s13, 4  }
 0x753   :  { %19 = sbr.rel (!%p17_p4) target bundleno = 1 (0x1), region = 116 }

</bundles_post_ra>
